<compile_context>
chip_gen: v7x
topology: tpu7x:2x2x1
jax: 0.10.0
libtpu: 0.0.40
codegen_flags: <defaults>
</compile_context>

<pallas_src>
import functools

import jax
import jax.numpy as jnp
from jax.experimental import pallas as pl
from jax.experimental.pallas import tpu as pltpu


# ----------------------------------------------------------------------------
# In-kernel GRU chunk recurrence (shared by encoder / decoder kernels)
# ----------------------------------------------------------------------------
def _gru_chunk(gi_scr, out_buf, h_carry, layer_idx, whh, bhh, lens, t0, Tc, B, H):
    """Run one GRU layer over a Tc-step chunk.

    gi_scr  : (Tc*B, 3H) f32 scratch holding the hoisted input projection.
    out_buf : (Tc*B, H)  f32 ref receiving the masked per-step hidden outputs
              (doubles as the next layer's input slab).
    h_carry : (L, B, H)  f32 scratch, hidden state carried across chunks.
    Only the (B,H)@(H,3H) Whh matmul stays inside the per-step loop; the loop
    is a short static unroll (Tc is kept small) with static row slices, and
    only `h` is live across steps.
    """
    G = 3 * H
    bhh_b = jnp.broadcast_to(bhh, (B, G))          # hoisted bias broadcast
    h = h_carry[layer_idx]
    for t in range(Tc):
        gi = gi_scr[pl.ds(t * B, B), :]
        gh = jnp.dot(h, whh, preferred_element_type=jnp.float32) + bhh_b
        # PyTorch GRU gate order [r, z, n]; b_hn stays inside r * (Whh h + bhh).
        r = jax.nn.sigmoid(gi[:, :H] + gh[:, :H])
        z = jax.nn.sigmoid(gi[:, H:2 * H] + gh[:, H:2 * H])
        n = jnp.tanh(gi[:, 2 * H:] + r * gh[:, 2 * H:])
        h_new = (1.0 - z) * n + z * h
        m = (lens > (t0 + t)).astype(jnp.float32)  # (B, 1) packed-seq mask
        h = m * h_new + (1.0 - m) * h              # freeze past length
        out_buf[pl.ds(t * B, B), :] = m * h        # pad_packed -> zeros
    h_carry[layer_idx] = h


# ----------------------------------------------------------------------------
# Kernel factories
# ----------------------------------------------------------------------------
def make_encoder_kernel(Tc, B, H, num_layers):
    G = 3 * H

    def kernel(*refs):
        lens_ref, x_ref, noise_ref, wih0_ref, bih0_ref, whh0_ref, bhh0_ref = refs[:7]
        idx = 7
        upper = []
        for _ in range(num_layers - 1):
            upper.append(refs[idx:idx + 4])
            idx += 4
        wm_ref, bm_ref, wv_ref, bv_ref = refs[idx:idx + 4]
        idx += 4
        hid_ref, means_ref, logv_ref, samp_ref = refs[idx:idx + 4]
        idx += 4
        h_carry, gi_scr = refs[idx:idx + 2]

        chunk = pl.program_id(0)

        @pl.when(chunk == 0)
        def _init():
            h_carry[...] = jnp.zeros_like(h_carry)

        t0 = chunk * Tc
        lens = lens_ref[...]                                   # (B, 1) int32

        # Layer 0: hoisted input projection (one bf16 MXU matmul per chunk).
        gi_scr[...] = (jnp.dot(x_ref[...], wih0_ref[...],
                               preferred_element_type=jnp.float32)
                       + bih0_ref[...])
        _gru_chunk(gi_scr, hid_ref, h_carry, 0,
                   whh0_ref[...], bhh0_ref[...], lens, t0, Tc, B, H)

        # Layers 1..L-1: hoisted projection of the previous layer's slab.
        # TODO(synk): train-mode inter-layer Dropout omitted (eval-mode forward).
        for li, (wih_ref, whh_ref, bih_ref, bhh_ref) in enumerate(upper):
            gi_scr[...] = (jnp.dot(hid_ref[...].astype(jnp.bfloat16), wih_ref[...],
                                   preferred_element_type=jnp.float32)
                           + bih_ref[...])
            _gru_chunk(gi_scr, hid_ref, h_carry, li + 1,
                       whh_ref[...], bhh_ref[...], lens, t0, Tc, B, H)

        # Fused head: means / vars 1x1-convs + latent sampler over the chunk.
        h_slab = hid_ref[...].astype(jnp.bfloat16)
        m_out = (jnp.dot(h_slab, wm_ref[...], preferred_element_type=jnp.float32)
                 + bm_ref[...])
        v_out = (jnp.dot(h_slab, wv_ref[...], preferred_element_type=jnp.float32)
                 + bv_ref[...])
        means_ref[...] = m_out
        logv_ref[...] = v_out
        # Matches PyTorch latentSampler: means + exp(vars) * N(0,1).
        samp_ref[...] = (m_out + jnp.exp(v_out) * noise_ref[...]).astype(samp_ref.dtype)

    return kernel


def make_decoder_kernel(Tc, B, H, num_layers):
    def kernel(*refs):
        lens_ref, samp_ref, wih0_ref, bih0_ref, whh0_ref, bhh0_ref = refs[:6]
        idx = 6
        upper = []
        for _ in range(num_layers - 1):
            upper.append(refs[idx:idx + 4])
            idx += 4
        wm_ref, bm_ref = refs[idx:idx + 2]
        idx += 2
        dec_ref = refs[idx]
        idx += 1
        h_carry, outs_scr, gi_scr = refs[idx:idx + 3]

        tchunk = pl.program_id(1)

        @pl.when(tchunk == 0)
        def _init():
            h_carry[...] = jnp.zeros_like(h_carry)

        t0 = tchunk * Tc
        lens = lens_ref[...]

        # Layer 0: projection of the sampled-latent chunk (bf16 MXU, f32 acc).
        gi_scr[...] = (jnp.dot(samp_ref[...], wih0_ref[...],
                               preferred_element_type=jnp.float32)
                       + bih0_ref[...])
        _gru_chunk(gi_scr, outs_scr, h_carry, 0,
                   whh0_ref[...], bhh0_ref[...], lens, t0, Tc, B, H)

        for li, (wih_ref, whh_ref, bih_ref, bhh_ref) in enumerate(upper):
            gi_scr[...] = (jnp.dot(outs_scr[...].astype(jnp.bfloat16), wih_ref[...],
                                   preferred_element_type=jnp.float32)
                           + bih_ref[...])
            _gru_chunk(gi_scr, outs_scr, h_carry, li + 1,
                       whh_ref[...], bhh_ref[...], lens, t0, Tc, B, H)

        # Fused "means" 1x1-conv head, hoisted over the whole chunk.
        dec_ref[...] = (jnp.dot(outs_scr[...].astype(jnp.bfloat16), wm_ref[...],
                                preferred_element_type=jnp.float32)
                        + bm_ref[...])

    return kernel


# ----------------------------------------------------------------------------
# pallas_call wrappers
# ----------------------------------------------------------------------------
_VMEM_LIMIT = 48 * 1024 * 1024   # headroom below v7x 64 MiB physical VMEM


def encoder_call(lens_i, x2d, noise2d, enc_p, Tc):
    TB, Fdim = x2d.shape
    B = lens_i.shape[0]
    T = TB // B
    H = enc_p["whh0"].shape[0]
    G = 3 * H
    bn = enc_p["w_m"].shape[1]
    num_layers = 1 + len(enc_p["upper"])
    n_chunks = T // Tc
    CB = Tc * B

    ops = [lens_i, x2d, noise2d,
           enc_p["wih0"], enc_p["bih0"], enc_p["whh0"], enc_p["bhh0"]]
    in_specs = [pl.BlockSpec((B, 1), lambda t: (0, 0)),
                pl.BlockSpec((CB, Fdim), lambda t: (t, 0)),
                pl.BlockSpec((CB, bn), lambda t: (t, 0)),
                pl.BlockSpec((Fdim, G), lambda t: (0, 0)),
                pl.BlockSpec((1, G), lambda t: (0, 0)),
                pl.BlockSpec((H, G), lambda t: (0, 0)),
                pl.BlockSpec((1, G), lambda t: (0, 0))]
    for lyr in enc_p["upper"]:
        ops += [lyr["wih"], lyr["whh"], lyr["bih"], lyr["bhh"]]
        in_specs += [pl.BlockSpec((H, G), lambda t: (0, 0)),
                     pl.BlockSpec((H, G), lambda t: (0, 0)),
                     pl.BlockSpec((1, G), lambda t: (0, 0)),
                     pl.BlockSpec((1, G), lambda t: (0, 0))]
    ops += [enc_p["w_m"], enc_p["b_m"], enc_p["w_v"], enc_p["b_v"]]
    in_specs += [pl.BlockSpec((H, bn), lambda t: (0, 0)),
                 pl.BlockSpec((1, bn), lambda t: (0, 0)),
                 pl.BlockSpec((H, bn), lambda t: (0, 0)),
                 pl.BlockSpec((1, bn), lambda t: (0, 0))]

    out_shape = (jax.ShapeDtypeStruct((TB, H), jnp.float32),    # hidden slab
                 jax.ShapeDtypeStruct((TB, bn), jnp.float32),   # means
                 jax.ShapeDtypeStruct((TB, bn), jnp.float32),   # vars (log)
                 jax.ShapeDtypeStruct((TB, bn), jnp.bfloat16))  # sampled latent
    out_specs = (pl.BlockSpec((CB, H), lambda t: (t, 0)),
                 pl.BlockSpec((CB, bn), lambda t: (t, 0)),
                 pl.BlockSpec((CB, bn), lambda t: (t, 0)),
                 pl.BlockSpec((CB, bn), lambda t: (t, 0)))
    scratch = [pltpu.VMEM((num_layers, B, H), jnp.float32),     # carried h
               pltpu.VMEM((CB, G), jnp.float32)]                # gi slab

    return pl.pallas_call(
        make_encoder_kernel(Tc, B, H, num_layers),
        out_shape=out_shape,
        grid_spec=pltpu.PrefetchScalarGridSpec(
            num_scalar_prefetch=0,
            grid=(n_chunks,),
            in_specs=in_specs,
            out_specs=out_specs,
            scratch_shapes=scratch),
        compiler_params=pltpu.CompilerParams(
            dimension_semantics=("arbitrary",),        # chunk axis carries state
            vmem_limit_bytes=_VMEM_LIMIT),
    )(*ops)


def decoder_call(lens_i, samp2d, dec_p, Tc):
    TB, bn = samp2d.shape
    B = lens_i.shape[0]
    T = TB // B
    C = dec_p["whh0"].shape[0]
    H = dec_p["whh0"].shape[1]
    G = 3 * H
    Fout = dec_p["wm"].shape[-1]
    num_layers = 1 + len(dec_p["upper"])
    n_chunks = T // Tc
    CB = Tc * B

    ops = [lens_i, samp2d,
           dec_p["wih0"], dec_p["bih0"], dec_p["whh0"], dec_p["bhh0"]]
    in_specs = [pl.BlockSpec((B, 1), lambda c, t: (0, 0)),
                pl.BlockSpec((CB, bn), lambda c, t: (t, 0)),
                pl.BlockSpec((None, bn, G), lambda c, t: (c, 0, 0)),
                pl.BlockSpec((None, 1, G), lambda c, t: (c, 0, 0)),
                pl.BlockSpec((None, H, G), lambda c, t: (c, 0, 0)),
                pl.BlockSpec((None, 1, G), lambda c, t: (c, 0, 0))]
    for lyr in dec_p["upper"]:
        ops += [lyr["wih"], lyr["whh"], lyr["bih"], lyr["bhh"]]
        in_specs += [pl.BlockSpec((None, H, G), lambda c, t: (c, 0, 0)),
                     pl.BlockSpec((None, H, G), lambda c, t: (c, 0, 0)),
                     pl.BlockSpec((None, 1, G), lambda c, t: (c, 0, 0)),
                     pl.BlockSpec((None, 1, G), lambda c, t: (c, 0, 0))]
    ops += [dec_p["wm"], dec_p["bm"]]
    in_specs += [pl.BlockSpec((None, H, Fout), lambda c, t: (c, 0, 0)),
                 pl.BlockSpec((None, 1, Fout), lambda c, t: (c, 0, 0))]

    out_shape = jax.ShapeDtypeStruct((C, TB, Fout), jnp.float32)
    out_specs = pl.BlockSpec((None, CB, Fout), lambda c, t: (c, t, 0))
    scratch = [pltpu.VMEM((num_layers, B, H), jnp.float32),     # carried h
               pltpu.VMEM((CB, H), jnp.float32),                # layer outputs
               pltpu.VMEM((CB, G), jnp.float32)]                # gi slab

    return pl.pallas_call(
        make_decoder_kernel(Tc, B, H, num_layers),
        out_shape=out_shape,
        grid_spec=pltpu.PrefetchScalarGridSpec(
            num_scalar_prefetch=0,
            grid=(C, n_chunks),
            in_specs=in_specs,
            out_specs=out_specs,
            scratch_shapes=scratch),
        compiler_params=pltpu.CompilerParams(
            dimension_semantics=("parallel", "arbitrary"),
            vmem_limit_bytes=_VMEM_LIMIT),
    )(*ops)


# ----------------------------------------------------------------------------
# Parameter setup (matches nn.GRU / 1x1 nn.Conv1d layouts, stored transposed;
# MXU-slab weights kept in bf16, recurrent Whh and all biases in f32)
# ----------------------------------------------------------------------------
def _uniform(key, shape, k):
    return jax.random.uniform(key, shape, jnp.float32, -k, k)


def init_gru_layer(key, in_size, hidden):
    k = 1.0 / (hidden ** 0.5)
    k1, k2, k3, k4 = jax.random.split(key, 4)
    return {"wih": _uniform(k1, (in_size, 3 * hidden), k).astype(jnp.bfloat16),
            "whh": _uniform(k2, (hidden, 3 * hidden), k),
            "bih": _uniform(k3, (1, 3 * hidden), k),
            "bhh": _uniform(k4, (1, 3 * hidden), k)}


def init_conv1x1(key, in_size, out_size):
    k = 1.0 / (in_size ** 0.5)
    k1, k2 = jax.random.split(key)
    return (_uniform(k1, (in_size, out_size), k).astype(jnp.bfloat16),
            _uniform(k2, (1, out_size), k))


def init_params(key, input_size, num_layers_enc, num_layers_dec,
                hidden_size, bn_size, num_outs):
    n_keys = num_layers_enc + 2 + num_outs * (num_layers_dec + 1)
    keys = jax.random.split(key, n_keys)
    ki = iter(keys)

    enc_layers = [init_gru_layer(next(ki), s, hidden_size)
                  for s in [input_size] + [hidden_size] * (num_layers_enc - 1)]
    wm_e, bm_e = init_conv1x1(next(ki), hidden_size, bn_size)
    wv_e, bv_e = init_conv1x1(next(ki), hidden_size, bn_size)
    enc = {"wih0": enc_layers[0]["wih"], "bih0": enc_layers[0]["bih"],
           "whh0": enc_layers[0]["whh"], "bhh0": enc_layers[0]["bhh"],
           "upper": enc_layers[1:],
           "w_m": wm_e, "b_m": bm_e, "w_v": wv_e, "b_v": bv_e}

    dec_layers, dec_heads = [], []
    for _ in range(num_outs):
        dec_layers.append([init_gru_layer(next(ki), s, hidden_size)
                           for s in [bn_size] + [hidden_size] * (num_layers_dec - 1)])
        dec_heads.append(init_conv1x1(next(ki), hidden_size, input_size))
    dec = {
        "wih0": jnp.stack([dec_layers[c][0]["wih"] for c in range(num_outs)]),
        "bih0": jnp.stack([dec_layers[c][0]["bih"] for c in range(num_outs)]),
        "whh0": jnp.stack([dec_layers[c][0]["whh"] for c in range(num_outs)]),
        "bhh0": jnp.stack([dec_layers[c][0]["bhh"] for c in range(num_outs)]),
        "upper": [{k: jnp.stack([dec_layers[c][l][k] for c in range(num_outs)])
                   for k in ("wih", "whh", "bih", "bhh")}
                  for l in range(1, num_layers_dec)],
        "wm": jnp.stack([dec_heads[c][0] for c in range(num_outs)]),
        "bm": jnp.stack([dec_heads[c][1] for c in range(num_outs)]),
    }
    return {"enc": enc, "dec": dec}


# ----------------------------------------------------------------------------
# Forward pass (nnetARVAE.forward)
# ----------------------------------------------------------------------------
def _pick_time_chunk(T, B, requested):
    Tc = min(requested, T)
    if T % Tc != 0 or ((T // Tc) > 1 and (Tc * B) % 16 != 0):
        return T                      # fall back to a single chunk
    return Tc


def nnet_arvae_forward(params, inputs, lengths, noise, time_chunk=8):
    """inputs: (B, T, F); lengths: (B,) int32; noise: (B, T, bn) ~ N(0,1)."""
    B, T, Fdim = inputs.shape
    H = params["enc"]["whh0"].shape[0]
    bn = noise.shape[-1]
    C = params["dec"]["whh0"].shape[0]
    Tc = _pick_time_chunk(T, B, time_chunk)

    lens_i = lengths.astype(jnp.int32).reshape(B, 1)
    # Time-major 2-D slabs; matmul operands in bf16 (f32 accumulation in-kernel).
    x2d = jnp.transpose(inputs, (1, 0, 2)).reshape(T * B, Fdim).astype(jnp.bfloat16)
    noise2d = jnp.transpose(noise, (1, 0, 2)).reshape(T * B, bn)

    # 1) fused encoder: GRU stack + means/vars convs + latent sampler.
    hid, means2, logv2, samp = encoder_call(lens_i, x2d, noise2d, params["enc"], Tc)

    # 2) all decoders in one pallas_call (component axis parallel, chunks serial).
    dec = decoder_call(lens_i, samp, params["dec"], Tc)

    means = jnp.transpose(means2.reshape(T, B, bn), (1, 0, 2))       # (B, T, bn)
    logv = jnp.transpose(logv2.reshape(T, B, bn), (1, 0, 2))         # (B, T, bn)
    enc_hidden = jnp.transpose(hid.reshape(T, B, H), (1, 0, 2))      # (B, T, H)
    decoded = jnp.transpose(dec.reshape(C, T, B, Fdim), (0, 2, 1, 3))  # (C,B,T,F)
    return decoded, (means, logv, enc_hidden)


if __name__ == "__main__":
    B, T = 4, 16
    input_size, hidden_size, bn_size = 16, 32, 8
    num_layers_enc, num_layers_dec, num_outs = 2, 2, 3
    time_chunk = 8

    root = jax.random.PRNGKey(0)
    k_param, k_x, k_noise = jax.random.split(root, 3)

    params = init_params(k_param, input_size, num_layers_enc, num_layers_dec,
                         hidden_size, bn_size, num_outs)

    x = jax.random.normal(k_x, (B, T, input_size), jnp.float32)
    lengths = jnp.array([16, 12, 9, 5], dtype=jnp.int32)  # sorted, as torch requires
    # torch.randn inside latentSampler -> deterministic normal noise input here.
    noise = jax.random.normal(k_noise, (B, T, bn_size), jnp.float32)

    fwd = jax.jit(functools.partial(nnet_arvae_forward, time_chunk=time_chunk))
    decoded, (means, logv, enc_hidden) = fwd(params, x, lengths, noise)
    jax.block_until_ready((decoded, means, logv, enc_hidden))

    assert decoded.shape == (num_outs, B, T, input_size)
    assert means.shape == (B, T, bn_size)
    assert logv.shape == (B, T, bn_size)
    assert enc_hidden.shape == (B, T, hidden_size)
    assert bool(jnp.all(jnp.isfinite(decoded)))
    assert bool(jnp.all(jnp.isfinite(means)))
    print("KERNEL_OK")
</pallas_src>

<mosaic_0001>
module attributes {stable_mosaic.version = 11 : i64} {
  func.func @kernel(%arg0: i32, %arg1: memref<4x1xi32, #tpu.memory_space<vmem>>, %arg2: memref<32x16xbf16, #tpu.memory_space<vmem>>, %arg3: memref<32x8xf32, #tpu.memory_space<vmem>>, %arg4: memref<16x96xbf16, #tpu.memory_space<vmem>>, %arg5: memref<1x96xf32, #tpu.memory_space<vmem>>, %arg6: memref<32x96xf32, #tpu.memory_space<vmem>>, %arg7: memref<1x96xf32, #tpu.memory_space<vmem>>, %arg8: memref<32x96xbf16, #tpu.memory_space<vmem>>, %arg9: memref<32x96xf32, #tpu.memory_space<vmem>>, %arg10: memref<1x96xf32, #tpu.memory_space<vmem>>, %arg11: memref<1x96xf32, #tpu.memory_space<vmem>>, %arg12: memref<32x8xbf16, #tpu.memory_space<vmem>>, %arg13: memref<1x8xf32, #tpu.memory_space<vmem>>, %arg14: memref<32x8xbf16, #tpu.memory_space<vmem>>, %arg15: memref<1x8xf32, #tpu.memory_space<vmem>>, %arg16: memref<32x32xf32, #tpu.memory_space<vmem>>, %arg17: memref<32x8xf32, #tpu.memory_space<vmem>>, %arg18: memref<32x8xf32, #tpu.memory_space<vmem>>, %arg19: memref<32x8xbf16, #tpu.memory_space<vmem>>, %arg20: memref<2x4x32xf32, #tpu.memory_space<vmem>>, %arg21: memref<32x96xf32, #tpu.memory_space<vmem>>) attributes {dimension_semantics = [#tpu.dimension_semantics<arbitrary>], iteration_bounds = array<i64: 2>, scalar_prefetch = 0 : i64, scratch_operands = 2 : i64, tpu.core_type = #tpu.core_type<tc>, window_params = [{pipeline_mode = #tpu.pipeline_mode<synchronous>, transform_indices = @transform_0, window_bounds = array<i64: 4, 1>}, {transform_indices = @transform_1, window_bounds = array<i64: 32, 16>}, {transform_indices = @transform_2, window_bounds = array<i64: 32, 8>}, {pipeline_mode = #tpu.pipeline_mode<synchronous>, transform_indices = @transform_3, window_bounds = array<i64: 16, 96>}, {pipeline_mode = #tpu.pipeline_mode<synchronous>, transform_indices = @transform_4, window_bounds = array<i64: 1, 96>}, {pipeline_mode = #tpu.pipeline_mode<synchronous>, transform_indices = @transform_5, window_bounds = array<i64: 32, 96>}, {pipeline_mode = #tpu.pipeline_mode<synchronous>, transform_indices = @transform_6, window_bounds = array<i64: 1, 96>}, {pipeline_mode = #tpu.pipeline_mode<synchronous>, transform_indices = @transform_7, window_bounds = array<i64: 32, 96>}, {pipeline_mode = #tpu.pipeline_mode<synchronous>, transform_indices = @transform_8, window_bounds = array<i64: 32, 96>}, {pipeline_mode = #tpu.pipeline_mode<synchronous>, transform_indices = @transform_9, window_bounds = array<i64: 1, 96>}, {pipeline_mode = #tpu.pipeline_mode<synchronous>, transform_indices = @transform_10, window_bounds = array<i64: 1, 96>}, {pipeline_mode = #tpu.pipeline_mode<synchronous>, transform_indices = @transform_11, window_bounds = array<i64: 32, 8>}, {pipeline_mode = #tpu.pipeline_mode<synchronous>, transform_indices = @transform_12, window_bounds = array<i64: 1, 8>}, {pipeline_mode = #tpu.pipeline_mode<synchronous>, transform_indices = @transform_13, window_bounds = array<i64: 32, 8>}, {pipeline_mode = #tpu.pipeline_mode<synchronous>, transform_indices = @transform_14, window_bounds = array<i64: 1, 8>}, {transform_indices = @transform_15, window_bounds = array<i64: 32, 32>}, {transform_indices = @transform_16, window_bounds = array<i64: 32, 8>}, {transform_indices = @transform_17, window_bounds = array<i64: 32, 8>}, {transform_indices = @transform_18, window_bounds = array<i64: 32, 8>}]} {
    %c0_i32 = arith.constant 0 : i32
    %0 = arith.cmpi eq, %arg0, %c0_i32 : i32
    %1 = arith.extui %0 : i1 to i32
    %c0_i32_0 = arith.constant 0 : i32
    %2 = arith.cmpi ne, %1, %c0_i32_0 : i32
    scf.if %2 {
      %cst_204 = arith.constant 0.000000e+00 : f32
      %762 = vector.broadcast %cst_204 : f32 to vector<2x4x32xf32>
      %c0_205 = arith.constant 0 : index
      %c0_206 = arith.constant 0 : index
      %c0_207 = arith.constant 0 : index
      %763 = vector.load %arg20[%c0_205, %c0_206, %c0_207] : memref<2x4x32xf32, #tpu.memory_space<vmem>>, vector<2x4x32xf32>
      tpu.vector_store %arg20[%c0_205, %c0_206, %c0_207], %762 {strides = array<i32>} : memref<2x4x32xf32, #tpu.memory_space<vmem>>, vector<2x4x32xf32>,
    } else {
    }
    %c8_i32 = arith.constant 8 : i32
    %3 = arith.muli %arg0, %c8_i32 : i32
    %c0 = arith.constant 0 : index
    %c0_1 = arith.constant 0 : index
    %4 = vector.load %arg1[%c0, %c0_1] : memref<4x1xi32, #tpu.memory_space<vmem>>, vector<4x1xi32>
    %c0_2 = arith.constant 0 : index
    %c0_3 = arith.constant 0 : index
    %5 = vector.load %arg2[%c0_2, %c0_3] : memref<32x16xbf16, #tpu.memory_space<vmem>>, vector<32x16xbf16>
    %c0_4 = arith.constant 0 : index
    %c0_5 = arith.constant 0 : index
    %6 = vector.load %arg4[%c0_4, %c0_5] : memref<16x96xbf16, #tpu.memory_space<vmem>>, vector<16x96xbf16>
    %cst = arith.constant dense<0.000000e+00> : vector<32x96xf32>
    %7 = tpu.matmul %5, %6, %cst {dimension_numbers = #tpu.dot_dimension_numbers<[1], [0], [0], [1], [0, 0, 1, 1], [], []>} : vector<32x16xbf16>, vector<16x96xbf16>, vector<32x96xf32> -> vector<32x96xf32>
    %c0_6 = arith.constant 0 : index
    %c0_7 = arith.constant 0 : index
    %8 = vector.load %arg5[%c0_6, %c0_7] : memref<1x96xf32, #tpu.memory_space<vmem>>, vector<1x96xf32>
    %9 = vector.broadcast %8 : vector<1x96xf32> to vector<32x96xf32>
    %10 = arith.addf %7, %9 : vector<32x96xf32>
    %c0_8 = arith.constant 0 : index
    %c0_9 = arith.constant 0 : index
    %11 = vector.load %arg21[%c0_8, %c0_9] : memref<32x96xf32, #tpu.memory_space<vmem>>, vector<32x96xf32>
    tpu.vector_store %arg21[%c0_8, %c0_9], %10 {strides = array<i32>} : memref<32x96xf32, #tpu.memory_space<vmem>>, vector<32x96xf32>,
    %c0_10 = arith.constant 0 : index
    %c0_11 = arith.constant 0 : index
    %12 = vector.load %arg6[%c0_10, %c0_11] : memref<32x96xf32, #tpu.memory_space<vmem>>, vector<32x96xf32>
    %c0_12 = arith.constant 0 : index
    %c0_13 = arith.constant 0 : index
    %13 = vector.load %arg7[%c0_12, %c0_13] : memref<1x96xf32, #tpu.memory_space<vmem>>, vector<1x96xf32>
    %14 = vector.shape_cast %13 : vector<1x96xf32> to vector<1x96xf32>
    %15 = vector.broadcast %14 : vector<1x96xf32> to vector<4x96xf32>
    %c0_14 = arith.constant 0 : index
    %c0_15 = arith.constant 0 : index
    %c0_16 = arith.constant 0 : index
    %16 = vector.load %arg20[%c0_14, %c0_15, %c0_16] : memref<2x4x32xf32, #tpu.memory_space<vmem>>, vector<1x4x32xf32>
    %17 = vector.shape_cast %16 : vector<1x4x32xf32> to vector<4x32xf32>
    %c0_17 = arith.constant 0 : index
    %c0_18 = arith.constant 0 : index
    %18 = vector.load %arg21[%c0_17, %c0_18] : memref<32x96xf32, #tpu.memory_space<vmem>>, vector<4x96xf32>
    %cst_19 = arith.constant dense<0.000000e+00> : vector<4x96xf32>
    %19 = tpu.matmul %17, %12, %cst_19 {dimension_numbers = #tpu.dot_dimension_numbers<[1], [0], [0], [1], [0, 0, 1, 1], [], []>} : vector<4x32xf32>, vector<32x96xf32>, vector<4x96xf32> -> vector<4x96xf32>
    %20 = arith.addf %19, %15 : vector<4x96xf32>
    %21 = vector.extract_strided_slice %18 {offsets = [0, 0], sizes = [4, 32], strides = [1, 1]} : vector<4x96xf32> to vector<4x32xf32>
    %22 = vector.extract_strided_slice %20 {offsets = [0, 0], sizes = [4, 32], strides = [1, 1]} : vector<4x96xf32> to vector<4x32xf32>
    %23 = arith.addf %21, %22 : vector<4x32xf32>
    %24 = arith.negf %23 : vector<4x32xf32>
    %25 = math.exp %24 : vector<4x32xf32>
    %cst_20 = arith.constant 1.000000e+00 : f32
    %26 = vector.broadcast %cst_20 : f32 to vector<4x32xf32>
    %27 = arith.addf %26, %25 : vector<4x32xf32>
    %28 = arith.divf %26, %27 : vector<4x32xf32>
    %29 = vector.extract_strided_slice %18 {offsets = [0, 32], sizes = [4, 32], strides = [1, 1]} : vector<4x96xf32> to vector<4x32xf32>
    %30 = vector.extract_strided_slice %20 {offsets = [0, 32], sizes = [4, 32], strides = [1, 1]} : vector<4x96xf32> to vector<4x32xf32>
    %31 = arith.addf %29, %30 : vector<4x32xf32>
    %32 = arith.negf %31 : vector<4x32xf32>
    %33 = math.exp %32 : vector<4x32xf32>
    %cst_21 = arith.constant 1.000000e+00 : f32
    %34 = vector.broadcast %cst_21 : f32 to vector<4x32xf32>
    %35 = arith.addf %34, %33 : vector<4x32xf32>
    %36 = arith.divf %34, %35 : vector<4x32xf32>
    %37 = vector.extract_strided_slice %18 {offsets = [0, 64], sizes = [4, 32], strides = [1, 1]} : vector<4x96xf32> to vector<4x32xf32>
    %38 = vector.extract_strided_slice %20 {offsets = [0, 64], sizes = [4, 32], strides = [1, 1]} : vector<4x96xf32> to vector<4x32xf32>
    %39 = arith.mulf %28, %38 : vector<4x32xf32>
    %40 = arith.addf %37, %39 : vector<4x32xf32>
    %41 = math.tanh %40 : vector<4x32xf32>
    %cst_22 = arith.constant 1.000000e+00 : f32
    %42 = vector.broadcast %cst_22 : f32 to vector<4x32xf32>
    %43 = arith.subf %42, %36 : vector<4x32xf32>
    %44 = arith.mulf %43, %41 : vector<4x32xf32>
    %45 = arith.mulf %36, %17 : vector<4x32xf32>
    %46 = arith.addf %44, %45 : vector<4x32xf32>
    %c0_i32_23 = arith.constant 0 : i32
    %47 = arith.addi %3, %c0_i32_23 : i32
    %48 = vector.broadcast %47 : i32 to vector<4x1xi32>
    %49 = arith.cmpi sgt, %4, %48 : vector<4x1xi32>
    %50 = arith.extui %49 : vector<4x1xi1> to vector<4x1xi32>
    %51 = arith.sitofp %50 : vector<4x1xi32> to vector<4x1xf32>
    %52 = vector.broadcast %51 : vector<4x1xf32> to vector<4x32xf32>
    %53 = arith.mulf %52, %46 : vector<4x32xf32>
    %cst_24 = arith.constant 1.000000e+00 : f32
    %54 = vector.broadcast %cst_24 : f32 to vector<4x1xf32>
    %55 = arith.subf %54, %51 : vector<4x1xf32>
    %56 = vector.broadcast %55 : vector<4x1xf32> to vector<4x32xf32>
    %57 = arith.mulf %56, %17 : vector<4x32xf32>
    %58 = arith.addf %53, %57 : vector<4x32xf32>
    %59 = vector.broadcast %51 : vector<4x1xf32> to vector<4x32xf32>
    %60 = arith.mulf %59, %58 : vector<4x32xf32>
    %c0_25 = arith.constant 0 : index
    %c0_26 = arith.constant 0 : index
    %61 = vector.load %arg16[%c0_25, %c0_26] : memref<32x32xf32, #tpu.memory_space<vmem>>, vector<4x32xf32>
    tpu.vector_store %arg16[%c0_25, %c0_26], %60 {strides = array<i32>} : memref<32x32xf32, #tpu.memory_space<vmem>>, vector<4x32xf32>,
    %c4 = arith.constant 4 : index
    %c0_27 = arith.constant 0 : index
    %62 = vector.load %arg21[%c4, %c0_27] : memref<32x96xf32, #tpu.memory_space<vmem>>, vector<4x96xf32>
    %cst_28 = arith.constant dense<0.000000e+00> : vector<4x96xf32>
    %63 = tpu.matmul %58, %12, %cst_28 {dimension_numbers = #tpu.dot_dimension_numbers<[1], [0], [0], [1], [0, 0, 1, 1], [], []>} : vector<4x32xf32>, vector<32x96xf32>, vector<4x96xf32> -> vector<4x96xf32>
    %64 = arith.addf %63, %15 : vector<4x96xf32>
    %65 = vector.extract_strided_slice %62 {offsets = [0, 0], sizes = [4, 32], strides = [1, 1]} : vector<4x96xf32> to vector<4x32xf32>
    %66 = vector.extract_strided_slice %64 {offsets = [0, 0], sizes = [4, 32], strides = [1, 1]} : vector<4x96xf32> to vector<4x32xf32>
    %67 = arith.addf %65, %66 : vector<4x32xf32>
    %68 = arith.negf %67 : vector<4x32xf32>
    %69 = math.exp %68 : vector<4x32xf32>
    %cst_29 = arith.constant 1.000000e+00 : f32
    %70 = vector.broadcast %cst_29 : f32 to vector<4x32xf32>
    %71 = arith.addf %70, %69 : vector<4x32xf32>
    %72 = arith.divf %70, %71 : vector<4x32xf32>
    %73 = vector.extract_strided_slice %62 {offsets = [0, 32], sizes = [4, 32], strides = [1, 1]} : vector<4x96xf32> to vector<4x32xf32>
    %74 = vector.extract_strided_slice %64 {offsets = [0, 32], sizes = [4, 32], strides = [1, 1]} : vector<4x96xf32> to vector<4x32xf32>
    %75 = arith.addf %73, %74 : vector<4x32xf32>
    %76 = arith.negf %75 : vector<4x32xf32>
    %77 = math.exp %76 : vector<4x32xf32>
    %cst_30 = arith.constant 1.000000e+00 : f32
    %78 = vector.broadcast %cst_30 : f32 to vector<4x32xf32>
    %79 = arith.addf %78, %77 : vector<4x32xf32>
    %80 = arith.divf %78, %79 : vector<4x32xf32>
    %81 = vector.extract_strided_slice %62 {offsets = [0, 64], sizes = [4, 32], strides = [1, 1]} : vector<4x96xf32> to vector<4x32xf32>
    %82 = vector.extract_strided_slice %64 {offsets = [0, 64], sizes = [4, 32], strides = [1, 1]} : vector<4x96xf32> to vector<4x32xf32>
    %83 = arith.mulf %72, %82 : vector<4x32xf32>
    %84 = arith.addf %81, %83 : vector<4x32xf32>
    %85 = math.tanh %84 : vector<4x32xf32>
    %cst_31 = arith.constant 1.000000e+00 : f32
    %86 = vector.broadcast %cst_31 : f32 to vector<4x32xf32>
    %87 = arith.subf %86, %80 : vector<4x32xf32>
    %88 = arith.mulf %87, %85 : vector<4x32xf32>
    %89 = arith.mulf %80, %58 : vector<4x32xf32>
    %90 = arith.addf %88, %89 : vector<4x32xf32>
    %c1_i32 = arith.constant 1 : i32
    %91 = arith.addi %3, %c1_i32 : i32
    %92 = vector.broadcast %91 : i32 to vector<4x1xi32>
    %93 = arith.cmpi sgt, %4, %92 : vector<4x1xi32>
    %94 = arith.extui %93 : vector<4x1xi1> to vector<4x1xi32>
    %95 = arith.sitofp %94 : vector<4x1xi32> to vector<4x1xf32>
    %96 = vector.broadcast %95 : vector<4x1xf32> to vector<4x32xf32>
    %97 = arith.mulf %96, %90 : vector<4x32xf32>
    %cst_32 = arith.constant 1.000000e+00 : f32
    %98 = vector.broadcast %cst_32 : f32 to vector<4x1xf32>
    %99 = arith.subf %98, %95 : vector<4x1xf32>
    %100 = vector.broadcast %99 : vector<4x1xf32> to vector<4x32xf32>
    %101 = arith.mulf %100, %58 : vector<4x32xf32>
    %102 = arith.addf %97, %101 : vector<4x32xf32>
    %103 = vector.broadcast %95 : vector<4x1xf32> to vector<4x32xf32>
    %104 = arith.mulf %103, %102 : vector<4x32xf32>
    %c4_33 = arith.constant 4 : index
    %c0_34 = arith.constant 0 : index
    %105 = vector.load %arg16[%c4_33, %c0_34] : memref<32x32xf32, #tpu.memory_space<vmem>>, vector<4x32xf32>
    tpu.vector_store %arg16[%c4_33, %c0_34], %104 {strides = array<i32>} : memref<32x32xf32, #tpu.memory_space<vmem>>, vector<4x32xf32>,
    %c8 = arith.constant 8 : index
    %c0_35 = arith.constant 0 : index
    %106 = vector.load %arg21[%c8, %c0_35] : memref<32x96xf32, #tpu.memory_space<vmem>>, vector<4x96xf32>
    %cst_36 = arith.constant dense<0.000000e+00> : vector<4x96xf32>
    %107 = tpu.matmul %102, %12, %cst_36 {dimension_numbers = #tpu.dot_dimension_numbers<[1], [0], [0], [1], [0, 0, 1, 1], [], []>} : vector<4x32xf32>, vector<32x96xf32>, vector<4x96xf32> -> vector<4x96xf32>
    %108 = arith.addf %107, %15 : vector<4x96xf32>
    %109 = vector.extract_strided_slice %106 {offsets = [0, 0], sizes = [4, 32], strides = [1, 1]} : vector<4x96xf32> to vector<4x32xf32>
    %110 = vector.extract_strided_slice %108 {offsets = [0, 0], sizes = [4, 32], strides = [1, 1]} : vector<4x96xf32> to vector<4x32xf32>
    %111 = arith.addf %109, %110 : vector<4x32xf32>
    %112 = arith.negf %111 : vector<4x32xf32>
    %113 = math.exp %112 : vector<4x32xf32>
    %cst_37 = arith.constant 1.000000e+00 : f32
    %114 = vector.broadcast %cst_37 : f32 to vector<4x32xf32>
    %115 = arith.addf %114, %113 : vector<4x32xf32>
    %116 = arith.divf %114, %115 : vector<4x32xf32>
    %117 = vector.extract_strided_slice %106 {offsets = [0, 32], sizes = [4, 32], strides = [1, 1]} : vector<4x96xf32> to vector<4x32xf32>
    %118 = vector.extract_strided_slice %108 {offsets = [0, 32], sizes = [4, 32], strides = [1, 1]} : vector<4x96xf32> to vector<4x32xf32>
    %119 = arith.addf %117, %118 : vector<4x32xf32>
    %120 = arith.negf %119 : vector<4x32xf32>
    %121 = math.exp %120 : vector<4x32xf32>
    %cst_38 = arith.constant 1.000000e+00 : f32
    %122 = vector.broadcast %cst_38 : f32 to vector<4x32xf32>
    %123 = arith.addf %122, %121 : vector<4x32xf32>
    %124 = arith.divf %122, %123 : vector<4x32xf32>
    %125 = vector.extract_strided_slice %106 {offsets = [0, 64], sizes = [4, 32], strides = [1, 1]} : vector<4x96xf32> to vector<4x32xf32>
    %126 = vector.extract_strided_slice %108 {offsets = [0, 64], sizes = [4, 32], strides = [1, 1]} : vector<4x96xf32> to vector<4x32xf32>
    %127 = arith.mulf %116, %126 : vector<4x32xf32>
    %128 = arith.addf %125, %127 : vector<4x32xf32>
    %129 = math.tanh %128 : vector<4x32xf32>
    %cst_39 = arith.constant 1.000000e+00 : f32
    %130 = vector.broadcast %cst_39 : f32 to vector<4x32xf32>
    %131 = arith.subf %130, %124 : vector<4x32xf32>
    %132 = arith.mulf %131, %129 : vector<4x32xf32>
    %133 = arith.mulf %124, %102 : vector<4x32xf32>
    %134 = arith.addf %132, %133 : vector<4x32xf32>
    %c2_i32 = arith.constant 2 : i32
    %135 = arith.addi %3, %c2_i32 : i32
    %136 = vector.broadcast %135 : i32 to vector<4x1xi32>
    %137 = arith.cmpi sgt, %4, %136 : vector<4x1xi32>
    %138 = arith.extui %137 : vector<4x1xi1> to vector<4x1xi32>
    %139 = arith.sitofp %138 : vector<4x1xi32> to vector<4x1xf32>
    %140 = vector.broadcast %139 : vector<4x1xf32> to vector<4x32xf32>
    %141 = arith.mulf %140, %134 : vector<4x32xf32>
    %cst_40 = arith.constant 1.000000e+00 : f32
    %142 = vector.broadcast %cst_40 : f32 to vector<4x1xf32>
    %143 = arith.subf %142, %139 : vector<4x1xf32>
    %144 = vector.broadcast %143 : vector<4x1xf32> to vector<4x32xf32>
    %145 = arith.mulf %144, %102 : vector<4x32xf32>
    %146 = arith.addf %141, %145 : vector<4x32xf32>
    %147 = vector.broadcast %139 : vector<4x1xf32> to vector<4x32xf32>
    %148 = arith.mulf %147, %146 : vector<4x32xf32>
    %c8_41 = arith.constant 8 : index
    %c0_42 = arith.constant 0 : index
    %149 = vector.load %arg16[%c8_41, %c0_42] : memref<32x32xf32, #tpu.memory_space<vmem>>, vector<4x32xf32>
    tpu.vector_store %arg16[%c8_41, %c0_42], %148 {strides = array<i32>} : memref<32x32xf32, #tpu.memory_space<vmem>>, vector<4x32xf32>,
    %c12 = arith.constant 12 : index
    %c0_43 = arith.constant 0 : index
    %150 = vector.load %arg21[%c12, %c0_43] : memref<32x96xf32, #tpu.memory_space<vmem>>, vector<4x96xf32>
    %cst_44 = arith.constant dense<0.000000e+00> : vector<4x96xf32>
    %151 = tpu.matmul %146, %12, %cst_44 {dimension_numbers = #tpu.dot_dimension_numbers<[1], [0], [0], [1], [0, 0, 1, 1], [], []>} : vector<4x32xf32>, vector<32x96xf32>, vector<4x96xf32> -> vector<4x96xf32>
    %152 = arith.addf %151, %15 : vector<4x96xf32>
    %153 = vector.extract_strided_slice %150 {offsets = [0, 0], sizes = [4, 32], strides = [1, 1]} : vector<4x96xf32> to vector<4x32xf32>
    %154 = vector.extract_strided_slice %152 {offsets = [0, 0], sizes = [4, 32], strides = [1, 1]} : vector<4x96xf32> to vector<4x32xf32>
    %155 = arith.addf %153, %154 : vector<4x32xf32>
    %156 = arith.negf %155 : vector<4x32xf32>
    %157 = math.exp %156 : vector<4x32xf32>
    %cst_45 = arith.constant 1.000000e+00 : f32
    %158 = vector.broadcast %cst_45 : f32 to vector<4x32xf32>
    %159 = arith.addf %158, %157 : vector<4x32xf32>
    %160 = arith.divf %158, %159 : vector<4x32xf32>
    %161 = vector.extract_strided_slice %150 {offsets = [0, 32], sizes = [4, 32], strides = [1, 1]} : vector<4x96xf32> to vector<4x32xf32>
    %162 = vector.extract_strided_slice %152 {offsets = [0, 32], sizes = [4, 32], strides = [1, 1]} : vector<4x96xf32> to vector<4x32xf32>
    %163 = arith.addf %161, %162 : vector<4x32xf32>
    %164 = arith.negf %163 : vector<4x32xf32>
    %165 = math.exp %164 : vector<4x32xf32>
    %cst_46 = arith.constant 1.000000e+00 : f32
    %166 = vector.broadcast %cst_46 : f32 to vector<4x32xf32>
    %167 = arith.addf %166, %165 : vector<4x32xf32>
    %168 = arith.divf %166, %167 : vector<4x32xf32>
    %169 = vector.extract_strided_slice %150 {offsets = [0, 64], sizes = [4, 32], strides = [1, 1]} : vector<4x96xf32> to vector<4x32xf32>
    %170 = vector.extract_strided_slice %152 {offsets = [0, 64], sizes = [4, 32], strides = [1, 1]} : vector<4x96xf32> to vector<4x32xf32>
    %171 = arith.mulf %160, %170 : vector<4x32xf32>
    %172 = arith.addf %169, %171 : vector<4x32xf32>
    %173 = math.tanh %172 : vector<4x32xf32>
    %cst_47 = arith.constant 1.000000e+00 : f32
    %174 = vector.broadcast %cst_47 : f32 to vector<4x32xf32>
    %175 = arith.subf %174, %168 : vector<4x32xf32>
    %176 = arith.mulf %175, %173 : vector<4x32xf32>
    %177 = arith.mulf %168, %146 : vector<4x32xf32>
    %178 = arith.addf %176, %177 : vector<4x32xf32>
    %c3_i32 = arith.constant 3 : i32
    %179 = arith.addi %3, %c3_i32 : i32
    %180 = vector.broadcast %179 : i32 to vector<4x1xi32>
    %181 = arith.cmpi sgt, %4, %180 : vector<4x1xi32>
    %182 = arith.extui %181 : vector<4x1xi1> to vector<4x1xi32>
    %183 = arith.sitofp %182 : vector<4x1xi32> to vector<4x1xf32>
    %184 = vector.broadcast %183 : vector<4x1xf32> to vector<4x32xf32>
    %185 = arith.mulf %184, %178 : vector<4x32xf32>
    %cst_48 = arith.constant 1.000000e+00 : f32
    %186 = vector.broadcast %cst_48 : f32 to vector<4x1xf32>
    %187 = arith.subf %186, %183 : vector<4x1xf32>
    %188 = vector.broadcast %187 : vector<4x1xf32> to vector<4x32xf32>
    %189 = arith.mulf %188, %146 : vector<4x32xf32>
    %190 = arith.addf %185, %189 : vector<4x32xf32>
    %191 = vector.broadcast %183 : vector<4x1xf32> to vector<4x32xf32>
    %192 = arith.mulf %191, %190 : vector<4x32xf32>
    %c12_49 = arith.constant 12 : index
    %c0_50 = arith.constant 0 : index
    %193 = vector.load %arg16[%c12_49, %c0_50] : memref<32x32xf32, #tpu.memory_space<vmem>>, vector<4x32xf32>
    tpu.vector_store %arg16[%c12_49, %c0_50], %192 {strides = array<i32>} : memref<32x32xf32, #tpu.memory_space<vmem>>, vector<4x32xf32>,
    %c16 = arith.constant 16 : index
    %c0_51 = arith.constant 0 : index
    %194 = vector.load %arg21[%c16, %c0_51] : memref<32x96xf32, #tpu.memory_space<vmem>>, vector<4x96xf32>
    %cst_52 = arith.constant dense<0.000000e+00> : vector<4x96xf32>
    %195 = tpu.matmul %190, %12, %cst_52 {dimension_numbers = #tpu.dot_dimension_numbers<[1], [0], [0], [1], [0, 0, 1, 1], [], []>} : vector<4x32xf32>, vector<32x96xf32>, vector<4x96xf32> -> vector<4x96xf32>
    %196 = arith.addf %195, %15 : vector<4x96xf32>
    %197 = vector.extract_strided_slice %194 {offsets = [0, 0], sizes = [4, 32], strides = [1, 1]} : vector<4x96xf32> to vector<4x32xf32>
    %198 = vector.extract_strided_slice %196 {offsets = [0, 0], sizes = [4, 32], strides = [1, 1]} : vector<4x96xf32> to vector<4x32xf32>
    %199 = arith.addf %197, %198 : vector<4x32xf32>
    %200 = arith.negf %199 : vector<4x32xf32>
    %201 = math.exp %200 : vector<4x32xf32>
    %cst_53 = arith.constant 1.000000e+00 : f32
    %202 = vector.broadcast %cst_53 : f32 to vector<4x32xf32>
    %203 = arith.addf %202, %201 : vector<4x32xf32>
    %204 = arith.divf %202, %203 : vector<4x32xf32>
    %205 = vector.extract_strided_slice %194 {offsets = [0, 32], sizes = [4, 32], strides = [1, 1]} : vector<4x96xf32> to vector<4x32xf32>
    %206 = vector.extract_strided_slice %196 {offsets = [0, 32], sizes = [4, 32], strides = [1, 1]} : vector<4x96xf32> to vector<4x32xf32>
    %207 = arith.addf %205, %206 : vector<4x32xf32>
    %208 = arith.negf %207 : vector<4x32xf32>
    %209 = math.exp %208 : vector<4x32xf32>
    %cst_54 = arith.constant 1.000000e+00 : f32
    %210 = vector.broadcast %cst_54 : f32 to vector<4x32xf32>
    %211 = arith.addf %210, %209 : vector<4x32xf32>
    %212 = arith.divf %210, %211 : vector<4x32xf32>
    %213 = vector.extract_strided_slice %194 {offsets = [0, 64], sizes = [4, 32], strides = [1, 1]} : vector<4x96xf32> to vector<4x32xf32>
    %214 = vector.extract_strided_slice %196 {offsets = [0, 64], sizes = [4, 32], strides = [1, 1]} : vector<4x96xf32> to vector<4x32xf32>
    %215 = arith.mulf %204, %214 : vector<4x32xf32>
    %216 = arith.addf %213, %215 : vector<4x32xf32>
    %217 = math.tanh %216 : vector<4x32xf32>
    %cst_55 = arith.constant 1.000000e+00 : f32
    %218 = vector.broadcast %cst_55 : f32 to vector<4x32xf32>
    %219 = arith.subf %218, %212 : vector<4x32xf32>
    %220 = arith.mulf %219, %217 : vector<4x32xf32>
    %221 = arith.mulf %212, %190 : vector<4x32xf32>
    %222 = arith.addf %220, %221 : vector<4x32xf32>
    %c4_i32 = arith.constant 4 : i32
    %223 = arith.addi %3, %c4_i32 : i32
    %224 = vector.broadcast %223 : i32 to vector<4x1xi32>
    %225 = arith.cmpi sgt, %4, %224 : vector<4x1xi32>
    %226 = arith.extui %225 : vector<4x1xi1> to vector<4x1xi32>
    %227 = arith.sitofp %226 : vector<4x1xi32> to vector<4x1xf32>
    %228 = vector.broadcast %227 : vector<4x1xf32> to vector<4x32xf32>
    %229 = arith.mulf %228, %222 : vector<4x32xf32>
    %cst_56 = arith.constant 1.000000e+00 : f32
    %230 = vector.broadcast %cst_56 : f32 to vector<4x1xf32>
    %231 = arith.subf %230, %227 : vector<4x1xf32>
    %232 = vector.broadcast %231 : vector<4x1xf32> to vector<4x32xf32>
    %233 = arith.mulf %232, %190 : vector<4x32xf32>
    %234 = arith.addf %229, %233 : vector<4x32xf32>
    %235 = vector.broadcast %227 : vector<4x1xf32> to vector<4x32xf32>
    %236 = arith.mulf %235, %234 : vector<4x32xf32>
    %c16_57 = arith.constant 16 : index
    %c0_58 = arith.constant 0 : index
    %237 = vector.load %arg16[%c16_57, %c0_58] : memref<32x32xf32, #tpu.memory_space<vmem>>, vector<4x32xf32>
    tpu.vector_store %arg16[%c16_57, %c0_58], %236 {strides = array<i32>} : memref<32x32xf32, #tpu.memory_space<vmem>>, vector<4x32xf32>,
    %c20 = arith.constant 20 : index
    %c0_59 = arith.constant 0 : index
    %238 = vector.load %arg21[%c20, %c0_59] : memref<32x96xf32, #tpu.memory_space<vmem>>, vector<4x96xf32>
    %cst_60 = arith.constant dense<0.000000e+00> : vector<4x96xf32>
    %239 = tpu.matmul %234, %12, %cst_60 {dimension_numbers = #tpu.dot_dimension_numbers<[1], [0], [0], [1], [0, 0, 1, 1], [], []>} : vector<4x32xf32>, vector<32x96xf32>, vector<4x96xf32> -> vector<4x96xf32>
    %240 = arith.addf %239, %15 : vector<4x96xf32>
    %241 = vector.extract_strided_slice %238 {offsets = [0, 0], sizes = [4, 32], strides = [1, 1]} : vector<4x96xf32> to vector<4x32xf32>
    %242 = vector.extract_strided_slice %240 {offsets = [0, 0], sizes = [4, 32], strides = [1, 1]} : vector<4x96xf32> to vector<4x32xf32>
    %243 = arith.addf %241, %242 : vector<4x32xf32>
    %244 = arith.negf %243 : vector<4x32xf32>
    %245 = math.exp %244 : vector<4x32xf32>
    %cst_61 = arith.constant 1.000000e+00 : f32
    %246 = vector.broadcast %cst_61 : f32 to vector<4x32xf32>
    %247 = arith.addf %246, %245 : vector<4x32xf32>
    %248 = arith.divf %246, %247 : vector<4x32xf32>
    %249 = vector.extract_strided_slice %238 {offsets = [0, 32], sizes = [4, 32], strides = [1, 1]} : vector<4x96xf32> to vector<4x32xf32>
    %250 = vector.extract_strided_slice %240 {offsets = [0, 32], sizes = [4, 32], strides = [1, 1]} : vector<4x96xf32> to vector<4x32xf32>
    %251 = arith.addf %249, %250 : vector<4x32xf32>
    %252 = arith.negf %251 : vector<4x32xf32>
    %253 = math.exp %252 : vector<4x32xf32>
    %cst_62 = arith.constant 1.000000e+00 : f32
    %254 = vector.broadcast %cst_62 : f32 to vector<4x32xf32>
    %255 = arith.addf %254, %253 : vector<4x32xf32>
    %256 = arith.divf %254, %255 : vector<4x32xf32>
    %257 = vector.extract_strided_slice %238 {offsets = [0, 64], sizes = [4, 32], strides = [1, 1]} : vector<4x96xf32> to vector<4x32xf32>
    %258 = vector.extract_strided_slice %240 {offsets = [0, 64], sizes = [4, 32], strides = [1, 1]} : vector<4x96xf32> to vector<4x32xf32>
    %259 = arith.mulf %248, %258 : vector<4x32xf32>
    %260 = arith.addf %257, %259 : vector<4x32xf32>
    %261 = math.tanh %260 : vector<4x32xf32>
    %cst_63 = arith.constant 1.000000e+00 : f32
    %262 = vector.broadcast %cst_63 : f32 to vector<4x32xf32>
    %263 = arith.subf %262, %256 : vector<4x32xf32>
    %264 = arith.mulf %263, %261 : vector<4x32xf32>
    %265 = arith.mulf %256, %234 : vector<4x32xf32>
    %266 = arith.addf %264, %265 : vector<4x32xf32>
    %c5_i32 = arith.constant 5 : i32
    %267 = arith.addi %3, %c5_i32 : i32
    %268 = vector.broadcast %267 : i32 to vector<4x1xi32>
    %269 = arith.cmpi sgt, %4, %268 : vector<4x1xi32>
    %270 = arith.extui %269 : vector<4x1xi1> to vector<4x1xi32>
    %271 = arith.sitofp %270 : vector<4x1xi32> to vector<4x1xf32>
    %272 = vector.broadcast %271 : vector<4x1xf32> to vector<4x32xf32>
    %273 = arith.mulf %272, %266 : vector<4x32xf32>
    %cst_64 = arith.constant 1.000000e+00 : f32
    %274 = vector.broadcast %cst_64 : f32 to vector<4x1xf32>
    %275 = arith.subf %274, %271 : vector<4x1xf32>
    %276 = vector.broadcast %275 : vector<4x1xf32> to vector<4x32xf32>
    %277 = arith.mulf %276, %234 : vector<4x32xf32>
    %278 = arith.addf %273, %277 : vector<4x32xf32>
    %279 = vector.broadcast %271 : vector<4x1xf32> to vector<4x32xf32>
    %280 = arith.mulf %279, %278 : vector<4x32xf32>
    %c20_65 = arith.constant 20 : index
    %c0_66 = arith.constant 0 : index
    %281 = vector.load %arg16[%c20_65, %c0_66] : memref<32x32xf32, #tpu.memory_space<vmem>>, vector<4x32xf32>
    tpu.vector_store %arg16[%c20_65, %c0_66], %280 {strides = array<i32>} : memref<32x32xf32, #tpu.memory_space<vmem>>, vector<4x32xf32>,
    %c24 = arith.constant 24 : index
    %c0_67 = arith.constant 0 : index
    %282 = vector.load %arg21[%c24, %c0_67] : memref<32x96xf32, #tpu.memory_space<vmem>>, vector<4x96xf32>
    %cst_68 = arith.constant dense<0.000000e+00> : vector<4x96xf32>
    %283 = tpu.matmul %278, %12, %cst_68 {dimension_numbers = #tpu.dot_dimension_numbers<[1], [0], [0], [1], [0, 0, 1, 1], [], []>} : vector<4x32xf32>, vector<32x96xf32>, vector<4x96xf32> -> vector<4x96xf32>
    %284 = arith.addf %283, %15 : vector<4x96xf32>
    %285 = vector.extract_strided_slice %282 {offsets = [0, 0], sizes = [4, 32], strides = [1, 1]} : vector<4x96xf32> to vector<4x32xf32>
    %286 = vector.extract_strided_slice %284 {offsets = [0, 0], sizes = [4, 32], strides = [1, 1]} : vector<4x96xf32> to vector<4x32xf32>
    %287 = arith.addf %285, %286 : vector<4x32xf32>
    %288 = arith.negf %287 : vector<4x32xf32>
    %289 = math.exp %288 : vector<4x32xf32>
    %cst_69 = arith.constant 1.000000e+00 : f32
    %290 = vector.broadcast %cst_69 : f32 to vector<4x32xf32>
    %291 = arith.addf %290, %289 : vector<4x32xf32>
    %292 = arith.divf %290, %291 : vector<4x32xf32>
    %293 = vector.extract_strided_slice %282 {offsets = [0, 32], sizes = [4, 32], strides = [1, 1]} : vector<4x96xf32> to vector<4x32xf32>
    %294 = vector.extract_strided_slice %284 {offsets = [0, 32], sizes = [4, 32], strides = [1, 1]} : vector<4x96xf32> to vector<4x32xf32>
    %295 = arith.addf %293, %294 : vector<4x32xf32>
    %296 = arith.negf %295 : vector<4x32xf32>
    %297 = math.exp %296 : vector<4x32xf32>
    %cst_70 = arith.constant 1.000000e+00 : f32
    %298 = vector.broadcast %cst_70 : f32 to vector<4x32xf32>
    %299 = arith.addf %298, %297 : vector<4x32xf32>
    %300 = arith.divf %298, %299 : vector<4x32xf32>
    %301 = vector.extract_strided_slice %282 {offsets = [0, 64], sizes = [4, 32], strides = [1, 1]} : vector<4x96xf32> to vector<4x32xf32>
    %302 = vector.extract_strided_slice %284 {offsets = [0, 64], sizes = [4, 32], strides = [1, 1]} : vector<4x96xf32> to vector<4x32xf32>
    %303 = arith.mulf %292, %302 : vector<4x32xf32>
    %304 = arith.addf %301, %303 : vector<4x32xf32>
    %305 = math.tanh %304 : vector<4x32xf32>
    %cst_71 = arith.constant 1.000000e+00 : f32
    %306 = vector.broadcast %cst_71 : f32 to vector<4x32xf32>
    %307 = arith.subf %306, %300 : vector<4x32xf32>
    %308 = arith.mulf %307, %305 : vector<4x32xf32>
    %309 = arith.mulf %300, %278 : vector<4x32xf32>
    %310 = arith.addf %308, %309 : vector<4x32xf32>
    %c6_i32 = arith.constant 6 : i32
    %311 = arith.addi %3, %c6_i32 : i32
    %312 = vector.broadcast %311 : i32 to vector<4x1xi32>
    %313 = arith.cmpi sgt, %4, %312 : vector<4x1xi32>
    %314 = arith.extui %313 : vector<4x1xi1> to vector<4x1xi32>
    %315 = arith.sitofp %314 : vector<4x1xi32> to vector<4x1xf32>
    %316 = vector.broadcast %315 : vector<4x1xf32> to vector<4x32xf32>
    %317 = arith.mulf %316, %310 : vector<4x32xf32>
    %cst_72 = arith.constant 1.000000e+00 : f32
    %318 = vector.broadcast %cst_72 : f32 to vector<4x1xf32>
    %319 = arith.subf %318, %315 : vector<4x1xf32>
    %320 = vector.broadcast %319 : vector<4x1xf32> to vector<4x32xf32>
    %321 = arith.mulf %320, %278 : vector<4x32xf32>
    %322 = arith.addf %317, %321 : vector<4x32xf32>
    %323 = vector.broadcast %315 : vector<4x1xf32> to vector<4x32xf32>
    %324 = arith.mulf %323, %322 : vector<4x32xf32>
    %c24_73 = arith.constant 24 : index
    %c0_74 = arith.constant 0 : index
    %325 = vector.load %arg16[%c24_73, %c0_74] : memref<32x32xf32, #tpu.memory_space<vmem>>, vector<4x32xf32>
    tpu.vector_store %arg16[%c24_73, %c0_74], %324 {strides = array<i32>} : memref<32x32xf32, #tpu.memory_space<vmem>>, vector<4x32xf32>,
    %c28 = arith.constant 28 : index
    %c0_75 = arith.constant 0 : index
    %326 = vector.load %arg21[%c28, %c0_75] : memref<32x96xf32, #tpu.memory_space<vmem>>, vector<4x96xf32>
    %cst_76 = arith.constant dense<0.000000e+00> : vector<4x96xf32>
    %327 = tpu.matmul %322, %12, %cst_76 {dimension_numbers = #tpu.dot_dimension_numbers<[1], [0], [0], [1], [0, 0, 1, 1], [], []>} : vector<4x32xf32>, vector<32x96xf32>, vector<4x96xf32> -> vector<4x96xf32>
    %328 = arith.addf %327, %15 : vector<4x96xf32>
    %329 = vector.extract_strided_slice %326 {offsets = [0, 0], sizes = [4, 32], strides = [1, 1]} : vector<4x96xf32> to vector<4x32xf32>
    %330 = vector.extract_strided_slice %328 {offsets = [0, 0], sizes = [4, 32], strides = [1, 1]} : vector<4x96xf32> to vector<4x32xf32>
    %331 = arith.addf %329, %330 : vector<4x32xf32>
    %332 = arith.negf %331 : vector<4x32xf32>
    %333 = math.exp %332 : vector<4x32xf32>
    %cst_77 = arith.constant 1.000000e+00 : f32
    %334 = vector.broadcast %cst_77 : f32 to vector<4x32xf32>
    %335 = arith.addf %334, %333 : vector<4x32xf32>
    %336 = arith.divf %334, %335 : vector<4x32xf32>
    %337 = vector.extract_strided_slice %326 {offsets = [0, 32], sizes = [4, 32], strides = [1, 1]} : vector<4x96xf32> to vector<4x32xf32>
    %338 = vector.extract_strided_slice %328 {offsets = [0, 32], sizes = [4, 32], strides = [1, 1]} : vector<4x96xf32> to vector<4x32xf32>
    %339 = arith.addf %337, %338 : vector<4x32xf32>
    %340 = arith.negf %339 : vector<4x32xf32>
    %341 = math.exp %340 : vector<4x32xf32>
    %cst_78 = arith.constant 1.000000e+00 : f32
    %342 = vector.broadcast %cst_78 : f32 to vector<4x32xf32>
    %343 = arith.addf %342, %341 : vector<4x32xf32>
    %344 = arith.divf %342, %343 : vector<4x32xf32>
    %345 = vector.extract_strided_slice %326 {offsets = [0, 64], sizes = [4, 32], strides = [1, 1]} : vector<4x96xf32> to vector<4x32xf32>
    %346 = vector.extract_strided_slice %328 {offsets = [0, 64], sizes = [4, 32], strides = [1, 1]} : vector<4x96xf32> to vector<4x32xf32>
    %347 = arith.mulf %336, %346 : vector<4x32xf32>
    %348 = arith.addf %345, %347 : vector<4x32xf32>
    %349 = math.tanh %348 : vector<4x32xf32>
    %cst_79 = arith.constant 1.000000e+00 : f32
    %350 = vector.broadcast %cst_79 : f32 to vector<4x32xf32>
    %351 = arith.subf %350, %344 : vector<4x32xf32>
    %352 = arith.mulf %351, %349 : vector<4x32xf32>
    %353 = arith.mulf %344, %322 : vector<4x32xf32>
    %354 = arith.addf %352, %353 : vector<4x32xf32>
    %c7_i32 = arith.constant 7 : i32
    %355 = arith.addi %3, %c7_i32 : i32
    %356 = vector.broadcast %355 : i32 to vector<4x1xi32>
    %357 = arith.cmpi sgt, %4, %356 : vector<4x1xi32>
    %358 = arith.extui %357 : vector<4x1xi1> to vector<4x1xi32>
    %359 = arith.sitofp %358 : vector<4x1xi32> to vector<4x1xf32>
    %360 = vector.broadcast %359 : vector<4x1xf32> to vector<4x32xf32>
    %361 = arith.mulf %360, %354 : vector<4x32xf32>
    %cst_80 = arith.constant 1.000000e+00 : f32
    %362 = vector.broadcast %cst_80 : f32 to vector<4x1xf32>
    %363 = arith.subf %362, %359 : vector<4x1xf32>
    %364 = vector.broadcast %363 : vector<4x1xf32> to vector<4x32xf32>
    %365 = arith.mulf %364, %322 : vector<4x32xf32>
    %366 = arith.addf %361, %365 : vector<4x32xf32>
    %367 = vector.broadcast %359 : vector<4x1xf32> to vector<4x32xf32>
    %368 = arith.mulf %367, %366 : vector<4x32xf32>
    %c28_81 = arith.constant 28 : index
    %c0_82 = arith.constant 0 : index
    %369 = vector.load %arg16[%c28_81, %c0_82] : memref<32x32xf32, #tpu.memory_space<vmem>>, vector<4x32xf32>
    tpu.vector_store %arg16[%c28_81, %c0_82], %368 {strides = array<i32>} : memref<32x32xf32, #tpu.memory_space<vmem>>, vector<4x32xf32>,
    %c0_83 = arith.constant 0 : index
    %c0_84 = arith.constant 0 : index
    %c0_85 = arith.constant 0 : index
    %370 = vector.load %arg20[%c0_83, %c0_84, %c0_85] : memref<2x4x32xf32, #tpu.memory_space<vmem>>, vector<1x4x32xf32>
    %371 = vector.shape_cast %370 : vector<1x4x32xf32> to vector<4x32xf32>
    %372 = vector.shape_cast %366 : vector<4x32xf32> to vector<1x4x32xf32>
    tpu.vector_store %arg20[%c0_83, %c0_84, %c0_85], %372 {strides = array<i32>} : memref<2x4x32xf32, #tpu.memory_space<vmem>>, vector<1x4x32xf32>,
    %c0_86 = arith.constant 0 : index
    %c0_87 = arith.constant 0 : index
    %373 = vector.load %arg16[%c0_86, %c0_87] : memref<32x32xf32, #tpu.memory_space<vmem>>, vector<32x32xf32>
    %374 = arith.truncf %373 : vector<32x32xf32> to vector<32x32xbf16>
    %c0_88 = arith.constant 0 : index
    %c0_89 = arith.constant 0 : index
    %375 = vector.load %arg8[%c0_88, %c0_89] : memref<32x96xbf16, #tpu.memory_space<vmem>>, vector<32x96xbf16>
    %cst_90 = arith.constant dense<0.000000e+00> : vector<32x96xf32>
    %376 = tpu.matmul %374, %375, %cst_90 {dimension_numbers = #tpu.dot_dimension_numbers<[1], [0], [0], [1], [0, 0, 1, 1], [], []>} : vector<32x32xbf16>, vector<32x96xbf16>, vector<32x96xf32> -> vector<32x96xf32>
    %c0_91 = arith.constant 0 : index
    %c0_92 = arith.constant 0 : index
    %377 = vector.load %arg10[%c0_91, %c0_92] : memref<1x96xf32, #tpu.memory_space<vmem>>, vector<1x96xf32>
    %378 = vector.broadcast %377 : vector<1x96xf32> to vector<32x96xf32>
    %379 = arith.addf %376, %378 : vector<32x96xf32>
    %c0_93 = arith.constant 0 : index
    %c0_94 = arith.constant 0 : index
    %380 = vector.load %arg21[%c0_93, %c0_94] : memref<32x96xf32, #tpu.memory_space<vmem>>, vector<32x96xf32>
    tpu.vector_store %arg21[%c0_93, %c0_94], %379 {strides = array<i32>} : memref<32x96xf32, #tpu.memory_space<vmem>>, vector<32x96xf32>,
    %c0_95 = arith.constant 0 : index
    %c0_96 = arith.constant 0 : index
    %381 = vector.load %arg9[%c0_95, %c0_96] : memref<32x96xf32, #tpu.memory_space<vmem>>, vector<32x96xf32>
    %c0_97 = arith.constant 0 : index
    %c0_98 = arith.constant 0 : index
    %382 = vector.load %arg11[%c0_97, %c0_98] : memref<1x96xf32, #tpu.memory_space<vmem>>, vector<1x96xf32>
    %383 = vector.shape_cast %382 : vector<1x96xf32> to vector<1x96xf32>
    %384 = vector.broadcast %383 : vector<1x96xf32> to vector<4x96xf32>
    %c1 = arith.constant 1 : index
    %c0_99 = arith.constant 0 : index
    %c0_100 = arith.constant 0 : index
    %385 = vector.load %arg20[%c1, %c0_99, %c0_100] : memref<2x4x32xf32, #tpu.memory_space<vmem>>, vector<1x4x32xf32>
    %386 = vector.shape_cast %385 : vector<1x4x32xf32> to vector<4x32xf32>
    %c0_101 = arith.constant 0 : index
    %c0_102 = arith.constant 0 : index
    %387 = vector.load %arg21[%c0_101, %c0_102] : memref<32x96xf32, #tpu.memory_space<vmem>>, vector<4x96xf32>
    %cst_103 = arith.constant dense<0.000000e+00> : vector<4x96xf32>
    %388 = tpu.matmul %386, %381, %cst_103 {dimension_numbers = #tpu.dot_dimension_numbers<[1], [0], [0], [1], [0, 0, 1, 1], [], []>} : vector<4x32xf32>, vector<32x96xf32>, vector<4x96xf32> -> vector<4x96xf32>
    %389 = arith.addf %388, %384 : vector<4x96xf32>
    %390 = vector.extract_strided_slice %387 {offsets = [0, 0], sizes = [4, 32], strides = [1, 1]} : vector<4x96xf32> to vector<4x32xf32>
    %391 = vector.extract_strided_slice %389 {offsets = [0, 0], sizes = [4, 32], strides = [1, 1]} : vector<4x96xf32> to vector<4x32xf32>
    %392 = arith.addf %390, %391 : vector<4x32xf32>
    %393 = arith.negf %392 : vector<4x32xf32>
    %394 = math.exp %393 : vector<4x32xf32>
    %cst_104 = arith.constant 1.000000e+00 : f32
    %395 = vector.broadcast %cst_104 : f32 to vector<4x32xf32>
    %396 = arith.addf %395, %394 : vector<4x32xf32>
    %397 = arith.divf %395, %396 : vector<4x32xf32>
    %398 = vector.extract_strided_slice %387 {offsets = [0, 32], sizes = [4, 32], strides = [1, 1]} : vector<4x96xf32> to vector<4x32xf32>
    %399 = vector.extract_strided_slice %389 {offsets = [0, 32], sizes = [4, 32], strides = [1, 1]} : vector<4x96xf32> to vector<4x32xf32>
    %400 = arith.addf %398, %399 : vector<4x32xf32>
    %401 = arith.negf %400 : vector<4x32xf32>
    %402 = math.exp %401 : vector<4x32xf32>
    %cst_105 = arith.constant 1.000000e+00 : f32
    %403 = vector.broadcast %cst_105 : f32 to vector<4x32xf32>
    %404 = arith.addf %403, %402 : vector<4x32xf32>
    %405 = arith.divf %403, %404 : vector<4x32xf32>
    %406 = vector.extract_strided_slice %387 {offsets = [0, 64], sizes = [4, 32], strides = [1, 1]} : vector<4x96xf32> to vector<4x32xf32>
    %407 = vector.extract_strided_slice %389 {offsets = [0, 64], sizes = [4, 32], strides = [1, 1]} : vector<4x96xf32> to vector<4x32xf32>
    %408 = arith.mulf %397, %407 : vector<4x32xf32>
    %409 = arith.addf %406, %408 : vector<4x32xf32>
    %410 = math.tanh %409 : vector<4x32xf32>
    %cst_106 = arith.constant 1.000000e+00 : f32
    %411 = vector.broadcast %cst_106 : f32 to vector<4x32xf32>
    %412 = arith.subf %411, %405 : vector<4x32xf32>
    %413 = arith.mulf %412, %410 : vector<4x32xf32>
    %414 = arith.mulf %405, %386 : vector<4x32xf32>
    %415 = arith.addf %413, %414 : vector<4x32xf32>
    %c0_i32_107 = arith.constant 0 : i32
    %416 = arith.addi %3, %c0_i32_107 : i32
    %417 = vector.broadcast %416 : i32 to vector<4x1xi32>
    %418 = arith.cmpi sgt, %4, %417 : vector<4x1xi32>
    %419 = arith.extui %418 : vector<4x1xi1> to vector<4x1xi32>
    %420 = arith.sitofp %419 : vector<4x1xi32> to vector<4x1xf32>
    %421 = vector.broadcast %420 : vector<4x1xf32> to vector<4x32xf32>
    %422 = arith.mulf %421, %415 : vector<4x32xf32>
    %cst_108 = arith.constant 1.000000e+00 : f32
    %423 = vector.broadcast %cst_108 : f32 to vector<4x1xf32>
    %424 = arith.subf %423, %420 : vector<4x1xf32>
    %425 = vector.broadcast %424 : vector<4x1xf32> to vector<4x32xf32>
    %426 = arith.mulf %425, %386 : vector<4x32xf32>
    %427 = arith.addf %422, %426 : vector<4x32xf32>
    %428 = vector.broadcast %420 : vector<4x1xf32> to vector<4x32xf32>
    %429 = arith.mulf %428, %427 : vector<4x32xf32>
    %c0_109 = arith.constant 0 : index
    %c0_110 = arith.constant 0 : index
    %430 = vector.load %arg16[%c0_109, %c0_110] : memref<32x32xf32, #tpu.memory_space<vmem>>, vector<4x32xf32>
    tpu.vector_store %arg16[%c0_109, %c0_110], %429 {strides = array<i32>} : memref<32x32xf32, #tpu.memory_space<vmem>>, vector<4x32xf32>,
    %c4_111 = arith.constant 4 : index
    %c0_112 = arith.constant 0 : index
    %431 = vector.load %arg21[%c4_111, %c0_112] : memref<32x96xf32, #tpu.memory_space<vmem>>, vector<4x96xf32>
    %cst_113 = arith.constant dense<0.000000e+00> : vector<4x96xf32>
    %432 = tpu.matmul %427, %381, %cst_113 {dimension_numbers = #tpu.dot_dimension_numbers<[1], [0], [0], [1], [0, 0, 1, 1], [], []>} : vector<4x32xf32>, vector<32x96xf32>, vector<4x96xf32> -> vector<4x96xf32>
    %433 = arith.addf %432, %384 : vector<4x96xf32>
    %434 = vector.extract_strided_slice %431 {offsets = [0, 0], sizes = [4, 32], strides = [1, 1]} : vector<4x96xf32> to vector<4x32xf32>
    %435 = vector.extract_strided_slice %433 {offsets = [0, 0], sizes = [4, 32], strides = [1, 1]} : vector<4x96xf32> to vector<4x32xf32>
    %436 = arith.addf %434, %435 : vector<4x32xf32>
    %437 = arith.negf %436 : vector<4x32xf32>
    %438 = math.exp %437 : vector<4x32xf32>
    %cst_114 = arith.constant 1.000000e+00 : f32
    %439 = vector.broadcast %cst_114 : f32 to vector<4x32xf32>
    %440 = arith.addf %439, %438 : vector<4x32xf32>
    %441 = arith.divf %439, %440 : vector<4x32xf32>
    %442 = vector.extract_strided_slice %431 {offsets = [0, 32], sizes = [4, 32], strides = [1, 1]} : vector<4x96xf32> to vector<4x32xf32>
    %443 = vector.extract_strided_slice %433 {offsets = [0, 32], sizes = [4, 32], strides = [1, 1]} : vector<4x96xf32> to vector<4x32xf32>
    %444 = arith.addf %442, %443 : vector<4x32xf32>
    %445 = arith.negf %444 : vector<4x32xf32>
    %446 = math.exp %445 : vector<4x32xf32>
    %cst_115 = arith.constant 1.000000e+00 : f32
    %447 = vector.broadcast %cst_115 : f32 to vector<4x32xf32>
    %448 = arith.addf %447, %446 : vector<4x32xf32>
    %449 = arith.divf %447, %448 : vector<4x32xf32>
    %450 = vector.extract_strided_slice %431 {offsets = [0, 64], sizes = [4, 32], strides = [1, 1]} : vector<4x96xf32> to vector<4x32xf32>
    %451 = vector.extract_strided_slice %433 {offsets = [0, 64], sizes = [4, 32], strides = [1, 1]} : vector<4x96xf32> to vector<4x32xf32>
    %452 = arith.mulf %441, %451 : vector<4x32xf32>
    %453 = arith.addf %450, %452 : vector<4x32xf32>
    %454 = math.tanh %453 : vector<4x32xf32>
    %cst_116 = arith.constant 1.000000e+00 : f32
    %455 = vector.broadcast %cst_116 : f32 to vector<4x32xf32>
    %456 = arith.subf %455, %449 : vector<4x32xf32>
    %457 = arith.mulf %456, %454 : vector<4x32xf32>
    %458 = arith.mulf %449, %427 : vector<4x32xf32>
    %459 = arith.addf %457, %458 : vector<4x32xf32>
    %c1_i32_117 = arith.constant 1 : i32
    %460 = arith.addi %3, %c1_i32_117 : i32
    %461 = vector.broadcast %460 : i32 to vector<4x1xi32>
    %462 = arith.cmpi sgt, %4, %461 : vector<4x1xi32>
    %463 = arith.extui %462 : vector<4x1xi1> to vector<4x1xi32>
    %464 = arith.sitofp %463 : vector<4x1xi32> to vector<4x1xf32>
    %465 = vector.broadcast %464 : vector<4x1xf32> to vector<4x32xf32>
    %466 = arith.mulf %465, %459 : vector<4x32xf32>
    %cst_118 = arith.constant 1.000000e+00 : f32
    %467 = vector.broadcast %cst_118 : f32 to vector<4x1xf32>
    %468 = arith.subf %467, %464 : vector<4x1xf32>
    %469 = vector.broadcast %468 : vector<4x1xf32> to vector<4x32xf32>
    %470 = arith.mulf %469, %427 : vector<4x32xf32>
    %471 = arith.addf %466, %470 : vector<4x32xf32>
    %472 = vector.broadcast %464 : vector<4x1xf32> to vector<4x32xf32>
    %473 = arith.mulf %472, %471 : vector<4x32xf32>
    %c4_119 = arith.constant 4 : index
    %c0_120 = arith.constant 0 : index
    %474 = vector.load %arg16[%c4_119, %c0_120] : memref<32x32xf32, #tpu.memory_space<vmem>>, vector<4x32xf32>
    tpu.vector_store %arg16[%c4_119, %c0_120], %473 {strides = array<i32>} : memref<32x32xf32, #tpu.memory_space<vmem>>, vector<4x32xf32>,
    %c8_121 = arith.constant 8 : index
    %c0_122 = arith.constant 0 : index
    %475 = vector.load %arg21[%c8_121, %c0_122] : memref<32x96xf32, #tpu.memory_space<vmem>>, vector<4x96xf32>
    %cst_123 = arith.constant dense<0.000000e+00> : vector<4x96xf32>
    %476 = tpu.matmul %471, %381, %cst_123 {dimension_numbers = #tpu.dot_dimension_numbers<[1], [0], [0], [1], [0, 0, 1, 1], [], []>} : vector<4x32xf32>, vector<32x96xf32>, vector<4x96xf32> -> vector<4x96xf32>
    %477 = arith.addf %476, %384 : vector<4x96xf32>
    %478 = vector.extract_strided_slice %475 {offsets = [0, 0], sizes = [4, 32], strides = [1, 1]} : vector<4x96xf32> to vector<4x32xf32>
    %479 = vector.extract_strided_slice %477 {offsets = [0, 0], sizes = [4, 32], strides = [1, 1]} : vector<4x96xf32> to vector<4x32xf32>
    %480 = arith.addf %478, %479 : vector<4x32xf32>
    %481 = arith.negf %480 : vector<4x32xf32>
    %482 = math.exp %481 : vector<4x32xf32>
    %cst_124 = arith.constant 1.000000e+00 : f32
    %483 = vector.broadcast %cst_124 : f32 to vector<4x32xf32>
    %484 = arith.addf %483, %482 : vector<4x32xf32>
    %485 = arith.divf %483, %484 : vector<4x32xf32>
    %486 = vector.extract_strided_slice %475 {offsets = [0, 32], sizes = [4, 32], strides = [1, 1]} : vector<4x96xf32> to vector<4x32xf32>
    %487 = vector.extract_strided_slice %477 {offsets = [0, 32], sizes = [4, 32], strides = [1, 1]} : vector<4x96xf32> to vector<4x32xf32>
    %488 = arith.addf %486, %487 : vector<4x32xf32>
    %489 = arith.negf %488 : vector<4x32xf32>
    %490 = math.exp %489 : vector<4x32xf32>
    %cst_125 = arith.constant 1.000000e+00 : f32
    %491 = vector.broadcast %cst_125 : f32 to vector<4x32xf32>
    %492 = arith.addf %491, %490 : vector<4x32xf32>
    %493 = arith.divf %491, %492 : vector<4x32xf32>
    %494 = vector.extract_strided_slice %475 {offsets = [0, 64], sizes = [4, 32], strides = [1, 1]} : vector<4x96xf32> to vector<4x32xf32>
    %495 = vector.extract_strided_slice %477 {offsets = [0, 64], sizes = [4, 32], strides = [1, 1]} : vector<4x96xf32> to vector<4x32xf32>
    %496 = arith.mulf %485, %495 : vector<4x32xf32>
    %497 = arith.addf %494, %496 : vector<4x32xf32>
    %498 = math.tanh %497 : vector<4x32xf32>
    %cst_126 = arith.constant 1.000000e+00 : f32
    %499 = vector.broadcast %cst_126 : f32 to vector<4x32xf32>
    %500 = arith.subf %499, %493 : vector<4x32xf32>
    %501 = arith.mulf %500, %498 : vector<4x32xf32>
    %502 = arith.mulf %493, %471 : vector<4x32xf32>
    %503 = arith.addf %501, %502 : vector<4x32xf32>
    %c2_i32_127 = arith.constant 2 : i32
    %504 = arith.addi %3, %c2_i32_127 : i32
    %505 = vector.broadcast %504 : i32 to vector<4x1xi32>
    %506 = arith.cmpi sgt, %4, %505 : vector<4x1xi32>
    %507 = arith.extui %506 : vector<4x1xi1> to vector<4x1xi32>
    %508 = arith.sitofp %507 : vector<4x1xi32> to vector<4x1xf32>
    %509 = vector.broadcast %508 : vector<4x1xf32> to vector<4x32xf32>
    %510 = arith.mulf %509, %503 : vector<4x32xf32>
    %cst_128 = arith.constant 1.000000e+00 : f32
    %511 = vector.broadcast %cst_128 : f32 to vector<4x1xf32>
    %512 = arith.subf %511, %508 : vector<4x1xf32>
    %513 = vector.broadcast %512 : vector<4x1xf32> to vector<4x32xf32>
    %514 = arith.mulf %513, %471 : vector<4x32xf32>
    %515 = arith.addf %510, %514 : vector<4x32xf32>
    %516 = vector.broadcast %508 : vector<4x1xf32> to vector<4x32xf32>
    %517 = arith.mulf %516, %515 : vector<4x32xf32>
    %c8_129 = arith.constant 8 : index
    %c0_130 = arith.constant 0 : index
    %518 = vector.load %arg16[%c8_129, %c0_130] : memref<32x32xf32, #tpu.memory_space<vmem>>, vector<4x32xf32>
    tpu.vector_store %arg16[%c8_129, %c0_130], %517 {strides = array<i32>} : memref<32x32xf32, #tpu.memory_space<vmem>>, vector<4x32xf32>,
    %c12_131 = arith.constant 12 : index
    %c0_132 = arith.constant 0 : index
    %519 = vector.load %arg21[%c12_131, %c0_132] : memref<32x96xf32, #tpu.memory_space<vmem>>, vector<4x96xf32>
    %cst_133 = arith.constant dense<0.000000e+00> : vector<4x96xf32>
    %520 = tpu.matmul %515, %381, %cst_133 {dimension_numbers = #tpu.dot_dimension_numbers<[1], [0], [0], [1], [0, 0, 1, 1], [], []>} : vector<4x32xf32>, vector<32x96xf32>, vector<4x96xf32> -> vector<4x96xf32>
    %521 = arith.addf %520, %384 : vector<4x96xf32>
    %522 = vector.extract_strided_slice %519 {offsets = [0, 0], sizes = [4, 32], strides = [1, 1]} : vector<4x96xf32> to vector<4x32xf32>
    %523 = vector.extract_strided_slice %521 {offsets = [0, 0], sizes = [4, 32], strides = [1, 1]} : vector<4x96xf32> to vector<4x32xf32>
    %524 = arith.addf %522, %523 : vector<4x32xf32>
    %525 = arith.negf %524 : vector<4x32xf32>
    %526 = math.exp %525 : vector<4x32xf32>
    %cst_134 = arith.constant 1.000000e+00 : f32
    %527 = vector.broadcast %cst_134 : f32 to vector<4x32xf32>
    %528 = arith.addf %527, %526 : vector<4x32xf32>
    %529 = arith.divf %527, %528 : vector<4x32xf32>
    %530 = vector.extract_strided_slice %519 {offsets = [0, 32], sizes = [4, 32], strides = [1, 1]} : vector<4x96xf32> to vector<4x32xf32>
    %531 = vector.extract_strided_slice %521 {offsets = [0, 32], sizes = [4, 32], strides = [1, 1]} : vector<4x96xf32> to vector<4x32xf32>
    %532 = arith.addf %530, %531 : vector<4x32xf32>
    %533 = arith.negf %532 : vector<4x32xf32>
    %534 = math.exp %533 : vector<4x32xf32>
    %cst_135 = arith.constant 1.000000e+00 : f32
    %535 = vector.broadcast %cst_135 : f32 to vector<4x32xf32>
    %536 = arith.addf %535, %534 : vector<4x32xf32>
    %537 = arith.divf %535, %536 : vector<4x32xf32>
    %538 = vector.extract_strided_slice %519 {offsets = [0, 64], sizes = [4, 32], strides = [1, 1]} : vector<4x96xf32> to vector<4x32xf32>
    %539 = vector.extract_strided_slice %521 {offsets = [0, 64], sizes = [4, 32], strides = [1, 1]} : vector<4x96xf32> to vector<4x32xf32>
    %540 = arith.mulf %529, %539 : vector<4x32xf32>
    %541 = arith.addf %538, %540 : vector<4x32xf32>
    %542 = math.tanh %541 : vector<4x32xf32>
    %cst_136 = arith.constant 1.000000e+00 : f32
    %543 = vector.broadcast %cst_136 : f32 to vector<4x32xf32>
    %544 = arith.subf %543, %537 : vector<4x32xf32>
    %545 = arith.mulf %544, %542 : vector<4x32xf32>
    %546 = arith.mulf %537, %515 : vector<4x32xf32>
    %547 = arith.addf %545, %546 : vector<4x32xf32>
    %c3_i32_137 = arith.constant 3 : i32
    %548 = arith.addi %3, %c3_i32_137 : i32
    %549 = vector.broadcast %548 : i32 to vector<4x1xi32>
    %550 = arith.cmpi sgt, %4, %549 : vector<4x1xi32>
    %551 = arith.extui %550 : vector<4x1xi1> to vector<4x1xi32>
    %552 = arith.sitofp %551 : vector<4x1xi32> to vector<4x1xf32>
    %553 = vector.broadcast %552 : vector<4x1xf32> to vector<4x32xf32>
    %554 = arith.mulf %553, %547 : vector<4x32xf32>
    %cst_138 = arith.constant 1.000000e+00 : f32
    %555 = vector.broadcast %cst_138 : f32 to vector<4x1xf32>
    %556 = arith.subf %555, %552 : vector<4x1xf32>
    %557 = vector.broadcast %556 : vector<4x1xf32> to vector<4x32xf32>
    %558 = arith.mulf %557, %515 : vector<4x32xf32>
    %559 = arith.addf %554, %558 : vector<4x32xf32>
    %560 = vector.broadcast %552 : vector<4x1xf32> to vector<4x32xf32>
    %561 = arith.mulf %560, %559 : vector<4x32xf32>
    %c12_139 = arith.constant 12 : index
    %c0_140 = arith.constant 0 : index
    %562 = vector.load %arg16[%c12_139, %c0_140] : memref<32x32xf32, #tpu.memory_space<vmem>>, vector<4x32xf32>
    tpu.vector_store %arg16[%c12_139, %c0_140], %561 {strides = array<i32>} : memref<32x32xf32, #tpu.memory_space<vmem>>, vector<4x32xf32>,
    %c16_141 = arith.constant 16 : index
    %c0_142 = arith.constant 0 : index
    %563 = vector.load %arg21[%c16_141, %c0_142] : memref<32x96xf32, #tpu.memory_space<vmem>>, vector<4x96xf32>
    %cst_143 = arith.constant dense<0.000000e+00> : vector<4x96xf32>
    %564 = tpu.matmul %559, %381, %cst_143 {dimension_numbers = #tpu.dot_dimension_numbers<[1], [0], [0], [1], [0, 0, 1, 1], [], []>} : vector<4x32xf32>, vector<32x96xf32>, vector<4x96xf32> -> vector<4x96xf32>
    %565 = arith.addf %564, %384 : vector<4x96xf32>
    %566 = vector.extract_strided_slice %563 {offsets = [0, 0], sizes = [4, 32], strides = [1, 1]} : vector<4x96xf32> to vector<4x32xf32>
    %567 = vector.extract_strided_slice %565 {offsets = [0, 0], sizes = [4, 32], strides = [1, 1]} : vector<4x96xf32> to vector<4x32xf32>
    %568 = arith.addf %566, %567 : vector<4x32xf32>
    %569 = arith.negf %568 : vector<4x32xf32>
    %570 = math.exp %569 : vector<4x32xf32>
    %cst_144 = arith.constant 1.000000e+00 : f32
    %571 = vector.broadcast %cst_144 : f32 to vector<4x32xf32>
    %572 = arith.addf %571, %570 : vector<4x32xf32>
    %573 = arith.divf %571, %572 : vector<4x32xf32>
    %574 = vector.extract_strided_slice %563 {offsets = [0, 32], sizes = [4, 32], strides = [1, 1]} : vector<4x96xf32> to vector<4x32xf32>
    %575 = vector.extract_strided_slice %565 {offsets = [0, 32], sizes = [4, 32], strides = [1, 1]} : vector<4x96xf32> to vector<4x32xf32>
    %576 = arith.addf %574, %575 : vector<4x32xf32>
    %577 = arith.negf %576 : vector<4x32xf32>
    %578 = math.exp %577 : vector<4x32xf32>
    %cst_145 = arith.constant 1.000000e+00 : f32
    %579 = vector.broadcast %cst_145 : f32 to vector<4x32xf32>
    %580 = arith.addf %579, %578 : vector<4x32xf32>
    %581 = arith.divf %579, %580 : vector<4x32xf32>
    %582 = vector.extract_strided_slice %563 {offsets = [0, 64], sizes = [4, 32], strides = [1, 1]} : vector<4x96xf32> to vector<4x32xf32>
    %583 = vector.extract_strided_slice %565 {offsets = [0, 64], sizes = [4, 32], strides = [1, 1]} : vector<4x96xf32> to vector<4x32xf32>
    %584 = arith.mulf %573, %583 : vector<4x32xf32>
    %585 = arith.addf %582, %584 : vector<4x32xf32>
    %586 = math.tanh %585 : vector<4x32xf32>
    %cst_146 = arith.constant 1.000000e+00 : f32
    %587 = vector.broadcast %cst_146 : f32 to vector<4x32xf32>
    %588 = arith.subf %587, %581 : vector<4x32xf32>
    %589 = arith.mulf %588, %586 : vector<4x32xf32>
    %590 = arith.mulf %581, %559 : vector<4x32xf32>
    %591 = arith.addf %589, %590 : vector<4x32xf32>
    %c4_i32_147 = arith.constant 4 : i32
    %592 = arith.addi %3, %c4_i32_147 : i32
    %593 = vector.broadcast %592 : i32 to vector<4x1xi32>
    %594 = arith.cmpi sgt, %4, %593 : vector<4x1xi32>
    %595 = arith.extui %594 : vector<4x1xi1> to vector<4x1xi32>
    %596 = arith.sitofp %595 : vector<4x1xi32> to vector<4x1xf32>
    %597 = vector.broadcast %596 : vector<4x1xf32> to vector<4x32xf32>
    %598 = arith.mulf %597, %591 : vector<4x32xf32>
    %cst_148 = arith.constant 1.000000e+00 : f32
    %599 = vector.broadcast %cst_148 : f32 to vector<4x1xf32>
    %600 = arith.subf %599, %596 : vector<4x1xf32>
    %601 = vector.broadcast %600 : vector<4x1xf32> to vector<4x32xf32>
    %602 = arith.mulf %601, %559 : vector<4x32xf32>
    %603 = arith.addf %598, %602 : vector<4x32xf32>
    %604 = vector.broadcast %596 : vector<4x1xf32> to vector<4x32xf32>
    %605 = arith.mulf %604, %603 : vector<4x32xf32>
    %c16_149 = arith.constant 16 : index
    %c0_150 = arith.constant 0 : index
    %606 = vector.load %arg16[%c16_149, %c0_150] : memref<32x32xf32, #tpu.memory_space<vmem>>, vector<4x32xf32>
    tpu.vector_store %arg16[%c16_149, %c0_150], %605 {strides = array<i32>} : memref<32x32xf32, #tpu.memory_space<vmem>>, vector<4x32xf32>,
    %c20_151 = arith.constant 20 : index
    %c0_152 = arith.constant 0 : index
    %607 = vector.load %arg21[%c20_151, %c0_152] : memref<32x96xf32, #tpu.memory_space<vmem>>, vector<4x96xf32>
    %cst_153 = arith.constant dense<0.000000e+00> : vector<4x96xf32>
    %608 = tpu.matmul %603, %381, %cst_153 {dimension_numbers = #tpu.dot_dimension_numbers<[1], [0], [0], [1], [0, 0, 1, 1], [], []>} : vector<4x32xf32>, vector<32x96xf32>, vector<4x96xf32> -> vector<4x96xf32>
    %609 = arith.addf %608, %384 : vector<4x96xf32>
    %610 = vector.extract_strided_slice %607 {offsets = [0, 0], sizes = [4, 32], strides = [1, 1]} : vector<4x96xf32> to vector<4x32xf32>
    %611 = vector.extract_strided_slice %609 {offsets = [0, 0], sizes = [4, 32], strides = [1, 1]} : vector<4x96xf32> to vector<4x32xf32>
    %612 = arith.addf %610, %611 : vector<4x32xf32>
    %613 = arith.negf %612 : vector<4x32xf32>
    %614 = math.exp %613 : vector<4x32xf32>
    %cst_154 = arith.constant 1.000000e+00 : f32
    %615 = vector.broadcast %cst_154 : f32 to vector<4x32xf32>
    %616 = arith.addf %615, %614 : vector<4x32xf32>
    %617 = arith.divf %615, %616 : vector<4x32xf32>
    %618 = vector.extract_strided_slice %607 {offsets = [0, 32], sizes = [4, 32], strides = [1, 1]} : vector<4x96xf32> to vector<4x32xf32>
    %619 = vector.extract_strided_slice %609 {offsets = [0, 32], sizes = [4, 32], strides = [1, 1]} : vector<4x96xf32> to vector<4x32xf32>
    %620 = arith.addf %618, %619 : vector<4x32xf32>
    %621 = arith.negf %620 : vector<4x32xf32>
    %622 = math.exp %621 : vector<4x32xf32>
    %cst_155 = arith.constant 1.000000e+00 : f32
    %623 = vector.broadcast %cst_155 : f32 to vector<4x32xf32>
    %624 = arith.addf %623, %622 : vector<4x32xf32>
    %625 = arith.divf %623, %624 : vector<4x32xf32>
    %626 = vector.extract_strided_slice %607 {offsets = [0, 64], sizes = [4, 32], strides = [1, 1]} : vector<4x96xf32> to vector<4x32xf32>
    %627 = vector.extract_strided_slice %609 {offsets = [0, 64], sizes = [4, 32], strides = [1, 1]} : vector<4x96xf32> to vector<4x32xf32>
    %628 = arith.mulf %617, %627 : vector<4x32xf32>
    %629 = arith.addf %626, %628 : vector<4x32xf32>
    %630 = math.tanh %629 : vector<4x32xf32>
    %cst_156 = arith.constant 1.000000e+00 : f32
    %631 = vector.broadcast %cst_156 : f32 to vector<4x32xf32>
    %632 = arith.subf %631, %625 : vector<4x32xf32>
    %633 = arith.mulf %632, %630 : vector<4x32xf32>
    %634 = arith.mulf %625, %603 : vector<4x32xf32>
    %635 = arith.addf %633, %634 : vector<4x32xf32>
    %c5_i32_157 = arith.constant 5 : i32
    %636 = arith.addi %3, %c5_i32_157 : i32
    %637 = vector.broadcast %636 : i32 to vector<4x1xi32>
    %638 = arith.cmpi sgt, %4, %637 : vector<4x1xi32>
    %639 = arith.extui %638 : vector<4x1xi1> to vector<4x1xi32>
    %640 = arith.sitofp %639 : vector<4x1xi32> to vector<4x1xf32>
    %641 = vector.broadcast %640 : vector<4x1xf32> to vector<4x32xf32>
    %642 = arith.mulf %641, %635 : vector<4x32xf32>
    %cst_158 = arith.constant 1.000000e+00 : f32
    %643 = vector.broadcast %cst_158 : f32 to vector<4x1xf32>
    %644 = arith.subf %643, %640 : vector<4x1xf32>
    %645 = vector.broadcast %644 : vector<4x1xf32> to vector<4x32xf32>
    %646 = arith.mulf %645, %603 : vector<4x32xf32>
    %647 = arith.addf %642, %646 : vector<4x32xf32>
    %648 = vector.broadcast %640 : vector<4x1xf32> to vector<4x32xf32>
    %649 = arith.mulf %648, %647 : vector<4x32xf32>
    %c20_159 = arith.constant 20 : index
    %c0_160 = arith.constant 0 : index
    %650 = vector.load %arg16[%c20_159, %c0_160] : memref<32x32xf32, #tpu.memory_space<vmem>>, vector<4x32xf32>
    tpu.vector_store %arg16[%c20_159, %c0_160], %649 {strides = array<i32>} : memref<32x32xf32, #tpu.memory_space<vmem>>, vector<4x32xf32>,
    %c24_161 = arith.constant 24 : index
    %c0_162 = arith.constant 0 : index
    %651 = vector.load %arg21[%c24_161, %c0_162] : memref<32x96xf32, #tpu.memory_space<vmem>>, vector<4x96xf32>
    %cst_163 = arith.constant dense<0.000000e+00> : vector<4x96xf32>
    %652 = tpu.matmul %647, %381, %cst_163 {dimension_numbers = #tpu.dot_dimension_numbers<[1], [0], [0], [1], [0, 0, 1, 1], [], []>} : vector<4x32xf32>, vector<32x96xf32>, vector<4x96xf32> -> vector<4x96xf32>
    %653 = arith.addf %652, %384 : vector<4x96xf32>
    %654 = vector.extract_strided_slice %651 {offsets = [0, 0], sizes = [4, 32], strides = [1, 1]} : vector<4x96xf32> to vector<4x32xf32>
    %655 = vector.extract_strided_slice %653 {offsets = [0, 0], sizes = [4, 32], strides = [1, 1]} : vector<4x96xf32> to vector<4x32xf32>
    %656 = arith.addf %654, %655 : vector<4x32xf32>
    %657 = arith.negf %656 : vector<4x32xf32>
    %658 = math.exp %657 : vector<4x32xf32>
    %cst_164 = arith.constant 1.000000e+00 : f32
    %659 = vector.broadcast %cst_164 : f32 to vector<4x32xf32>
    %660 = arith.addf %659, %658 : vector<4x32xf32>
    %661 = arith.divf %659, %660 : vector<4x32xf32>
    %662 = vector.extract_strided_slice %651 {offsets = [0, 32], sizes = [4, 32], strides = [1, 1]} : vector<4x96xf32> to vector<4x32xf32>
    %663 = vector.extract_strided_slice %653 {offsets = [0, 32], sizes = [4, 32], strides = [1, 1]} : vector<4x96xf32> to vector<4x32xf32>
    %664 = arith.addf %662, %663 : vector<4x32xf32>
    %665 = arith.negf %664 : vector<4x32xf32>
    %666 = math.exp %665 : vector<4x32xf32>
    %cst_165 = arith.constant 1.000000e+00 : f32
    %667 = vector.broadcast %cst_165 : f32 to vector<4x32xf32>
    %668 = arith.addf %667, %666 : vector<4x32xf32>
    %669 = arith.divf %667, %668 : vector<4x32xf32>
    %670 = vector.extract_strided_slice %651 {offsets = [0, 64], sizes = [4, 32], strides = [1, 1]} : vector<4x96xf32> to vector<4x32xf32>
    %671 = vector.extract_strided_slice %653 {offsets = [0, 64], sizes = [4, 32], strides = [1, 1]} : vector<4x96xf32> to vector<4x32xf32>
    %672 = arith.mulf %661, %671 : vector<4x32xf32>
    %673 = arith.addf %670, %672 : vector<4x32xf32>
    %674 = math.tanh %673 : vector<4x32xf32>
    %cst_166 = arith.constant 1.000000e+00 : f32
    %675 = vector.broadcast %cst_166 : f32 to vector<4x32xf32>
    %676 = arith.subf %675, %669 : vector<4x32xf32>
    %677 = arith.mulf %676, %674 : vector<4x32xf32>
    %678 = arith.mulf %669, %647 : vector<4x32xf32>
    %679 = arith.addf %677, %678 : vector<4x32xf32>
    %c6_i32_167 = arith.constant 6 : i32
    %680 = arith.addi %3, %c6_i32_167 : i32
    %681 = vector.broadcast %680 : i32 to vector<4x1xi32>
    %682 = arith.cmpi sgt, %4, %681 : vector<4x1xi32>
    %683 = arith.extui %682 : vector<4x1xi1> to vector<4x1xi32>
    %684 = arith.sitofp %683 : vector<4x1xi32> to vector<4x1xf32>
    %685 = vector.broadcast %684 : vector<4x1xf32> to vector<4x32xf32>
    %686 = arith.mulf %685, %679 : vector<4x32xf32>
    %cst_168 = arith.constant 1.000000e+00 : f32
    %687 = vector.broadcast %cst_168 : f32 to vector<4x1xf32>
    %688 = arith.subf %687, %684 : vector<4x1xf32>
    %689 = vector.broadcast %688 : vector<4x1xf32> to vector<4x32xf32>
    %690 = arith.mulf %689, %647 : vector<4x32xf32>
    %691 = arith.addf %686, %690 : vector<4x32xf32>
    %692 = vector.broadcast %684 : vector<4x1xf32> to vector<4x32xf32>
    %693 = arith.mulf %692, %691 : vector<4x32xf32>
    %c24_169 = arith.constant 24 : index
    %c0_170 = arith.constant 0 : index
    %694 = vector.load %arg16[%c24_169, %c0_170] : memref<32x32xf32, #tpu.memory_space<vmem>>, vector<4x32xf32>
    tpu.vector_store %arg16[%c24_169, %c0_170], %693 {strides = array<i32>} : memref<32x32xf32, #tpu.memory_space<vmem>>, vector<4x32xf32>,
    %c28_171 = arith.constant 28 : index
    %c0_172 = arith.constant 0 : index
    %695 = vector.load %arg21[%c28_171, %c0_172] : memref<32x96xf32, #tpu.memory_space<vmem>>, vector<4x96xf32>
    %cst_173 = arith.constant dense<0.000000e+00> : vector<4x96xf32>
    %696 = tpu.matmul %691, %381, %cst_173 {dimension_numbers = #tpu.dot_dimension_numbers<[1], [0], [0], [1], [0, 0, 1, 1], [], []>} : vector<4x32xf32>, vector<32x96xf32>, vector<4x96xf32> -> vector<4x96xf32>
    %697 = arith.addf %696, %384 : vector<4x96xf32>
    %698 = vector.extract_strided_slice %695 {offsets = [0, 0], sizes = [4, 32], strides = [1, 1]} : vector<4x96xf32> to vector<4x32xf32>
    %699 = vector.extract_strided_slice %697 {offsets = [0, 0], sizes = [4, 32], strides = [1, 1]} : vector<4x96xf32> to vector<4x32xf32>
    %700 = arith.addf %698, %699 : vector<4x32xf32>
    %701 = arith.negf %700 : vector<4x32xf32>
    %702 = math.exp %701 : vector<4x32xf32>
    %cst_174 = arith.constant 1.000000e+00 : f32
    %703 = vector.broadcast %cst_174 : f32 to vector<4x32xf32>
    %704 = arith.addf %703, %702 : vector<4x32xf32>
    %705 = arith.divf %703, %704 : vector<4x32xf32>
    %706 = vector.extract_strided_slice %695 {offsets = [0, 32], sizes = [4, 32], strides = [1, 1]} : vector<4x96xf32> to vector<4x32xf32>
    %707 = vector.extract_strided_slice %697 {offsets = [0, 32], sizes = [4, 32], strides = [1, 1]} : vector<4x96xf32> to vector<4x32xf32>
    %708 = arith.addf %706, %707 : vector<4x32xf32>
    %709 = arith.negf %708 : vector<4x32xf32>
    %710 = math.exp %709 : vector<4x32xf32>
    %cst_175 = arith.constant 1.000000e+00 : f32
    %711 = vector.broadcast %cst_175 : f32 to vector<4x32xf32>
    %712 = arith.addf %711, %710 : vector<4x32xf32>
    %713 = arith.divf %711, %712 : vector<4x32xf32>
    %714 = vector.extract_strided_slice %695 {offsets = [0, 64], sizes = [4, 32], strides = [1, 1]} : vector<4x96xf32> to vector<4x32xf32>
    %715 = vector.extract_strided_slice %697 {offsets = [0, 64], sizes = [4, 32], strides = [1, 1]} : vector<4x96xf32> to vector<4x32xf32>
    %716 = arith.mulf %705, %715 : vector<4x32xf32>
    %717 = arith.addf %714, %716 : vector<4x32xf32>
    %718 = math.tanh %717 : vector<4x32xf32>
    %cst_176 = arith.constant 1.000000e+00 : f32
    %719 = vector.broadcast %cst_176 : f32 to vector<4x32xf32>
    %720 = arith.subf %719, %713 : vector<4x32xf32>
    %721 = arith.mulf %720, %718 : vector<4x32xf32>
    %722 = arith.mulf %713, %691 : vector<4x32xf32>
    %723 = arith.addf %721, %722 : vector<4x32xf32>
    %c7_i32_177 = arith.constant 7 : i32
    %724 = arith.addi %3, %c7_i32_177 : i32
    %725 = vector.broadcast %724 : i32 to vector<4x1xi32>
    %726 = arith.cmpi sgt, %4, %725 : vector<4x1xi32>
    %727 = arith.extui %726 : vector<4x1xi1> to vector<4x1xi32>
    %728 = arith.sitofp %727 : vector<4x1xi32> to vector<4x1xf32>
    %729 = vector.broadcast %728 : vector<4x1xf32> to vector<4x32xf32>
    %730 = arith.mulf %729, %723 : vector<4x32xf32>
    %cst_178 = arith.constant 1.000000e+00 : f32
    %731 = vector.broadcast %cst_178 : f32 to vector<4x1xf32>
    %732 = arith.subf %731, %728 : vector<4x1xf32>
    %733 = vector.broadcast %732 : vector<4x1xf32> to vector<4x32xf32>
    %734 = arith.mulf %733, %691 : vector<4x32xf32>
    %735 = arith.addf %730, %734 : vector<4x32xf32>
    %736 = vector.broadcast %728 : vector<4x1xf32> to vector<4x32xf32>
    %737 = arith.mulf %736, %735 : vector<4x32xf32>
    %c28_179 = arith.constant 28 : index
    %c0_180 = arith.constant 0 : index
    %738 = vector.load %arg16[%c28_179, %c0_180] : memref<32x32xf32, #tpu.memory_space<vmem>>, vector<4x32xf32>
    tpu.vector_store %arg16[%c28_179, %c0_180], %737 {strides = array<i32>} : memref<32x32xf32, #tpu.memory_space<vmem>>, vector<4x32xf32>,
    %c1_181 = arith.constant 1 : index
    %c0_182 = arith.constant 0 : index
    %c0_183 = arith.constant 0 : index
    %739 = vector.load %arg20[%c1_181, %c0_182, %c0_183] : memref<2x4x32xf32, #tpu.memory_space<vmem>>, vector<1x4x32xf32>
    %740 = vector.shape_cast %739 : vector<1x4x32xf32> to vector<4x32xf32>
    %741 = vector.shape_cast %735 : vector<4x32xf32> to vector<1x4x32xf32>
    tpu.vector_store %arg20[%c1_181, %c0_182, %c0_183], %741 {strides = array<i32>} : memref<2x4x32xf32, #tpu.memory_space<vmem>>, vector<1x4x32xf32>,
    %c0_184 = arith.constant 0 : index
    %c0_185 = arith.constant 0 : index
    %742 = vector.load %arg16[%c0_184, %c0_185] : memref<32x32xf32, #tpu.memory_space<vmem>>, vector<32x32xf32>
    %743 = arith.truncf %742 : vector<32x32xf32> to vector<32x32xbf16>
    %c0_186 = arith.constant 0 : index
    %c0_187 = arith.constant 0 : index
    %744 = vector.load %arg12[%c0_186, %c0_187] : memref<32x8xbf16, #tpu.memory_space<vmem>>, vector<32x8xbf16>
    %cst_188 = arith.constant dense<0.000000e+00> : vector<32x8xf32>
    %745 = tpu.matmul %743, %744, %cst_188 {dimension_numbers = #tpu.dot_dimension_numbers<[1], [0], [0], [1], [0, 0, 1, 1], [], []>} : vector<32x32xbf16>, vector<32x8xbf16>, vector<32x8xf32> -> vector<32x8xf32>
    %c0_189 = arith.constant 0 : index
    %c0_190 = arith.constant 0 : index
    %746 = vector.load %arg13[%c0_189, %c0_190] : memref<1x8xf32, #tpu.memory_space<vmem>>, vector<1x8xf32>
    %747 = vector.broadcast %746 : vector<1x8xf32> to vector<32x8xf32>
    %748 = arith.addf %745, %747 : vector<32x8xf32>
    %c0_191 = arith.constant 0 : index
    %c0_192 = arith.constant 0 : index
    %749 = vector.load %arg14[%c0_191, %c0_192] : memref<32x8xbf16, #tpu.memory_space<vmem>>, vector<32x8xbf16>
    %cst_193 = arith.constant dense<0.000000e+00> : vector<32x8xf32>
    %750 = tpu.matmul %743, %749, %cst_193 {dimension_numbers = #tpu.dot_dimension_numbers<[1], [0], [0], [1], [0, 0, 1, 1], [], []>} : vector<32x32xbf16>, vector<32x8xbf16>, vector<32x8xf32> -> vector<32x8xf32>
    %c0_194 = arith.constant 0 : index
    %c0_195 = arith.constant 0 : index
    %751 = vector.load %arg15[%c0_194, %c0_195] : memref<1x8xf32, #tpu.memory_space<vmem>>, vector<1x8xf32>
    %752 = vector.broadcast %751 : vector<1x8xf32> to vector<32x8xf32>
    %753 = arith.addf %750, %752 : vector<32x8xf32>
    %c0_196 = arith.constant 0 : index
    %c0_197 = arith.constant 0 : index
    %754 = vector.load %arg17[%c0_196, %c0_197] : memref<32x8xf32, #tpu.memory_space<vmem>>, vector<32x8xf32>
    tpu.vector_store %arg17[%c0_196, %c0_197], %748 {strides = array<i32>} : memref<32x8xf32, #tpu.memory_space<vmem>>, vector<32x8xf32>,
    %c0_198 = arith.constant 0 : index
    %c0_199 = arith.constant 0 : index
    %755 = vector.load %arg18[%c0_198, %c0_199] : memref<32x8xf32, #tpu.memory_space<vmem>>, vector<32x8xf32>
    tpu.vector_store %arg18[%c0_198, %c0_199], %753 {strides = array<i32>} : memref<32x8xf32, #tpu.memory_space<vmem>>, vector<32x8xf32>,
    %756 = math.exp %753 : vector<32x8xf32>
    %c0_200 = arith.constant 0 : index
    %c0_201 = arith.constant 0 : index
    %757 = vector.load %arg3[%c0_200, %c0_201] : memref<32x8xf32, #tpu.memory_space<vmem>>, vector<32x8xf32>
    %758 = arith.mulf %756, %757 : vector<32x8xf32>
    %759 = arith.addf %748, %758 : vector<32x8xf32>
    %760 = arith.truncf %759 : vector<32x8xf32> to vector<32x8xbf16>
    %c0_202 = arith.constant 0 : index
    %c0_203 = arith.constant 0 : index
    %761 = vector.load %arg19[%c0_202, %c0_203] : memref<32x8xbf16, #tpu.memory_space<vmem>>, vector<32x8xbf16>
    tpu.vector_store %arg19[%c0_202, %c0_203], %760 {strides = array<i32>} : memref<32x8xbf16, #tpu.memory_space<vmem>>, vector<32x8xbf16>,
    return
  }
  func.func @transform_0(%arg0: i32) -> (i32, i32) {
    %c0_i32 = arith.constant 0 : i32
    %c0_i32_0 = arith.constant 0 : i32
    %c0_i32_1 = arith.constant 0 : i32
    return %c0_i32, %c0_i32_0 : i32, i32
  }
  func.func @transform_1(%arg0: i32) -> (i32, i32) {
    %c0_i32 = arith.constant 0 : i32
    %c0_i32_0 = arith.constant 0 : i32
    return %arg0, %c0_i32 : i32, i32
  }
  func.func @transform_2(%arg0: i32) -> (i32, i32) {
    %c0_i32 = arith.constant 0 : i32
    %c0_i32_0 = arith.constant 0 : i32
    return %arg0, %c0_i32 : i32, i32
  }
  func.func @transform_3(%arg0: i32) -> (i32, i32) {
    %c0_i32 = arith.constant 0 : i32
    %c0_i32_0 = arith.constant 0 : i32
    %c0_i32_1 = arith.constant 0 : i32
    return %c0_i32, %c0_i32_0 : i32, i32
  }
  func.func @transform_4(%arg0: i32) -> (i32, i32) {
    %c0_i32 = arith.constant 0 : i32
    %c0_i32_0 = arith.constant 0 : i32
    %c0_i32_1 = arith.constant 0 : i32
    return %c0_i32, %c0_i32_0 : i32, i32
  }
  func.func @transform_5(%arg0: i32) -> (i32, i32) {
    %c0_i32 = arith.constant 0 : i32
    %c0_i32_0 = arith.constant 0 : i32
    %c0_i32_1 = arith.constant 0 : i32
    return %c0_i32, %c0_i32_0 : i32, i32
  }
  func.func @transform_6(%arg0: i32) -> (i32, i32) {
    %c0_i32 = arith.constant 0 : i32
    %c0_i32_0 = arith.constant 0 : i32
    %c0_i32_1 = arith.constant 0 : i32
    return %c0_i32, %c0_i32_0 : i32, i32
  }
  func.func @transform_7(%arg0: i32) -> (i32, i32) {
    %c0_i32 = arith.constant 0 : i32
    %c0_i32_0 = arith.constant 0 : i32
    %c0_i32_1 = arith.constant 0 : i32
    return %c0_i32, %c0_i32_0 : i32, i32
  }
  func.func @transform_8(%arg0: i32) -> (i32, i32) {
    %c0_i32 = arith.constant 0 : i32
    %c0_i32_0 = arith.constant 0 : i32
    %c0_i32_1 = arith.constant 0 : i32
    return %c0_i32, %c0_i32_0 : i32, i32
  }
  func.func @transform_9(%arg0: i32) -> (i32, i32) {
    %c0_i32 = arith.constant 0 : i32
    %c0_i32_0 = arith.constant 0 : i32
    %c0_i32_1 = arith.constant 0 : i32
    return %c0_i32, %c0_i32_0 : i32, i32
  }
  func.func @transform_10(%arg0: i32) -> (i32, i32) {
    %c0_i32 = arith.constant 0 : i32
    %c0_i32_0 = arith.constant 0 : i32
    %c0_i32_1 = arith.constant 0 : i32
    return %c0_i32, %c0_i32_0 : i32, i32
  }
  func.func @transform_11(%arg0: i32) -> (i32, i32) {
    %c0_i32 = arith.constant 0 : i32
    %c0_i32_0 = arith.constant 0 : i32
    %c0_i32_1 = arith.constant 0 : i32
    return %c0_i32, %c0_i32_0 : i32, i32
  }
  func.func @transform_12(%arg0: i32) -> (i32, i32) {
    %c0_i32 = arith.constant 0 : i32
    %c0_i32_0 = arith.constant 0 : i32
    %c0_i32_1 = arith.constant 0 : i32
    return %c0_i32, %c0_i32_0 : i32, i32
  }
  func.func @transform_13(%arg0: i32) -> (i32, i32) {
    %c0_i32 = arith.constant 0 : i32
    %c0_i32_0 = arith.constant 0 : i32
    %c0_i32_1 = arith.constant 0 : i32
    return %c0_i32, %c0_i32_0 : i32, i32
  }
  func.func @transform_14(%arg0: i32) -> (i32, i32) {
    %c0_i32 = arith.constant 0 : i32
    %c0_i32_0 = arith.constant 0 : i32
    %c0_i32_1 = arith.constant 0 : i32
    return %c0_i32, %c0_i32_0 : i32, i32
  }
  func.func @transform_15(%arg0: i32) -> (i32, i32) {
    %c0_i32 = arith.constant 0 : i32
    %c0_i32_0 = arith.constant 0 : i32
    return %arg0, %c0_i32 : i32, i32
  }
  func.func @transform_16(%arg0: i32) -> (i32, i32) {
    %c0_i32 = arith.constant 0 : i32
    %c0_i32_0 = arith.constant 0 : i32
    return %arg0, %c0_i32 : i32, i32
  }
  func.func @transform_17(%arg0: i32) -> (i32, i32) {
    %c0_i32 = arith.constant 0 : i32
    %c0_i32_0 = arith.constant 0 : i32
    return %arg0, %c0_i32 : i32, i32
  }
  func.func @transform_18(%arg0: i32) -> (i32, i32) {
    %c0_i32 = arith.constant 0 : i32
    %c0_i32_0 = arith.constant 0 : i32
    return %arg0, %c0_i32 : i32, i32
  }
}

module attributes {stable_mosaic.version = 11 : i64} {
  func.func @kernel(%arg0: i32, %arg1: i32, %arg2: memref<4x1xi32, #tpu.memory_space<vmem>>, %arg3: memref<32x8xbf16, #tpu.memory_space<vmem>>, %arg4: memref<1x8x96xbf16, #tpu.memory_space<vmem>>, %arg5: memref<1x1x96xf32, #tpu.memory_space<vmem>>, %arg6: memref<1x32x96xf32, #tpu.memory_space<vmem>>, %arg7: memref<1x1x96xf32, #tpu.memory_space<vmem>>, %arg8: memref<1x32x96xbf16, #tpu.memory_space<vmem>>, %arg9: memref<1x32x96xf32, #tpu.memory_space<vmem>>, %arg10: memref<1x1x96xf32, #tpu.memory_space<vmem>>, %arg11: memref<1x1x96xf32, #tpu.memory_space<vmem>>, %arg12: memref<1x32x16xbf16, #tpu.memory_space<vmem>>, %arg13: memref<1x1x16xf32, #tpu.memory_space<vmem>>, %arg14: memref<1x32x16xf32, #tpu.memory_space<vmem>>, %arg15: memref<2x4x32xf32, #tpu.memory_space<vmem>>, %arg16: memref<32x32xf32, #tpu.memory_space<vmem>>, %arg17: memref<32x96xf32, #tpu.memory_space<vmem>>) attributes {dimension_semantics = [#tpu.dimension_semantics<parallel>, #tpu.dimension_semantics<arbitrary>], iteration_bounds = array<i64: 3, 2>, scalar_prefetch = 0 : i64, scratch_operands = 3 : i64, tpu.core_type = #tpu.core_type<tc>, window_params = [{pipeline_mode = #tpu.pipeline_mode<synchronous>, transform_indices = @transform_0, window_bounds = array<i64: 4, 1>}, {transform_indices = @transform_1, window_bounds = array<i64: 32, 8>}, {transform_indices = @transform_2, window_bounds = array<i64: 1, 8, 96>}, {transform_indices = @transform_3, window_bounds = array<i64: 1, 1, 96>}, {transform_indices = @transform_4, window_bounds = array<i64: 1, 32, 96>}, {transform_indices = @transform_5, window_bounds = array<i64: 1, 1, 96>}, {transform_indices = @transform_6, window_bounds = array<i64: 1, 32, 96>}, {transform_indices = @transform_7, window_bounds = array<i64: 1, 32, 96>}, {transform_indices = @transform_8, window_bounds = array<i64: 1, 1, 96>}, {transform_indices = @transform_9, window_bounds = array<i64: 1, 1, 96>}, {transform_indices = @transform_10, window_bounds = array<i64: 1, 32, 16>}, {transform_indices = @transform_11, window_bounds = array<i64: 1, 1, 16>}, {transform_indices = @transform_12, window_bounds = array<i64: 1, 32, 16>}]} {
    %c0_i32 = arith.constant 0 : i32
    %0 = arith.cmpi eq, %arg1, %c0_i32 : i32
    %1 = arith.extui %0 : i1 to i32
    %c0_i32_0 = arith.constant 0 : i32
    %2 = arith.cmpi ne, %1, %c0_i32_0 : i32
    scf.if %2 {
      %cst_204 = arith.constant 0.000000e+00 : f32
      %762 = vector.broadcast %cst_204 : f32 to vector<2x4x32xf32>
      %c0_205 = arith.constant 0 : index
      %c0_206 = arith.constant 0 : index
      %c0_207 = arith.constant 0 : index
      %763 = vector.load %arg15[%c0_205, %c0_206, %c0_207] : memref<2x4x32xf32, #tpu.memory_space<vmem>>, vector<2x4x32xf32>
      tpu.vector_store %arg15[%c0_205, %c0_206, %c0_207], %762 {strides = array<i32>} : memref<2x4x32xf32, #tpu.memory_space<vmem>>, vector<2x4x32xf32>,
    } else {
    }
    %c8_i32 = arith.constant 8 : i32
    %3 = arith.muli %arg1, %c8_i32 : i32
    %c0 = arith.constant 0 : index
    %c0_1 = arith.constant 0 : index
    %4 = vector.load %arg2[%c0, %c0_1] : memref<4x1xi32, #tpu.memory_space<vmem>>, vector<4x1xi32>
    %c0_2 = arith.constant 0 : index
    %c0_3 = arith.constant 0 : index
    %5 = vector.load %arg3[%c0_2, %c0_3] : memref<32x8xbf16, #tpu.memory_space<vmem>>, vector<32x8xbf16>
    %c0_4 = arith.constant 0 : index
    %c0_5 = arith.constant 0 : index
    %c0_6 = arith.constant 0 : index
    %6 = vector.load %arg4[%c0_4, %c0_5, %c0_6] : memref<1x8x96xbf16, #tpu.memory_space<vmem>>, vector<1x8x96xbf16>
    %7 = vector.shape_cast %6 : vector<1x8x96xbf16> to vector<8x96xbf16>
    %cst = arith.constant dense<0.000000e+00> : vector<32x96xf32>
    %8 = tpu.matmul %5, %7, %cst {dimension_numbers = #tpu.dot_dimension_numbers<[1], [0], [0], [1], [0, 0, 1, 1], [], []>} : vector<32x8xbf16>, vector<8x96xbf16>, vector<32x96xf32> -> vector<32x96xf32>
    %c0_7 = arith.constant 0 : index
    %c0_8 = arith.constant 0 : index
    %c0_9 = arith.constant 0 : index
    %9 = vector.load %arg5[%c0_7, %c0_8, %c0_9] : memref<1x1x96xf32, #tpu.memory_space<vmem>>, vector<1x1x96xf32>
    %10 = vector.shape_cast %9 : vector<1x1x96xf32> to vector<1x96xf32>
    %11 = vector.broadcast %10 : vector<1x96xf32> to vector<32x96xf32>
    %12 = arith.addf %8, %11 : vector<32x96xf32>
    %c0_10 = arith.constant 0 : index
    %c0_11 = arith.constant 0 : index
    %13 = vector.load %arg17[%c0_10, %c0_11] : memref<32x96xf32, #tpu.memory_space<vmem>>, vector<32x96xf32>
    tpu.vector_store %arg17[%c0_10, %c0_11], %12 {strides = array<i32>} : memref<32x96xf32, #tpu.memory_space<vmem>>, vector<32x96xf32>,
    %c0_12 = arith.constant 0 : index
    %c0_13 = arith.constant 0 : index
    %c0_14 = arith.constant 0 : index
    %14 = vector.load %arg6[%c0_12, %c0_13, %c0_14] : memref<1x32x96xf32, #tpu.memory_space<vmem>>, vector<1x32x96xf32>
    %15 = vector.shape_cast %14 : vector<1x32x96xf32> to vector<32x96xf32>
    %c0_15 = arith.constant 0 : index
    %c0_16 = arith.constant 0 : index
    %c0_17 = arith.constant 0 : index
    %16 = vector.load %arg7[%c0_15, %c0_16, %c0_17] : memref<1x1x96xf32, #tpu.memory_space<vmem>>, vector<1x1x96xf32>
    %17 = vector.shape_cast %16 : vector<1x1x96xf32> to vector<1x96xf32>
    %18 = vector.shape_cast %17 : vector<1x96xf32> to vector<1x96xf32>
    %19 = vector.broadcast %18 : vector<1x96xf32> to vector<4x96xf32>
    %c0_18 = arith.constant 0 : index
    %c0_19 = arith.constant 0 : index
    %c0_20 = arith.constant 0 : index
    %20 = vector.load %arg15[%c0_18, %c0_19, %c0_20] : memref<2x4x32xf32, #tpu.memory_space<vmem>>, vector<1x4x32xf32>
    %21 = vector.shape_cast %20 : vector<1x4x32xf32> to vector<4x32xf32>
    %c0_21 = arith.constant 0 : index
    %c0_22 = arith.constant 0 : index
    %22 = vector.load %arg17[%c0_21, %c0_22] : memref<32x96xf32, #tpu.memory_space<vmem>>, vector<4x96xf32>
    %cst_23 = arith.constant dense<0.000000e+00> : vector<4x96xf32>
    %23 = tpu.matmul %21, %15, %cst_23 {dimension_numbers = #tpu.dot_dimension_numbers<[1], [0], [0], [1], [0, 0, 1, 1], [], []>} : vector<4x32xf32>, vector<32x96xf32>, vector<4x96xf32> -> vector<4x96xf32>
    %24 = arith.addf %23, %19 : vector<4x96xf32>
    %25 = vector.extract_strided_slice %22 {offsets = [0, 0], sizes = [4, 32], strides = [1, 1]} : vector<4x96xf32> to vector<4x32xf32>
    %26 = vector.extract_strided_slice %24 {offsets = [0, 0], sizes = [4, 32], strides = [1, 1]} : vector<4x96xf32> to vector<4x32xf32>
    %27 = arith.addf %25, %26 : vector<4x32xf32>
    %28 = arith.negf %27 : vector<4x32xf32>
    %29 = math.exp %28 : vector<4x32xf32>
    %cst_24 = arith.constant 1.000000e+00 : f32
    %30 = vector.broadcast %cst_24 : f32 to vector<4x32xf32>
    %31 = arith.addf %30, %29 : vector<4x32xf32>
    %32 = arith.divf %30, %31 : vector<4x32xf32>
    %33 = vector.extract_strided_slice %22 {offsets = [0, 32], sizes = [4, 32], strides = [1, 1]} : vector<4x96xf32> to vector<4x32xf32>
    %34 = vector.extract_strided_slice %24 {offsets = [0, 32], sizes = [4, 32], strides = [1, 1]} : vector<4x96xf32> to vector<4x32xf32>
    %35 = arith.addf %33, %34 : vector<4x32xf32>
    %36 = arith.negf %35 : vector<4x32xf32>
    %37 = math.exp %36 : vector<4x32xf32>
    %cst_25 = arith.constant 1.000000e+00 : f32
    %38 = vector.broadcast %cst_25 : f32 to vector<4x32xf32>
    %39 = arith.addf %38, %37 : vector<4x32xf32>
    %40 = arith.divf %38, %39 : vector<4x32xf32>
    %41 = vector.extract_strided_slice %22 {offsets = [0, 64], sizes = [4, 32], strides = [1, 1]} : vector<4x96xf32> to vector<4x32xf32>
    %42 = vector.extract_strided_slice %24 {offsets = [0, 64], sizes = [4, 32], strides = [1, 1]} : vector<4x96xf32> to vector<4x32xf32>
    %43 = arith.mulf %32, %42 : vector<4x32xf32>
    %44 = arith.addf %41, %43 : vector<4x32xf32>
    %45 = math.tanh %44 : vector<4x32xf32>
    %cst_26 = arith.constant 1.000000e+00 : f32
    %46 = vector.broadcast %cst_26 : f32 to vector<4x32xf32>
    %47 = arith.subf %46, %40 : vector<4x32xf32>
    %48 = arith.mulf %47, %45 : vector<4x32xf32>
    %49 = arith.mulf %40, %21 : vector<4x32xf32>
    %50 = arith.addf %48, %49 : vector<4x32xf32>
    %c0_i32_27 = arith.constant 0 : i32
    %51 = arith.addi %3, %c0_i32_27 : i32
    %52 = vector.broadcast %51 : i32 to vector<4x1xi32>
    %53 = arith.cmpi sgt, %4, %52 : vector<4x1xi32>
    %54 = arith.extui %53 : vector<4x1xi1> to vector<4x1xi32>
    %55 = arith.sitofp %54 : vector<4x1xi32> to vector<4x1xf32>
    %56 = vector.broadcast %55 : vector<4x1xf32> to vector<4x32xf32>
    %57 = arith.mulf %56, %50 : vector<4x32xf32>
    %cst_28 = arith.constant 1.000000e+00 : f32
    %58 = vector.broadcast %cst_28 : f32 to vector<4x1xf32>
    %59 = arith.subf %58, %55 : vector<4x1xf32>
    %60 = vector.broadcast %59 : vector<4x1xf32> to vector<4x32xf32>
    %61 = arith.mulf %60, %21 : vector<4x32xf32>
    %62 = arith.addf %57, %61 : vector<4x32xf32>
    %63 = vector.broadcast %55 : vector<4x1xf32> to vector<4x32xf32>
    %64 = arith.mulf %63, %62 : vector<4x32xf32>
    %c0_29 = arith.constant 0 : index
    %c0_30 = arith.constant 0 : index
    %65 = vector.load %arg16[%c0_29, %c0_30] : memref<32x32xf32, #tpu.memory_space<vmem>>, vector<4x32xf32>
    tpu.vector_store %arg16[%c0_29, %c0_30], %64 {strides = array<i32>} : memref<32x32xf32, #tpu.memory_space<vmem>>, vector<4x32xf32>,
    %c4 = arith.constant 4 : index
    %c0_31 = arith.constant 0 : index
    %66 = vector.load %arg17[%c4, %c0_31] : memref<32x96xf32, #tpu.memory_space<vmem>>, vector<4x96xf32>
    %cst_32 = arith.constant dense<0.000000e+00> : vector<4x96xf32>
    %67 = tpu.matmul %62, %15, %cst_32 {dimension_numbers = #tpu.dot_dimension_numbers<[1], [0], [0], [1], [0, 0, 1, 1], [], []>} : vector<4x32xf32>, vector<32x96xf32>, vector<4x96xf32> -> vector<4x96xf32>
    %68 = arith.addf %67, %19 : vector<4x96xf32>
    %69 = vector.extract_strided_slice %66 {offsets = [0, 0], sizes = [4, 32], strides = [1, 1]} : vector<4x96xf32> to vector<4x32xf32>
    %70 = vector.extract_strided_slice %68 {offsets = [0, 0], sizes = [4, 32], strides = [1, 1]} : vector<4x96xf32> to vector<4x32xf32>
    %71 = arith.addf %69, %70 : vector<4x32xf32>
    %72 = arith.negf %71 : vector<4x32xf32>
    %73 = math.exp %72 : vector<4x32xf32>
    %cst_33 = arith.constant 1.000000e+00 : f32
    %74 = vector.broadcast %cst_33 : f32 to vector<4x32xf32>
    %75 = arith.addf %74, %73 : vector<4x32xf32>
    %76 = arith.divf %74, %75 : vector<4x32xf32>
    %77 = vector.extract_strided_slice %66 {offsets = [0, 32], sizes = [4, 32], strides = [1, 1]} : vector<4x96xf32> to vector<4x32xf32>
    %78 = vector.extract_strided_slice %68 {offsets = [0, 32], sizes = [4, 32], strides = [1, 1]} : vector<4x96xf32> to vector<4x32xf32>
    %79 = arith.addf %77, %78 : vector<4x32xf32>
    %80 = arith.negf %79 : vector<4x32xf32>
    %81 = math.exp %80 : vector<4x32xf32>
    %cst_34 = arith.constant 1.000000e+00 : f32
    %82 = vector.broadcast %cst_34 : f32 to vector<4x32xf32>
    %83 = arith.addf %82, %81 : vector<4x32xf32>
    %84 = arith.divf %82, %83 : vector<4x32xf32>
    %85 = vector.extract_strided_slice %66 {offsets = [0, 64], sizes = [4, 32], strides = [1, 1]} : vector<4x96xf32> to vector<4x32xf32>
    %86 = vector.extract_strided_slice %68 {offsets = [0, 64], sizes = [4, 32], strides = [1, 1]} : vector<4x96xf32> to vector<4x32xf32>
    %87 = arith.mulf %76, %86 : vector<4x32xf32>
    %88 = arith.addf %85, %87 : vector<4x32xf32>
    %89 = math.tanh %88 : vector<4x32xf32>
    %cst_35 = arith.constant 1.000000e+00 : f32
    %90 = vector.broadcast %cst_35 : f32 to vector<4x32xf32>
    %91 = arith.subf %90, %84 : vector<4x32xf32>
    %92 = arith.mulf %91, %89 : vector<4x32xf32>
    %93 = arith.mulf %84, %62 : vector<4x32xf32>
    %94 = arith.addf %92, %93 : vector<4x32xf32>
    %c1_i32 = arith.constant 1 : i32
    %95 = arith.addi %3, %c1_i32 : i32
    %96 = vector.broadcast %95 : i32 to vector<4x1xi32>
    %97 = arith.cmpi sgt, %4, %96 : vector<4x1xi32>
    %98 = arith.extui %97 : vector<4x1xi1> to vector<4x1xi32>
    %99 = arith.sitofp %98 : vector<4x1xi32> to vector<4x1xf32>
    %100 = vector.broadcast %99 : vector<4x1xf32> to vector<4x32xf32>
    %101 = arith.mulf %100, %94 : vector<4x32xf32>
    %cst_36 = arith.constant 1.000000e+00 : f32
    %102 = vector.broadcast %cst_36 : f32 to vector<4x1xf32>
    %103 = arith.subf %102, %99 : vector<4x1xf32>
    %104 = vector.broadcast %103 : vector<4x1xf32> to vector<4x32xf32>
    %105 = arith.mulf %104, %62 : vector<4x32xf32>
    %106 = arith.addf %101, %105 : vector<4x32xf32>
    %107 = vector.broadcast %99 : vector<4x1xf32> to vector<4x32xf32>
    %108 = arith.mulf %107, %106 : vector<4x32xf32>
    %c4_37 = arith.constant 4 : index
    %c0_38 = arith.constant 0 : index
    %109 = vector.load %arg16[%c4_37, %c0_38] : memref<32x32xf32, #tpu.memory_space<vmem>>, vector<4x32xf32>
    tpu.vector_store %arg16[%c4_37, %c0_38], %108 {strides = array<i32>} : memref<32x32xf32, #tpu.memory_space<vmem>>, vector<4x32xf32>,
    %c8 = arith.constant 8 : index
    %c0_39 = arith.constant 0 : index
    %110 = vector.load %arg17[%c8, %c0_39] : memref<32x96xf32, #tpu.memory_space<vmem>>, vector<4x96xf32>
    %cst_40 = arith.constant dense<0.000000e+00> : vector<4x96xf32>
    %111 = tpu.matmul %106, %15, %cst_40 {dimension_numbers = #tpu.dot_dimension_numbers<[1], [0], [0], [1], [0, 0, 1, 1], [], []>} : vector<4x32xf32>, vector<32x96xf32>, vector<4x96xf32> -> vector<4x96xf32>
    %112 = arith.addf %111, %19 : vector<4x96xf32>
    %113 = vector.extract_strided_slice %110 {offsets = [0, 0], sizes = [4, 32], strides = [1, 1]} : vector<4x96xf32> to vector<4x32xf32>
    %114 = vector.extract_strided_slice %112 {offsets = [0, 0], sizes = [4, 32], strides = [1, 1]} : vector<4x96xf32> to vector<4x32xf32>
    %115 = arith.addf %113, %114 : vector<4x32xf32>
    %116 = arith.negf %115 : vector<4x32xf32>
    %117 = math.exp %116 : vector<4x32xf32>
    %cst_41 = arith.constant 1.000000e+00 : f32
    %118 = vector.broadcast %cst_41 : f32 to vector<4x32xf32>
    %119 = arith.addf %118, %117 : vector<4x32xf32>
    %120 = arith.divf %118, %119 : vector<4x32xf32>
    %121 = vector.extract_strided_slice %110 {offsets = [0, 32], sizes = [4, 32], strides = [1, 1]} : vector<4x96xf32> to vector<4x32xf32>
    %122 = vector.extract_strided_slice %112 {offsets = [0, 32], sizes = [4, 32], strides = [1, 1]} : vector<4x96xf32> to vector<4x32xf32>
    %123 = arith.addf %121, %122 : vector<4x32xf32>
    %124 = arith.negf %123 : vector<4x32xf32>
    %125 = math.exp %124 : vector<4x32xf32>
    %cst_42 = arith.constant 1.000000e+00 : f32
    %126 = vector.broadcast %cst_42 : f32 to vector<4x32xf32>
    %127 = arith.addf %126, %125 : vector<4x32xf32>
    %128 = arith.divf %126, %127 : vector<4x32xf32>
    %129 = vector.extract_strided_slice %110 {offsets = [0, 64], sizes = [4, 32], strides = [1, 1]} : vector<4x96xf32> to vector<4x32xf32>
    %130 = vector.extract_strided_slice %112 {offsets = [0, 64], sizes = [4, 32], strides = [1, 1]} : vector<4x96xf32> to vector<4x32xf32>
    %131 = arith.mulf %120, %130 : vector<4x32xf32>
    %132 = arith.addf %129, %131 : vector<4x32xf32>
    %133 = math.tanh %132 : vector<4x32xf32>
    %cst_43 = arith.constant 1.000000e+00 : f32
    %134 = vector.broadcast %cst_43 : f32 to vector<4x32xf32>
    %135 = arith.subf %134, %128 : vector<4x32xf32>
    %136 = arith.mulf %135, %133 : vector<4x32xf32>
    %137 = arith.mulf %128, %106 : vector<4x32xf32>
    %138 = arith.addf %136, %137 : vector<4x32xf32>
    %c2_i32 = arith.constant 2 : i32
    %139 = arith.addi %3, %c2_i32 : i32
    %140 = vector.broadcast %139 : i32 to vector<4x1xi32>
    %141 = arith.cmpi sgt, %4, %140 : vector<4x1xi32>
    %142 = arith.extui %141 : vector<4x1xi1> to vector<4x1xi32>
    %143 = arith.sitofp %142 : vector<4x1xi32> to vector<4x1xf32>
    %144 = vector.broadcast %143 : vector<4x1xf32> to vector<4x32xf32>
    %145 = arith.mulf %144, %138 : vector<4x32xf32>
    %cst_44 = arith.constant 1.000000e+00 : f32
    %146 = vector.broadcast %cst_44 : f32 to vector<4x1xf32>
    %147 = arith.subf %146, %143 : vector<4x1xf32>
    %148 = vector.broadcast %147 : vector<4x1xf32> to vector<4x32xf32>
    %149 = arith.mulf %148, %106 : vector<4x32xf32>
    %150 = arith.addf %145, %149 : vector<4x32xf32>
    %151 = vector.broadcast %143 : vector<4x1xf32> to vector<4x32xf32>
    %152 = arith.mulf %151, %150 : vector<4x32xf32>
    %c8_45 = arith.constant 8 : index
    %c0_46 = arith.constant 0 : index
    %153 = vector.load %arg16[%c8_45, %c0_46] : memref<32x32xf32, #tpu.memory_space<vmem>>, vector<4x32xf32>
    tpu.vector_store %arg16[%c8_45, %c0_46], %152 {strides = array<i32>} : memref<32x32xf32, #tpu.memory_space<vmem>>, vector<4x32xf32>,
    %c12 = arith.constant 12 : index
    %c0_47 = arith.constant 0 : index
    %154 = vector.load %arg17[%c12, %c0_47] : memref<32x96xf32, #tpu.memory_space<vmem>>, vector<4x96xf32>
    %cst_48 = arith.constant dense<0.000000e+00> : vector<4x96xf32>
    %155 = tpu.matmul %150, %15, %cst_48 {dimension_numbers = #tpu.dot_dimension_numbers<[1], [0], [0], [1], [0, 0, 1, 1], [], []>} : vector<4x32xf32>, vector<32x96xf32>, vector<4x96xf32> -> vector<4x96xf32>
    %156 = arith.addf %155, %19 : vector<4x96xf32>
    %157 = vector.extract_strided_slice %154 {offsets = [0, 0], sizes = [4, 32], strides = [1, 1]} : vector<4x96xf32> to vector<4x32xf32>
    %158 = vector.extract_strided_slice %156 {offsets = [0, 0], sizes = [4, 32], strides = [1, 1]} : vector<4x96xf32> to vector<4x32xf32>
    %159 = arith.addf %157, %158 : vector<4x32xf32>
    %160 = arith.negf %159 : vector<4x32xf32>
    %161 = math.exp %160 : vector<4x32xf32>
    %cst_49 = arith.constant 1.000000e+00 : f32
    %162 = vector.broadcast %cst_49 : f32 to vector<4x32xf32>
    %163 = arith.addf %162, %161 : vector<4x32xf32>
    %164 = arith.divf %162, %163 : vector<4x32xf32>
    %165 = vector.extract_strided_slice %154 {offsets = [0, 32], sizes = [4, 32], strides = [1, 1]} : vector<4x96xf32> to vector<4x32xf32>
    %166 = vector.extract_strided_slice %156 {offsets = [0, 32], sizes = [4, 32], strides = [1, 1]} : vector<4x96xf32> to vector<4x32xf32>
    %167 = arith.addf %165, %166 : vector<4x32xf32>
    %168 = arith.negf %167 : vector<4x32xf32>
    %169 = math.exp %168 : vector<4x32xf32>
    %cst_50 = arith.constant 1.000000e+00 : f32
    %170 = vector.broadcast %cst_50 : f32 to vector<4x32xf32>
    %171 = arith.addf %170, %169 : vector<4x32xf32>
    %172 = arith.divf %170, %171 : vector<4x32xf32>
    %173 = vector.extract_strided_slice %154 {offsets = [0, 64], sizes = [4, 32], strides = [1, 1]} : vector<4x96xf32> to vector<4x32xf32>
    %174 = vector.extract_strided_slice %156 {offsets = [0, 64], sizes = [4, 32], strides = [1, 1]} : vector<4x96xf32> to vector<4x32xf32>
    %175 = arith.mulf %164, %174 : vector<4x32xf32>
    %176 = arith.addf %173, %175 : vector<4x32xf32>
    %177 = math.tanh %176 : vector<4x32xf32>
    %cst_51 = arith.constant 1.000000e+00 : f32
    %178 = vector.broadcast %cst_51 : f32 to vector<4x32xf32>
    %179 = arith.subf %178, %172 : vector<4x32xf32>
    %180 = arith.mulf %179, %177 : vector<4x32xf32>
    %181 = arith.mulf %172, %150 : vector<4x32xf32>
    %182 = arith.addf %180, %181 : vector<4x32xf32>
    %c3_i32 = arith.constant 3 : i32
    %183 = arith.addi %3, %c3_i32 : i32
    %184 = vector.broadcast %183 : i32 to vector<4x1xi32>
    %185 = arith.cmpi sgt, %4, %184 : vector<4x1xi32>
    %186 = arith.extui %185 : vector<4x1xi1> to vector<4x1xi32>
    %187 = arith.sitofp %186 : vector<4x1xi32> to vector<4x1xf32>
    %188 = vector.broadcast %187 : vector<4x1xf32> to vector<4x32xf32>
    %189 = arith.mulf %188, %182 : vector<4x32xf32>
    %cst_52 = arith.constant 1.000000e+00 : f32
    %190 = vector.broadcast %cst_52 : f32 to vector<4x1xf32>
    %191 = arith.subf %190, %187 : vector<4x1xf32>
    %192 = vector.broadcast %191 : vector<4x1xf32> to vector<4x32xf32>
    %193 = arith.mulf %192, %150 : vector<4x32xf32>
    %194 = arith.addf %189, %193 : vector<4x32xf32>
    %195 = vector.broadcast %187 : vector<4x1xf32> to vector<4x32xf32>
    %196 = arith.mulf %195, %194 : vector<4x32xf32>
    %c12_53 = arith.constant 12 : index
    %c0_54 = arith.constant 0 : index
    %197 = vector.load %arg16[%c12_53, %c0_54] : memref<32x32xf32, #tpu.memory_space<vmem>>, vector<4x32xf32>
    tpu.vector_store %arg16[%c12_53, %c0_54], %196 {strides = array<i32>} : memref<32x32xf32, #tpu.memory_space<vmem>>, vector<4x32xf32>,
    %c16 = arith.constant 16 : index
    %c0_55 = arith.constant 0 : index
    %198 = vector.load %arg17[%c16, %c0_55] : memref<32x96xf32, #tpu.memory_space<vmem>>, vector<4x96xf32>
    %cst_56 = arith.constant dense<0.000000e+00> : vector<4x96xf32>
    %199 = tpu.matmul %194, %15, %cst_56 {dimension_numbers = #tpu.dot_dimension_numbers<[1], [0], [0], [1], [0, 0, 1, 1], [], []>} : vector<4x32xf32>, vector<32x96xf32>, vector<4x96xf32> -> vector<4x96xf32>
    %200 = arith.addf %199, %19 : vector<4x96xf32>
    %201 = vector.extract_strided_slice %198 {offsets = [0, 0], sizes = [4, 32], strides = [1, 1]} : vector<4x96xf32> to vector<4x32xf32>
    %202 = vector.extract_strided_slice %200 {offsets = [0, 0], sizes = [4, 32], strides = [1, 1]} : vector<4x96xf32> to vector<4x32xf32>
    %203 = arith.addf %201, %202 : vector<4x32xf32>
    %204 = arith.negf %203 : vector<4x32xf32>
    %205 = math.exp %204 : vector<4x32xf32>
    %cst_57 = arith.constant 1.000000e+00 : f32
    %206 = vector.broadcast %cst_57 : f32 to vector<4x32xf32>
    %207 = arith.addf %206, %205 : vector<4x32xf32>
    %208 = arith.divf %206, %207 : vector<4x32xf32>
    %209 = vector.extract_strided_slice %198 {offsets = [0, 32], sizes = [4, 32], strides = [1, 1]} : vector<4x96xf32> to vector<4x32xf32>
    %210 = vector.extract_strided_slice %200 {offsets = [0, 32], sizes = [4, 32], strides = [1, 1]} : vector<4x96xf32> to vector<4x32xf32>
    %211 = arith.addf %209, %210 : vector<4x32xf32>
    %212 = arith.negf %211 : vector<4x32xf32>
    %213 = math.exp %212 : vector<4x32xf32>
    %cst_58 = arith.constant 1.000000e+00 : f32
    %214 = vector.broadcast %cst_58 : f32 to vector<4x32xf32>
    %215 = arith.addf %214, %213 : vector<4x32xf32>
    %216 = arith.divf %214, %215 : vector<4x32xf32>
    %217 = vector.extract_strided_slice %198 {offsets = [0, 64], sizes = [4, 32], strides = [1, 1]} : vector<4x96xf32> to vector<4x32xf32>
    %218 = vector.extract_strided_slice %200 {offsets = [0, 64], sizes = [4, 32], strides = [1, 1]} : vector<4x96xf32> to vector<4x32xf32>
    %219 = arith.mulf %208, %218 : vector<4x32xf32>
    %220 = arith.addf %217, %219 : vector<4x32xf32>
    %221 = math.tanh %220 : vector<4x32xf32>
    %cst_59 = arith.constant 1.000000e+00 : f32
    %222 = vector.broadcast %cst_59 : f32 to vector<4x32xf32>
    %223 = arith.subf %222, %216 : vector<4x32xf32>
    %224 = arith.mulf %223, %221 : vector<4x32xf32>
    %225 = arith.mulf %216, %194 : vector<4x32xf32>
    %226 = arith.addf %224, %225 : vector<4x32xf32>
    %c4_i32 = arith.constant 4 : i32
    %227 = arith.addi %3, %c4_i32 : i32
    %228 = vector.broadcast %227 : i32 to vector<4x1xi32>
    %229 = arith.cmpi sgt, %4, %228 : vector<4x1xi32>
    %230 = arith.extui %229 : vector<4x1xi1> to vector<4x1xi32>
    %231 = arith.sitofp %230 : vector<4x1xi32> to vector<4x1xf32>
    %232 = vector.broadcast %231 : vector<4x1xf32> to vector<4x32xf32>
    %233 = arith.mulf %232, %226 : vector<4x32xf32>
    %cst_60 = arith.constant 1.000000e+00 : f32
    %234 = vector.broadcast %cst_60 : f32 to vector<4x1xf32>
    %235 = arith.subf %234, %231 : vector<4x1xf32>
    %236 = vector.broadcast %235 : vector<4x1xf32> to vector<4x32xf32>
    %237 = arith.mulf %236, %194 : vector<4x32xf32>
    %238 = arith.addf %233, %237 : vector<4x32xf32>
    %239 = vector.broadcast %231 : vector<4x1xf32> to vector<4x32xf32>
    %240 = arith.mulf %239, %238 : vector<4x32xf32>
    %c16_61 = arith.constant 16 : index
    %c0_62 = arith.constant 0 : index
    %241 = vector.load %arg16[%c16_61, %c0_62] : memref<32x32xf32, #tpu.memory_space<vmem>>, vector<4x32xf32>
    tpu.vector_store %arg16[%c16_61, %c0_62], %240 {strides = array<i32>} : memref<32x32xf32, #tpu.memory_space<vmem>>, vector<4x32xf32>,
    %c20 = arith.constant 20 : index
    %c0_63 = arith.constant 0 : index
    %242 = vector.load %arg17[%c20, %c0_63] : memref<32x96xf32, #tpu.memory_space<vmem>>, vector<4x96xf32>
    %cst_64 = arith.constant dense<0.000000e+00> : vector<4x96xf32>
    %243 = tpu.matmul %238, %15, %cst_64 {dimension_numbers = #tpu.dot_dimension_numbers<[1], [0], [0], [1], [0, 0, 1, 1], [], []>} : vector<4x32xf32>, vector<32x96xf32>, vector<4x96xf32> -> vector<4x96xf32>
    %244 = arith.addf %243, %19 : vector<4x96xf32>
    %245 = vector.extract_strided_slice %242 {offsets = [0, 0], sizes = [4, 32], strides = [1, 1]} : vector<4x96xf32> to vector<4x32xf32>
    %246 = vector.extract_strided_slice %244 {offsets = [0, 0], sizes = [4, 32], strides = [1, 1]} : vector<4x96xf32> to vector<4x32xf32>
    %247 = arith.addf %245, %246 : vector<4x32xf32>
    %248 = arith.negf %247 : vector<4x32xf32>
    %249 = math.exp %248 : vector<4x32xf32>
    %cst_65 = arith.constant 1.000000e+00 : f32
    %250 = vector.broadcast %cst_65 : f32 to vector<4x32xf32>
    %251 = arith.addf %250, %249 : vector<4x32xf32>
    %252 = arith.divf %250, %251 : vector<4x32xf32>
    %253 = vector.extract_strided_slice %242 {offsets = [0, 32], sizes = [4, 32], strides = [1, 1]} : vector<4x96xf32> to vector<4x32xf32>
    %254 = vector.extract_strided_slice %244 {offsets = [0, 32], sizes = [4, 32], strides = [1, 1]} : vector<4x96xf32> to vector<4x32xf32>
    %255 = arith.addf %253, %254 : vector<4x32xf32>
    %256 = arith.negf %255 : vector<4x32xf32>
    %257 = math.exp %256 : vector<4x32xf32>
    %cst_66 = arith.constant 1.000000e+00 : f32
    %258 = vector.broadcast %cst_66 : f32 to vector<4x32xf32>
    %259 = arith.addf %258, %257 : vector<4x32xf32>
    %260 = arith.divf %258, %259 : vector<4x32xf32>
    %261 = vector.extract_strided_slice %242 {offsets = [0, 64], sizes = [4, 32], strides = [1, 1]} : vector<4x96xf32> to vector<4x32xf32>
    %262 = vector.extract_strided_slice %244 {offsets = [0, 64], sizes = [4, 32], strides = [1, 1]} : vector<4x96xf32> to vector<4x32xf32>
    %263 = arith.mulf %252, %262 : vector<4x32xf32>
    %264 = arith.addf %261, %263 : vector<4x32xf32>
    %265 = math.tanh %264 : vector<4x32xf32>
    %cst_67 = arith.constant 1.000000e+00 : f32
    %266 = vector.broadcast %cst_67 : f32 to vector<4x32xf32>
    %267 = arith.subf %266, %260 : vector<4x32xf32>
    %268 = arith.mulf %267, %265 : vector<4x32xf32>
    %269 = arith.mulf %260, %238 : vector<4x32xf32>
    %270 = arith.addf %268, %269 : vector<4x32xf32>
    %c5_i32 = arith.constant 5 : i32
    %271 = arith.addi %3, %c5_i32 : i32
    %272 = vector.broadcast %271 : i32 to vector<4x1xi32>
    %273 = arith.cmpi sgt, %4, %272 : vector<4x1xi32>
    %274 = arith.extui %273 : vector<4x1xi1> to vector<4x1xi32>
    %275 = arith.sitofp %274 : vector<4x1xi32> to vector<4x1xf32>
    %276 = vector.broadcast %275 : vector<4x1xf32> to vector<4x32xf32>
    %277 = arith.mulf %276, %270 : vector<4x32xf32>
    %cst_68 = arith.constant 1.000000e+00 : f32
    %278 = vector.broadcast %cst_68 : f32 to vector<4x1xf32>
    %279 = arith.subf %278, %275 : vector<4x1xf32>
    %280 = vector.broadcast %279 : vector<4x1xf32> to vector<4x32xf32>
    %281 = arith.mulf %280, %238 : vector<4x32xf32>
    %282 = arith.addf %277, %281 : vector<4x32xf32>
    %283 = vector.broadcast %275 : vector<4x1xf32> to vector<4x32xf32>
    %284 = arith.mulf %283, %282 : vector<4x32xf32>
    %c20_69 = arith.constant 20 : index
    %c0_70 = arith.constant 0 : index
    %285 = vector.load %arg16[%c20_69, %c0_70] : memref<32x32xf32, #tpu.memory_space<vmem>>, vector<4x32xf32>
    tpu.vector_store %arg16[%c20_69, %c0_70], %284 {strides = array<i32>} : memref<32x32xf32, #tpu.memory_space<vmem>>, vector<4x32xf32>,
    %c24 = arith.constant 24 : index
    %c0_71 = arith.constant 0 : index
    %286 = vector.load %arg17[%c24, %c0_71] : memref<32x96xf32, #tpu.memory_space<vmem>>, vector<4x96xf32>
    %cst_72 = arith.constant dense<0.000000e+00> : vector<4x96xf32>
    %287 = tpu.matmul %282, %15, %cst_72 {dimension_numbers = #tpu.dot_dimension_numbers<[1], [0], [0], [1], [0, 0, 1, 1], [], []>} : vector<4x32xf32>, vector<32x96xf32>, vector<4x96xf32> -> vector<4x96xf32>
    %288 = arith.addf %287, %19 : vector<4x96xf32>
    %289 = vector.extract_strided_slice %286 {offsets = [0, 0], sizes = [4, 32], strides = [1, 1]} : vector<4x96xf32> to vector<4x32xf32>
    %290 = vector.extract_strided_slice %288 {offsets = [0, 0], sizes = [4, 32], strides = [1, 1]} : vector<4x96xf32> to vector<4x32xf32>
    %291 = arith.addf %289, %290 : vector<4x32xf32>
    %292 = arith.negf %291 : vector<4x32xf32>
    %293 = math.exp %292 : vector<4x32xf32>
    %cst_73 = arith.constant 1.000000e+00 : f32
    %294 = vector.broadcast %cst_73 : f32 to vector<4x32xf32>
    %295 = arith.addf %294, %293 : vector<4x32xf32>
    %296 = arith.divf %294, %295 : vector<4x32xf32>
    %297 = vector.extract_strided_slice %286 {offsets = [0, 32], sizes = [4, 32], strides = [1, 1]} : vector<4x96xf32> to vector<4x32xf32>
    %298 = vector.extract_strided_slice %288 {offsets = [0, 32], sizes = [4, 32], strides = [1, 1]} : vector<4x96xf32> to vector<4x32xf32>
    %299 = arith.addf %297, %298 : vector<4x32xf32>
    %300 = arith.negf %299 : vector<4x32xf32>
    %301 = math.exp %300 : vector<4x32xf32>
    %cst_74 = arith.constant 1.000000e+00 : f32
    %302 = vector.broadcast %cst_74 : f32 to vector<4x32xf32>
    %303 = arith.addf %302, %301 : vector<4x32xf32>
    %304 = arith.divf %302, %303 : vector<4x32xf32>
    %305 = vector.extract_strided_slice %286 {offsets = [0, 64], sizes = [4, 32], strides = [1, 1]} : vector<4x96xf32> to vector<4x32xf32>
    %306 = vector.extract_strided_slice %288 {offsets = [0, 64], sizes = [4, 32], strides = [1, 1]} : vector<4x96xf32> to vector<4x32xf32>
    %307 = arith.mulf %296, %306 : vector<4x32xf32>
    %308 = arith.addf %305, %307 : vector<4x32xf32>
    %309 = math.tanh %308 : vector<4x32xf32>
    %cst_75 = arith.constant 1.000000e+00 : f32
    %310 = vector.broadcast %cst_75 : f32 to vector<4x32xf32>
    %311 = arith.subf %310, %304 : vector<4x32xf32>
    %312 = arith.mulf %311, %309 : vector<4x32xf32>
    %313 = arith.mulf %304, %282 : vector<4x32xf32>
    %314 = arith.addf %312, %313 : vector<4x32xf32>
    %c6_i32 = arith.constant 6 : i32
    %315 = arith.addi %3, %c6_i32 : i32
    %316 = vector.broadcast %315 : i32 to vector<4x1xi32>
    %317 = arith.cmpi sgt, %4, %316 : vector<4x1xi32>
    %318 = arith.extui %317 : vector<4x1xi1> to vector<4x1xi32>
    %319 = arith.sitofp %318 : vector<4x1xi32> to vector<4x1xf32>
    %320 = vector.broadcast %319 : vector<4x1xf32> to vector<4x32xf32>
    %321 = arith.mulf %320, %314 : vector<4x32xf32>
    %cst_76 = arith.constant 1.000000e+00 : f32
    %322 = vector.broadcast %cst_76 : f32 to vector<4x1xf32>
    %323 = arith.subf %322, %319 : vector<4x1xf32>
    %324 = vector.broadcast %323 : vector<4x1xf32> to vector<4x32xf32>
    %325 = arith.mulf %324, %282 : vector<4x32xf32>
    %326 = arith.addf %321, %325 : vector<4x32xf32>
    %327 = vector.broadcast %319 : vector<4x1xf32> to vector<4x32xf32>
    %328 = arith.mulf %327, %326 : vector<4x32xf32>
    %c24_77 = arith.constant 24 : index
    %c0_78 = arith.constant 0 : index
    %329 = vector.load %arg16[%c24_77, %c0_78] : memref<32x32xf32, #tpu.memory_space<vmem>>, vector<4x32xf32>
    tpu.vector_store %arg16[%c24_77, %c0_78], %328 {strides = array<i32>} : memref<32x32xf32, #tpu.memory_space<vmem>>, vector<4x32xf32>,
    %c28 = arith.constant 28 : index
    %c0_79 = arith.constant 0 : index
    %330 = vector.load %arg17[%c28, %c0_79] : memref<32x96xf32, #tpu.memory_space<vmem>>, vector<4x96xf32>
    %cst_80 = arith.constant dense<0.000000e+00> : vector<4x96xf32>
    %331 = tpu.matmul %326, %15, %cst_80 {dimension_numbers = #tpu.dot_dimension_numbers<[1], [0], [0], [1], [0, 0, 1, 1], [], []>} : vector<4x32xf32>, vector<32x96xf32>, vector<4x96xf32> -> vector<4x96xf32>
    %332 = arith.addf %331, %19 : vector<4x96xf32>
    %333 = vector.extract_strided_slice %330 {offsets = [0, 0], sizes = [4, 32], strides = [1, 1]} : vector<4x96xf32> to vector<4x32xf32>
    %334 = vector.extract_strided_slice %332 {offsets = [0, 0], sizes = [4, 32], strides = [1, 1]} : vector<4x96xf32> to vector<4x32xf32>
    %335 = arith.addf %333, %334 : vector<4x32xf32>
    %336 = arith.negf %335 : vector<4x32xf32>
    %337 = math.exp %336 : vector<4x32xf32>
    %cst_81 = arith.constant 1.000000e+00 : f32
    %338 = vector.broadcast %cst_81 : f32 to vector<4x32xf32>
    %339 = arith.addf %338, %337 : vector<4x32xf32>
    %340 = arith.divf %338, %339 : vector<4x32xf32>
    %341 = vector.extract_strided_slice %330 {offsets = [0, 32], sizes = [4, 32], strides = [1, 1]} : vector<4x96xf32> to vector<4x32xf32>
    %342 = vector.extract_strided_slice %332 {offsets = [0, 32], sizes = [4, 32], strides = [1, 1]} : vector<4x96xf32> to vector<4x32xf32>
    %343 = arith.addf %341, %342 : vector<4x32xf32>
    %344 = arith.negf %343 : vector<4x32xf32>
    %345 = math.exp %344 : vector<4x32xf32>
    %cst_82 = arith.constant 1.000000e+00 : f32
    %346 = vector.broadcast %cst_82 : f32 to vector<4x32xf32>
    %347 = arith.addf %346, %345 : vector<4x32xf32>
    %348 = arith.divf %346, %347 : vector<4x32xf32>
    %349 = vector.extract_strided_slice %330 {offsets = [0, 64], sizes = [4, 32], strides = [1, 1]} : vector<4x96xf32> to vector<4x32xf32>
    %350 = vector.extract_strided_slice %332 {offsets = [0, 64], sizes = [4, 32], strides = [1, 1]} : vector<4x96xf32> to vector<4x32xf32>
    %351 = arith.mulf %340, %350 : vector<4x32xf32>
    %352 = arith.addf %349, %351 : vector<4x32xf32>
    %353 = math.tanh %352 : vector<4x32xf32>
    %cst_83 = arith.constant 1.000000e+00 : f32
    %354 = vector.broadcast %cst_83 : f32 to vector<4x32xf32>
    %355 = arith.subf %354, %348 : vector<4x32xf32>
    %356 = arith.mulf %355, %353 : vector<4x32xf32>
    %357 = arith.mulf %348, %326 : vector<4x32xf32>
    %358 = arith.addf %356, %357 : vector<4x32xf32>
    %c7_i32 = arith.constant 7 : i32
    %359 = arith.addi %3, %c7_i32 : i32
    %360 = vector.broadcast %359 : i32 to vector<4x1xi32>
    %361 = arith.cmpi sgt, %4, %360 : vector<4x1xi32>
    %362 = arith.extui %361 : vector<4x1xi1> to vector<4x1xi32>
    %363 = arith.sitofp %362 : vector<4x1xi32> to vector<4x1xf32>
    %364 = vector.broadcast %363 : vector<4x1xf32> to vector<4x32xf32>
    %365 = arith.mulf %364, %358 : vector<4x32xf32>
    %cst_84 = arith.constant 1.000000e+00 : f32
    %366 = vector.broadcast %cst_84 : f32 to vector<4x1xf32>
    %367 = arith.subf %366, %363 : vector<4x1xf32>
    %368 = vector.broadcast %367 : vector<4x1xf32> to vector<4x32xf32>
    %369 = arith.mulf %368, %326 : vector<4x32xf32>
    %370 = arith.addf %365, %369 : vector<4x32xf32>
    %371 = vector.broadcast %363 : vector<4x1xf32> to vector<4x32xf32>
    %372 = arith.mulf %371, %370 : vector<4x32xf32>
    %c28_85 = arith.constant 28 : index
    %c0_86 = arith.constant 0 : index
    %373 = vector.load %arg16[%c28_85, %c0_86] : memref<32x32xf32, #tpu.memory_space<vmem>>, vector<4x32xf32>
    tpu.vector_store %arg16[%c28_85, %c0_86], %372 {strides = array<i32>} : memref<32x32xf32, #tpu.memory_space<vmem>>, vector<4x32xf32>,
    %c0_87 = arith.constant 0 : index
    %c0_88 = arith.constant 0 : index
    %c0_89 = arith.constant 0 : index
    %374 = vector.load %arg15[%c0_87, %c0_88, %c0_89] : memref<2x4x32xf32, #tpu.memory_space<vmem>>, vector<1x4x32xf32>
    %375 = vector.shape_cast %374 : vector<1x4x32xf32> to vector<4x32xf32>
    %376 = vector.shape_cast %370 : vector<4x32xf32> to vector<1x4x32xf32>
    tpu.vector_store %arg15[%c0_87, %c0_88, %c0_89], %376 {strides = array<i32>} : memref<2x4x32xf32, #tpu.memory_space<vmem>>, vector<1x4x32xf32>,
    %c0_90 = arith.constant 0 : index
    %c0_91 = arith.constant 0 : index
    %377 = vector.load %arg16[%c0_90, %c0_91] : memref<32x32xf32, #tpu.memory_space<vmem>>, vector<32x32xf32>
    %378 = arith.truncf %377 : vector<32x32xf32> to vector<32x32xbf16>
    %c0_92 = arith.constant 0 : index
    %c0_93 = arith.constant 0 : index
    %c0_94 = arith.constant 0 : index
    %379 = vector.load %arg8[%c0_92, %c0_93, %c0_94] : memref<1x32x96xbf16, #tpu.memory_space<vmem>>, vector<1x32x96xbf16>
    %380 = vector.shape_cast %379 : vector<1x32x96xbf16> to vector<32x96xbf16>
    %cst_95 = arith.constant dense<0.000000e+00> : vector<32x96xf32>
    %381 = tpu.matmul %378, %380, %cst_95 {dimension_numbers = #tpu.dot_dimension_numbers<[1], [0], [0], [1], [0, 0, 1, 1], [], []>} : vector<32x32xbf16>, vector<32x96xbf16>, vector<32x96xf32> -> vector<32x96xf32>
    %c0_96 = arith.constant 0 : index
    %c0_97 = arith.constant 0 : index
    %c0_98 = arith.constant 0 : index
    %382 = vector.load %arg10[%c0_96, %c0_97, %c0_98] : memref<1x1x96xf32, #tpu.memory_space<vmem>>, vector<1x1x96xf32>
    %383 = vector.shape_cast %382 : vector<1x1x96xf32> to vector<1x96xf32>
    %384 = vector.broadcast %383 : vector<1x96xf32> to vector<32x96xf32>
    %385 = arith.addf %381, %384 : vector<32x96xf32>
    %c0_99 = arith.constant 0 : index
    %c0_100 = arith.constant 0 : index
    %386 = vector.load %arg17[%c0_99, %c0_100] : memref<32x96xf32, #tpu.memory_space<vmem>>, vector<32x96xf32>
    tpu.vector_store %arg17[%c0_99, %c0_100], %385 {strides = array<i32>} : memref<32x96xf32, #tpu.memory_space<vmem>>, vector<32x96xf32>,
    %c0_101 = arith.constant 0 : index
    %c0_102 = arith.constant 0 : index
    %c0_103 = arith.constant 0 : index
    %387 = vector.load %arg9[%c0_101, %c0_102, %c0_103] : memref<1x32x96xf32, #tpu.memory_space<vmem>>, vector<1x32x96xf32>
    %388 = vector.shape_cast %387 : vector<1x32x96xf32> to vector<32x96xf32>
    %c0_104 = arith.constant 0 : index
    %c0_105 = arith.constant 0 : index
    %c0_106 = arith.constant 0 : index
    %389 = vector.load %arg11[%c0_104, %c0_105, %c0_106] : memref<1x1x96xf32, #tpu.memory_space<vmem>>, vector<1x1x96xf32>
    %390 = vector.shape_cast %389 : vector<1x1x96xf32> to vector<1x96xf32>
    %391 = vector.shape_cast %390 : vector<1x96xf32> to vector<1x96xf32>
    %392 = vector.broadcast %391 : vector<1x96xf32> to vector<4x96xf32>
    %c1 = arith.constant 1 : index
    %c0_107 = arith.constant 0 : index
    %c0_108 = arith.constant 0 : index
    %393 = vector.load %arg15[%c1, %c0_107, %c0_108] : memref<2x4x32xf32, #tpu.memory_space<vmem>>, vector<1x4x32xf32>
    %394 = vector.shape_cast %393 : vector<1x4x32xf32> to vector<4x32xf32>
    %c0_109 = arith.constant 0 : index
    %c0_110 = arith.constant 0 : index
    %395 = vector.load %arg17[%c0_109, %c0_110] : memref<32x96xf32, #tpu.memory_space<vmem>>, vector<4x96xf32>
    %cst_111 = arith.constant dense<0.000000e+00> : vector<4x96xf32>
    %396 = tpu.matmul %394, %388, %cst_111 {dimension_numbers = #tpu.dot_dimension_numbers<[1], [0], [0], [1], [0, 0, 1, 1], [], []>} : vector<4x32xf32>, vector<32x96xf32>, vector<4x96xf32> -> vector<4x96xf32>
    %397 = arith.addf %396, %392 : vector<4x96xf32>
    %398 = vector.extract_strided_slice %395 {offsets = [0, 0], sizes = [4, 32], strides = [1, 1]} : vector<4x96xf32> to vector<4x32xf32>
    %399 = vector.extract_strided_slice %397 {offsets = [0, 0], sizes = [4, 32], strides = [1, 1]} : vector<4x96xf32> to vector<4x32xf32>
    %400 = arith.addf %398, %399 : vector<4x32xf32>
    %401 = arith.negf %400 : vector<4x32xf32>
    %402 = math.exp %401 : vector<4x32xf32>
    %cst_112 = arith.constant 1.000000e+00 : f32
    %403 = vector.broadcast %cst_112 : f32 to vector<4x32xf32>
    %404 = arith.addf %403, %402 : vector<4x32xf32>
    %405 = arith.divf %403, %404 : vector<4x32xf32>
    %406 = vector.extract_strided_slice %395 {offsets = [0, 32], sizes = [4, 32], strides = [1, 1]} : vector<4x96xf32> to vector<4x32xf32>
    %407 = vector.extract_strided_slice %397 {offsets = [0, 32], sizes = [4, 32], strides = [1, 1]} : vector<4x96xf32> to vector<4x32xf32>
    %408 = arith.addf %406, %407 : vector<4x32xf32>
    %409 = arith.negf %408 : vector<4x32xf32>
    %410 = math.exp %409 : vector<4x32xf32>
    %cst_113 = arith.constant 1.000000e+00 : f32
    %411 = vector.broadcast %cst_113 : f32 to vector<4x32xf32>
    %412 = arith.addf %411, %410 : vector<4x32xf32>
    %413 = arith.divf %411, %412 : vector<4x32xf32>
    %414 = vector.extract_strided_slice %395 {offsets = [0, 64], sizes = [4, 32], strides = [1, 1]} : vector<4x96xf32> to vector<4x32xf32>
    %415 = vector.extract_strided_slice %397 {offsets = [0, 64], sizes = [4, 32], strides = [1, 1]} : vector<4x96xf32> to vector<4x32xf32>
    %416 = arith.mulf %405, %415 : vector<4x32xf32>
    %417 = arith.addf %414, %416 : vector<4x32xf32>
    %418 = math.tanh %417 : vector<4x32xf32>
    %cst_114 = arith.constant 1.000000e+00 : f32
    %419 = vector.broadcast %cst_114 : f32 to vector<4x32xf32>
    %420 = arith.subf %419, %413 : vector<4x32xf32>
    %421 = arith.mulf %420, %418 : vector<4x32xf32>
    %422 = arith.mulf %413, %394 : vector<4x32xf32>
    %423 = arith.addf %421, %422 : vector<4x32xf32>
    %c0_i32_115 = arith.constant 0 : i32
    %424 = arith.addi %3, %c0_i32_115 : i32
    %425 = vector.broadcast %424 : i32 to vector<4x1xi32>
    %426 = arith.cmpi sgt, %4, %425 : vector<4x1xi32>
    %427 = arith.extui %426 : vector<4x1xi1> to vector<4x1xi32>
    %428 = arith.sitofp %427 : vector<4x1xi32> to vector<4x1xf32>
    %429 = vector.broadcast %428 : vector<4x1xf32> to vector<4x32xf32>
    %430 = arith.mulf %429, %423 : vector<4x32xf32>
    %cst_116 = arith.constant 1.000000e+00 : f32
    %431 = vector.broadcast %cst_116 : f32 to vector<4x1xf32>
    %432 = arith.subf %431, %428 : vector<4x1xf32>
    %433 = vector.broadcast %432 : vector<4x1xf32> to vector<4x32xf32>
    %434 = arith.mulf %433, %394 : vector<4x32xf32>
    %435 = arith.addf %430, %434 : vector<4x32xf32>
    %436 = vector.broadcast %428 : vector<4x1xf32> to vector<4x32xf32>
    %437 = arith.mulf %436, %435 : vector<4x32xf32>
    %c0_117 = arith.constant 0 : index
    %c0_118 = arith.constant 0 : index
    %438 = vector.load %arg16[%c0_117, %c0_118] : memref<32x32xf32, #tpu.memory_space<vmem>>, vector<4x32xf32>
    tpu.vector_store %arg16[%c0_117, %c0_118], %437 {strides = array<i32>} : memref<32x32xf32, #tpu.memory_space<vmem>>, vector<4x32xf32>,
    %c4_119 = arith.constant 4 : index
    %c0_120 = arith.constant 0 : index
    %439 = vector.load %arg17[%c4_119, %c0_120] : memref<32x96xf32, #tpu.memory_space<vmem>>, vector<4x96xf32>
    %cst_121 = arith.constant dense<0.000000e+00> : vector<4x96xf32>
    %440 = tpu.matmul %435, %388, %cst_121 {dimension_numbers = #tpu.dot_dimension_numbers<[1], [0], [0], [1], [0, 0, 1, 1], [], []>} : vector<4x32xf32>, vector<32x96xf32>, vector<4x96xf32> -> vector<4x96xf32>
    %441 = arith.addf %440, %392 : vector<4x96xf32>
    %442 = vector.extract_strided_slice %439 {offsets = [0, 0], sizes = [4, 32], strides = [1, 1]} : vector<4x96xf32> to vector<4x32xf32>
    %443 = vector.extract_strided_slice %441 {offsets = [0, 0], sizes = [4, 32], strides = [1, 1]} : vector<4x96xf32> to vector<4x32xf32>
    %444 = arith.addf %442, %443 : vector<4x32xf32>
    %445 = arith.negf %444 : vector<4x32xf32>
    %446 = math.exp %445 : vector<4x32xf32>
    %cst_122 = arith.constant 1.000000e+00 : f32
    %447 = vector.broadcast %cst_122 : f32 to vector<4x32xf32>
    %448 = arith.addf %447, %446 : vector<4x32xf32>
    %449 = arith.divf %447, %448 : vector<4x32xf32>
    %450 = vector.extract_strided_slice %439 {offsets = [0, 32], sizes = [4, 32], strides = [1, 1]} : vector<4x96xf32> to vector<4x32xf32>
    %451 = vector.extract_strided_slice %441 {offsets = [0, 32], sizes = [4, 32], strides = [1, 1]} : vector<4x96xf32> to vector<4x32xf32>
    %452 = arith.addf %450, %451 : vector<4x32xf32>
    %453 = arith.negf %452 : vector<4x32xf32>
    %454 = math.exp %453 : vector<4x32xf32>
    %cst_123 = arith.constant 1.000000e+00 : f32
    %455 = vector.broadcast %cst_123 : f32 to vector<4x32xf32>
    %456 = arith.addf %455, %454 : vector<4x32xf32>
    %457 = arith.divf %455, %456 : vector<4x32xf32>
    %458 = vector.extract_strided_slice %439 {offsets = [0, 64], sizes = [4, 32], strides = [1, 1]} : vector<4x96xf32> to vector<4x32xf32>
    %459 = vector.extract_strided_slice %441 {offsets = [0, 64], sizes = [4, 32], strides = [1, 1]} : vector<4x96xf32> to vector<4x32xf32>
    %460 = arith.mulf %449, %459 : vector<4x32xf32>
    %461 = arith.addf %458, %460 : vector<4x32xf32>
    %462 = math.tanh %461 : vector<4x32xf32>
    %cst_124 = arith.constant 1.000000e+00 : f32
    %463 = vector.broadcast %cst_124 : f32 to vector<4x32xf32>
    %464 = arith.subf %463, %457 : vector<4x32xf32>
    %465 = arith.mulf %464, %462 : vector<4x32xf32>
    %466 = arith.mulf %457, %435 : vector<4x32xf32>
    %467 = arith.addf %465, %466 : vector<4x32xf32>
    %c1_i32_125 = arith.constant 1 : i32
    %468 = arith.addi %3, %c1_i32_125 : i32
    %469 = vector.broadcast %468 : i32 to vector<4x1xi32>
    %470 = arith.cmpi sgt, %4, %469 : vector<4x1xi32>
    %471 = arith.extui %470 : vector<4x1xi1> to vector<4x1xi32>
    %472 = arith.sitofp %471 : vector<4x1xi32> to vector<4x1xf32>
    %473 = vector.broadcast %472 : vector<4x1xf32> to vector<4x32xf32>
    %474 = arith.mulf %473, %467 : vector<4x32xf32>
    %cst_126 = arith.constant 1.000000e+00 : f32
    %475 = vector.broadcast %cst_126 : f32 to vector<4x1xf32>
    %476 = arith.subf %475, %472 : vector<4x1xf32>
    %477 = vector.broadcast %476 : vector<4x1xf32> to vector<4x32xf32>
    %478 = arith.mulf %477, %435 : vector<4x32xf32>
    %479 = arith.addf %474, %478 : vector<4x32xf32>
    %480 = vector.broadcast %472 : vector<4x1xf32> to vector<4x32xf32>
    %481 = arith.mulf %480, %479 : vector<4x32xf32>
    %c4_127 = arith.constant 4 : index
    %c0_128 = arith.constant 0 : index
    %482 = vector.load %arg16[%c4_127, %c0_128] : memref<32x32xf32, #tpu.memory_space<vmem>>, vector<4x32xf32>
    tpu.vector_store %arg16[%c4_127, %c0_128], %481 {strides = array<i32>} : memref<32x32xf32, #tpu.memory_space<vmem>>, vector<4x32xf32>,
    %c8_129 = arith.constant 8 : index
    %c0_130 = arith.constant 0 : index
    %483 = vector.load %arg17[%c8_129, %c0_130] : memref<32x96xf32, #tpu.memory_space<vmem>>, vector<4x96xf32>
    %cst_131 = arith.constant dense<0.000000e+00> : vector<4x96xf32>
    %484 = tpu.matmul %479, %388, %cst_131 {dimension_numbers = #tpu.dot_dimension_numbers<[1], [0], [0], [1], [0, 0, 1, 1], [], []>} : vector<4x32xf32>, vector<32x96xf32>, vector<4x96xf32> -> vector<4x96xf32>
    %485 = arith.addf %484, %392 : vector<4x96xf32>
    %486 = vector.extract_strided_slice %483 {offsets = [0, 0], sizes = [4, 32], strides = [1, 1]} : vector<4x96xf32> to vector<4x32xf32>
    %487 = vector.extract_strided_slice %485 {offsets = [0, 0], sizes = [4, 32], strides = [1, 1]} : vector<4x96xf32> to vector<4x32xf32>
    %488 = arith.addf %486, %487 : vector<4x32xf32>
    %489 = arith.negf %488 : vector<4x32xf32>
    %490 = math.exp %489 : vector<4x32xf32>
    %cst_132 = arith.constant 1.000000e+00 : f32
    %491 = vector.broadcast %cst_132 : f32 to vector<4x32xf32>
    %492 = arith.addf %491, %490 : vector<4x32xf32>
    %493 = arith.divf %491, %492 : vector<4x32xf32>
    %494 = vector.extract_strided_slice %483 {offsets = [0, 32], sizes = [4, 32], strides = [1, 1]} : vector<4x96xf32> to vector<4x32xf32>
    %495 = vector.extract_strided_slice %485 {offsets = [0, 32], sizes = [4, 32], strides = [1, 1]} : vector<4x96xf32> to vector<4x32xf32>
    %496 = arith.addf %494, %495 : vector<4x32xf32>
    %497 = arith.negf %496 : vector<4x32xf32>
    %498 = math.exp %497 : vector<4x32xf32>
    %cst_133 = arith.constant 1.000000e+00 : f32
    %499 = vector.broadcast %cst_133 : f32 to vector<4x32xf32>
    %500 = arith.addf %499, %498 : vector<4x32xf32>
    %501 = arith.divf %499, %500 : vector<4x32xf32>
    %502 = vector.extract_strided_slice %483 {offsets = [0, 64], sizes = [4, 32], strides = [1, 1]} : vector<4x96xf32> to vector<4x32xf32>
    %503 = vector.extract_strided_slice %485 {offsets = [0, 64], sizes = [4, 32], strides = [1, 1]} : vector<4x96xf32> to vector<4x32xf32>
    %504 = arith.mulf %493, %503 : vector<4x32xf32>
    %505 = arith.addf %502, %504 : vector<4x32xf32>
    %506 = math.tanh %505 : vector<4x32xf32>
    %cst_134 = arith.constant 1.000000e+00 : f32
    %507 = vector.broadcast %cst_134 : f32 to vector<4x32xf32>
    %508 = arith.subf %507, %501 : vector<4x32xf32>
    %509 = arith.mulf %508, %506 : vector<4x32xf32>
    %510 = arith.mulf %501, %479 : vector<4x32xf32>
    %511 = arith.addf %509, %510 : vector<4x32xf32>
    %c2_i32_135 = arith.constant 2 : i32
    %512 = arith.addi %3, %c2_i32_135 : i32
    %513 = vector.broadcast %512 : i32 to vector<4x1xi32>
    %514 = arith.cmpi sgt, %4, %513 : vector<4x1xi32>
    %515 = arith.extui %514 : vector<4x1xi1> to vector<4x1xi32>
    %516 = arith.sitofp %515 : vector<4x1xi32> to vector<4x1xf32>
    %517 = vector.broadcast %516 : vector<4x1xf32> to vector<4x32xf32>
    %518 = arith.mulf %517, %511 : vector<4x32xf32>
    %cst_136 = arith.constant 1.000000e+00 : f32
    %519 = vector.broadcast %cst_136 : f32 to vector<4x1xf32>
    %520 = arith.subf %519, %516 : vector<4x1xf32>
    %521 = vector.broadcast %520 : vector<4x1xf32> to vector<4x32xf32>
    %522 = arith.mulf %521, %479 : vector<4x32xf32>
    %523 = arith.addf %518, %522 : vector<4x32xf32>
    %524 = vector.broadcast %516 : vector<4x1xf32> to vector<4x32xf32>
    %525 = arith.mulf %524, %523 : vector<4x32xf32>
    %c8_137 = arith.constant 8 : index
    %c0_138 = arith.constant 0 : index
    %526 = vector.load %arg16[%c8_137, %c0_138] : memref<32x32xf32, #tpu.memory_space<vmem>>, vector<4x32xf32>
    tpu.vector_store %arg16[%c8_137, %c0_138], %525 {strides = array<i32>} : memref<32x32xf32, #tpu.memory_space<vmem>>, vector<4x32xf32>,
    %c12_139 = arith.constant 12 : index
    %c0_140 = arith.constant 0 : index
    %527 = vector.load %arg17[%c12_139, %c0_140] : memref<32x96xf32, #tpu.memory_space<vmem>>, vector<4x96xf32>
    %cst_141 = arith.constant dense<0.000000e+00> : vector<4x96xf32>
    %528 = tpu.matmul %523, %388, %cst_141 {dimension_numbers = #tpu.dot_dimension_numbers<[1], [0], [0], [1], [0, 0, 1, 1], [], []>} : vector<4x32xf32>, vector<32x96xf32>, vector<4x96xf32> -> vector<4x96xf32>
    %529 = arith.addf %528, %392 : vector<4x96xf32>
    %530 = vector.extract_strided_slice %527 {offsets = [0, 0], sizes = [4, 32], strides = [1, 1]} : vector<4x96xf32> to vector<4x32xf32>
    %531 = vector.extract_strided_slice %529 {offsets = [0, 0], sizes = [4, 32], strides = [1, 1]} : vector<4x96xf32> to vector<4x32xf32>
    %532 = arith.addf %530, %531 : vector<4x32xf32>
    %533 = arith.negf %532 : vector<4x32xf32>
    %534 = math.exp %533 : vector<4x32xf32>
    %cst_142 = arith.constant 1.000000e+00 : f32
    %535 = vector.broadcast %cst_142 : f32 to vector<4x32xf32>
    %536 = arith.addf %535, %534 : vector<4x32xf32>
    %537 = arith.divf %535, %536 : vector<4x32xf32>
    %538 = vector.extract_strided_slice %527 {offsets = [0, 32], sizes = [4, 32], strides = [1, 1]} : vector<4x96xf32> to vector<4x32xf32>
    %539 = vector.extract_strided_slice %529 {offsets = [0, 32], sizes = [4, 32], strides = [1, 1]} : vector<4x96xf32> to vector<4x32xf32>
    %540 = arith.addf %538, %539 : vector<4x32xf32>
    %541 = arith.negf %540 : vector<4x32xf32>
    %542 = math.exp %541 : vector<4x32xf32>
    %cst_143 = arith.constant 1.000000e+00 : f32
    %543 = vector.broadcast %cst_143 : f32 to vector<4x32xf32>
    %544 = arith.addf %543, %542 : vector<4x32xf32>
    %545 = arith.divf %543, %544 : vector<4x32xf32>
    %546 = vector.extract_strided_slice %527 {offsets = [0, 64], sizes = [4, 32], strides = [1, 1]} : vector<4x96xf32> to vector<4x32xf32>
    %547 = vector.extract_strided_slice %529 {offsets = [0, 64], sizes = [4, 32], strides = [1, 1]} : vector<4x96xf32> to vector<4x32xf32>
    %548 = arith.mulf %537, %547 : vector<4x32xf32>
    %549 = arith.addf %546, %548 : vector<4x32xf32>
    %550 = math.tanh %549 : vector<4x32xf32>
    %cst_144 = arith.constant 1.000000e+00 : f32
    %551 = vector.broadcast %cst_144 : f32 to vector<4x32xf32>
    %552 = arith.subf %551, %545 : vector<4x32xf32>
    %553 = arith.mulf %552, %550 : vector<4x32xf32>
    %554 = arith.mulf %545, %523 : vector<4x32xf32>
    %555 = arith.addf %553, %554 : vector<4x32xf32>
    %c3_i32_145 = arith.constant 3 : i32
    %556 = arith.addi %3, %c3_i32_145 : i32
    %557 = vector.broadcast %556 : i32 to vector<4x1xi32>
    %558 = arith.cmpi sgt, %4, %557 : vector<4x1xi32>
    %559 = arith.extui %558 : vector<4x1xi1> to vector<4x1xi32>
    %560 = arith.sitofp %559 : vector<4x1xi32> to vector<4x1xf32>
    %561 = vector.broadcast %560 : vector<4x1xf32> to vector<4x32xf32>
    %562 = arith.mulf %561, %555 : vector<4x32xf32>
    %cst_146 = arith.constant 1.000000e+00 : f32
    %563 = vector.broadcast %cst_146 : f32 to vector<4x1xf32>
    %564 = arith.subf %563, %560 : vector<4x1xf32>
    %565 = vector.broadcast %564 : vector<4x1xf32> to vector<4x32xf32>
    %566 = arith.mulf %565, %523 : vector<4x32xf32>
    %567 = arith.addf %562, %566 : vector<4x32xf32>
    %568 = vector.broadcast %560 : vector<4x1xf32> to vector<4x32xf32>
    %569 = arith.mulf %568, %567 : vector<4x32xf32>
    %c12_147 = arith.constant 12 : index
    %c0_148 = arith.constant 0 : index
    %570 = vector.load %arg16[%c12_147, %c0_148] : memref<32x32xf32, #tpu.memory_space<vmem>>, vector<4x32xf32>
    tpu.vector_store %arg16[%c12_147, %c0_148], %569 {strides = array<i32>} : memref<32x32xf32, #tpu.memory_space<vmem>>, vector<4x32xf32>,
    %c16_149 = arith.constant 16 : index
    %c0_150 = arith.constant 0 : index
    %571 = vector.load %arg17[%c16_149, %c0_150] : memref<32x96xf32, #tpu.memory_space<vmem>>, vector<4x96xf32>
    %cst_151 = arith.constant dense<0.000000e+00> : vector<4x96xf32>
    %572 = tpu.matmul %567, %388, %cst_151 {dimension_numbers = #tpu.dot_dimension_numbers<[1], [0], [0], [1], [0, 0, 1, 1], [], []>} : vector<4x32xf32>, vector<32x96xf32>, vector<4x96xf32> -> vector<4x96xf32>
    %573 = arith.addf %572, %392 : vector<4x96xf32>
    %574 = vector.extract_strided_slice %571 {offsets = [0, 0], sizes = [4, 32], strides = [1, 1]} : vector<4x96xf32> to vector<4x32xf32>
    %575 = vector.extract_strided_slice %573 {offsets = [0, 0], sizes = [4, 32], strides = [1, 1]} : vector<4x96xf32> to vector<4x32xf32>
    %576 = arith.addf %574, %575 : vector<4x32xf32>
    %577 = arith.negf %576 : vector<4x32xf32>
    %578 = math.exp %577 : vector<4x32xf32>
    %cst_152 = arith.constant 1.000000e+00 : f32
    %579 = vector.broadcast %cst_152 : f32 to vector<4x32xf32>
    %580 = arith.addf %579, %578 : vector<4x32xf32>
    %581 = arith.divf %579, %580 : vector<4x32xf32>
    %582 = vector.extract_strided_slice %571 {offsets = [0, 32], sizes = [4, 32], strides = [1, 1]} : vector<4x96xf32> to vector<4x32xf32>
    %583 = vector.extract_strided_slice %573 {offsets = [0, 32], sizes = [4, 32], strides = [1, 1]} : vector<4x96xf32> to vector<4x32xf32>
    %584 = arith.addf %582, %583 : vector<4x32xf32>
    %585 = arith.negf %584 : vector<4x32xf32>
    %586 = math.exp %585 : vector<4x32xf32>
    %cst_153 = arith.constant 1.000000e+00 : f32
    %587 = vector.broadcast %cst_153 : f32 to vector<4x32xf32>
    %588 = arith.addf %587, %586 : vector<4x32xf32>
    %589 = arith.divf %587, %588 : vector<4x32xf32>
    %590 = vector.extract_strided_slice %571 {offsets = [0, 64], sizes = [4, 32], strides = [1, 1]} : vector<4x96xf32> to vector<4x32xf32>
    %591 = vector.extract_strided_slice %573 {offsets = [0, 64], sizes = [4, 32], strides = [1, 1]} : vector<4x96xf32> to vector<4x32xf32>
    %592 = arith.mulf %581, %591 : vector<4x32xf32>
    %593 = arith.addf %590, %592 : vector<4x32xf32>
    %594 = math.tanh %593 : vector<4x32xf32>
    %cst_154 = arith.constant 1.000000e+00 : f32
    %595 = vector.broadcast %cst_154 : f32 to vector<4x32xf32>
    %596 = arith.subf %595, %589 : vector<4x32xf32>
    %597 = arith.mulf %596, %594 : vector<4x32xf32>
    %598 = arith.mulf %589, %567 : vector<4x32xf32>
    %599 = arith.addf %597, %598 : vector<4x32xf32>
    %c4_i32_155 = arith.constant 4 : i32
    %600 = arith.addi %3, %c4_i32_155 : i32
    %601 = vector.broadcast %600 : i32 to vector<4x1xi32>
    %602 = arith.cmpi sgt, %4, %601 : vector<4x1xi32>
    %603 = arith.extui %602 : vector<4x1xi1> to vector<4x1xi32>
    %604 = arith.sitofp %603 : vector<4x1xi32> to vector<4x1xf32>
    %605 = vector.broadcast %604 : vector<4x1xf32> to vector<4x32xf32>
    %606 = arith.mulf %605, %599 : vector<4x32xf32>
    %cst_156 = arith.constant 1.000000e+00 : f32
    %607 = vector.broadcast %cst_156 : f32 to vector<4x1xf32>
    %608 = arith.subf %607, %604 : vector<4x1xf32>
    %609 = vector.broadcast %608 : vector<4x1xf32> to vector<4x32xf32>
    %610 = arith.mulf %609, %567 : vector<4x32xf32>
    %611 = arith.addf %606, %610 : vector<4x32xf32>
    %612 = vector.broadcast %604 : vector<4x1xf32> to vector<4x32xf32>
    %613 = arith.mulf %612, %611 : vector<4x32xf32>
    %c16_157 = arith.constant 16 : index
    %c0_158 = arith.constant 0 : index
    %614 = vector.load %arg16[%c16_157, %c0_158] : memref<32x32xf32, #tpu.memory_space<vmem>>, vector<4x32xf32>
    tpu.vector_store %arg16[%c16_157, %c0_158], %613 {strides = array<i32>} : memref<32x32xf32, #tpu.memory_space<vmem>>, vector<4x32xf32>,
    %c20_159 = arith.constant 20 : index
    %c0_160 = arith.constant 0 : index
    %615 = vector.load %arg17[%c20_159, %c0_160] : memref<32x96xf32, #tpu.memory_space<vmem>>, vector<4x96xf32>
    %cst_161 = arith.constant dense<0.000000e+00> : vector<4x96xf32>
    %616 = tpu.matmul %611, %388, %cst_161 {dimension_numbers = #tpu.dot_dimension_numbers<[1], [0], [0], [1], [0, 0, 1, 1], [], []>} : vector<4x32xf32>, vector<32x96xf32>, vector<4x96xf32> -> vector<4x96xf32>
    %617 = arith.addf %616, %392 : vector<4x96xf32>
    %618 = vector.extract_strided_slice %615 {offsets = [0, 0], sizes = [4, 32], strides = [1, 1]} : vector<4x96xf32> to vector<4x32xf32>
    %619 = vector.extract_strided_slice %617 {offsets = [0, 0], sizes = [4, 32], strides = [1, 1]} : vector<4x96xf32> to vector<4x32xf32>
    %620 = arith.addf %618, %619 : vector<4x32xf32>
    %621 = arith.negf %620 : vector<4x32xf32>
    %622 = math.exp %621 : vector<4x32xf32>
    %cst_162 = arith.constant 1.000000e+00 : f32
    %623 = vector.broadcast %cst_162 : f32 to vector<4x32xf32>
    %624 = arith.addf %623, %622 : vector<4x32xf32>
    %625 = arith.divf %623, %624 : vector<4x32xf32>
    %626 = vector.extract_strided_slice %615 {offsets = [0, 32], sizes = [4, 32], strides = [1, 1]} : vector<4x96xf32> to vector<4x32xf32>
    %627 = vector.extract_strided_slice %617 {offsets = [0, 32], sizes = [4, 32], strides = [1, 1]} : vector<4x96xf32> to vector<4x32xf32>
    %628 = arith.addf %626, %627 : vector<4x32xf32>
    %629 = arith.negf %628 : vector<4x32xf32>
    %630 = math.exp %629 : vector<4x32xf32>
    %cst_163 = arith.constant 1.000000e+00 : f32
    %631 = vector.broadcast %cst_163 : f32 to vector<4x32xf32>
    %632 = arith.addf %631, %630 : vector<4x32xf32>
    %633 = arith.divf %631, %632 : vector<4x32xf32>
    %634 = vector.extract_strided_slice %615 {offsets = [0, 64], sizes = [4, 32], strides = [1, 1]} : vector<4x96xf32> to vector<4x32xf32>
    %635 = vector.extract_strided_slice %617 {offsets = [0, 64], sizes = [4, 32], strides = [1, 1]} : vector<4x96xf32> to vector<4x32xf32>
    %636 = arith.mulf %625, %635 : vector<4x32xf32>
    %637 = arith.addf %634, %636 : vector<4x32xf32>
    %638 = math.tanh %637 : vector<4x32xf32>
    %cst_164 = arith.constant 1.000000e+00 : f32
    %639 = vector.broadcast %cst_164 : f32 to vector<4x32xf32>
    %640 = arith.subf %639, %633 : vector<4x32xf32>
    %641 = arith.mulf %640, %638 : vector<4x32xf32>
    %642 = arith.mulf %633, %611 : vector<4x32xf32>
    %643 = arith.addf %641, %642 : vector<4x32xf32>
    %c5_i32_165 = arith.constant 5 : i32
    %644 = arith.addi %3, %c5_i32_165 : i32
    %645 = vector.broadcast %644 : i32 to vector<4x1xi32>
    %646 = arith.cmpi sgt, %4, %645 : vector<4x1xi32>
    %647 = arith.extui %646 : vector<4x1xi1> to vector<4x1xi32>
    %648 = arith.sitofp %647 : vector<4x1xi32> to vector<4x1xf32>
    %649 = vector.broadcast %648 : vector<4x1xf32> to vector<4x32xf32>
    %650 = arith.mulf %649, %643 : vector<4x32xf32>
    %cst_166 = arith.constant 1.000000e+00 : f32
    %651 = vector.broadcast %cst_166 : f32 to vector<4x1xf32>
    %652 = arith.subf %651, %648 : vector<4x1xf32>
    %653 = vector.broadcast %652 : vector<4x1xf32> to vector<4x32xf32>
    %654 = arith.mulf %653, %611 : vector<4x32xf32>
    %655 = arith.addf %650, %654 : vector<4x32xf32>
    %656 = vector.broadcast %648 : vector<4x1xf32> to vector<4x32xf32>
    %657 = arith.mulf %656, %655 : vector<4x32xf32>
    %c20_167 = arith.constant 20 : index
    %c0_168 = arith.constant 0 : index
    %658 = vector.load %arg16[%c20_167, %c0_168] : memref<32x32xf32, #tpu.memory_space<vmem>>, vector<4x32xf32>
    tpu.vector_store %arg16[%c20_167, %c0_168], %657 {strides = array<i32>} : memref<32x32xf32, #tpu.memory_space<vmem>>, vector<4x32xf32>,
    %c24_169 = arith.constant 24 : index
    %c0_170 = arith.constant 0 : index
    %659 = vector.load %arg17[%c24_169, %c0_170] : memref<32x96xf32, #tpu.memory_space<vmem>>, vector<4x96xf32>
    %cst_171 = arith.constant dense<0.000000e+00> : vector<4x96xf32>
    %660 = tpu.matmul %655, %388, %cst_171 {dimension_numbers = #tpu.dot_dimension_numbers<[1], [0], [0], [1], [0, 0, 1, 1], [], []>} : vector<4x32xf32>, vector<32x96xf32>, vector<4x96xf32> -> vector<4x96xf32>
    %661 = arith.addf %660, %392 : vector<4x96xf32>
    %662 = vector.extract_strided_slice %659 {offsets = [0, 0], sizes = [4, 32], strides = [1, 1]} : vector<4x96xf32> to vector<4x32xf32>
    %663 = vector.extract_strided_slice %661 {offsets = [0, 0], sizes = [4, 32], strides = [1, 1]} : vector<4x96xf32> to vector<4x32xf32>
    %664 = arith.addf %662, %663 : vector<4x32xf32>
    %665 = arith.negf %664 : vector<4x32xf32>
    %666 = math.exp %665 : vector<4x32xf32>
    %cst_172 = arith.constant 1.000000e+00 : f32
    %667 = vector.broadcast %cst_172 : f32 to vector<4x32xf32>
    %668 = arith.addf %667, %666 : vector<4x32xf32>
    %669 = arith.divf %667, %668 : vector<4x32xf32>
    %670 = vector.extract_strided_slice %659 {offsets = [0, 32], sizes = [4, 32], strides = [1, 1]} : vector<4x96xf32> to vector<4x32xf32>
    %671 = vector.extract_strided_slice %661 {offsets = [0, 32], sizes = [4, 32], strides = [1, 1]} : vector<4x96xf32> to vector<4x32xf32>
    %672 = arith.addf %670, %671 : vector<4x32xf32>
    %673 = arith.negf %672 : vector<4x32xf32>
    %674 = math.exp %673 : vector<4x32xf32>
    %cst_173 = arith.constant 1.000000e+00 : f32
    %675 = vector.broadcast %cst_173 : f32 to vector<4x32xf32>
    %676 = arith.addf %675, %674 : vector<4x32xf32>
    %677 = arith.divf %675, %676 : vector<4x32xf32>
    %678 = vector.extract_strided_slice %659 {offsets = [0, 64], sizes = [4, 32], strides = [1, 1]} : vector<4x96xf32> to vector<4x32xf32>
    %679 = vector.extract_strided_slice %661 {offsets = [0, 64], sizes = [4, 32], strides = [1, 1]} : vector<4x96xf32> to vector<4x32xf32>
    %680 = arith.mulf %669, %679 : vector<4x32xf32>
    %681 = arith.addf %678, %680 : vector<4x32xf32>
    %682 = math.tanh %681 : vector<4x32xf32>
    %cst_174 = arith.constant 1.000000e+00 : f32
    %683 = vector.broadcast %cst_174 : f32 to vector<4x32xf32>
    %684 = arith.subf %683, %677 : vector<4x32xf32>
    %685 = arith.mulf %684, %682 : vector<4x32xf32>
    %686 = arith.mulf %677, %655 : vector<4x32xf32>
    %687 = arith.addf %685, %686 : vector<4x32xf32>
    %c6_i32_175 = arith.constant 6 : i32
    %688 = arith.addi %3, %c6_i32_175 : i32
    %689 = vector.broadcast %688 : i32 to vector<4x1xi32>
    %690 = arith.cmpi sgt, %4, %689 : vector<4x1xi32>
    %691 = arith.extui %690 : vector<4x1xi1> to vector<4x1xi32>
    %692 = arith.sitofp %691 : vector<4x1xi32> to vector<4x1xf32>
    %693 = vector.broadcast %692 : vector<4x1xf32> to vector<4x32xf32>
    %694 = arith.mulf %693, %687 : vector<4x32xf32>
    %cst_176 = arith.constant 1.000000e+00 : f32
    %695 = vector.broadcast %cst_176 : f32 to vector<4x1xf32>
    %696 = arith.subf %695, %692 : vector<4x1xf32>
    %697 = vector.broadcast %696 : vector<4x1xf32> to vector<4x32xf32>
    %698 = arith.mulf %697, %655 : vector<4x32xf32>
    %699 = arith.addf %694, %698 : vector<4x32xf32>
    %700 = vector.broadcast %692 : vector<4x1xf32> to vector<4x32xf32>
    %701 = arith.mulf %700, %699 : vector<4x32xf32>
    %c24_177 = arith.constant 24 : index
    %c0_178 = arith.constant 0 : index
    %702 = vector.load %arg16[%c24_177, %c0_178] : memref<32x32xf32, #tpu.memory_space<vmem>>, vector<4x32xf32>
    tpu.vector_store %arg16[%c24_177, %c0_178], %701 {strides = array<i32>} : memref<32x32xf32, #tpu.memory_space<vmem>>, vector<4x32xf32>,
    %c28_179 = arith.constant 28 : index
    %c0_180 = arith.constant 0 : index
    %703 = vector.load %arg17[%c28_179, %c0_180] : memref<32x96xf32, #tpu.memory_space<vmem>>, vector<4x96xf32>
    %cst_181 = arith.constant dense<0.000000e+00> : vector<4x96xf32>
    %704 = tpu.matmul %699, %388, %cst_181 {dimension_numbers = #tpu.dot_dimension_numbers<[1], [0], [0], [1], [0, 0, 1, 1], [], []>} : vector<4x32xf32>, vector<32x96xf32>, vector<4x96xf32> -> vector<4x96xf32>
    %705 = arith.addf %704, %392 : vector<4x96xf32>
    %706 = vector.extract_strided_slice %703 {offsets = [0, 0], sizes = [4, 32], strides = [1, 1]} : vector<4x96xf32> to vector<4x32xf32>
    %707 = vector.extract_strided_slice %705 {offsets = [0, 0], sizes = [4, 32], strides = [1, 1]} : vector<4x96xf32> to vector<4x32xf32>
    %708 = arith.addf %706, %707 : vector<4x32xf32>
    %709 = arith.negf %708 : vector<4x32xf32>
    %710 = math.exp %709 : vector<4x32xf32>
    %cst_182 = arith.constant 1.000000e+00 : f32
    %711 = vector.broadcast %cst_182 : f32 to vector<4x32xf32>
    %712 = arith.addf %711, %710 : vector<4x32xf32>
    %713 = arith.divf %711, %712 : vector<4x32xf32>
    %714 = vector.extract_strided_slice %703 {offsets = [0, 32], sizes = [4, 32], strides = [1, 1]} : vector<4x96xf32> to vector<4x32xf32>
    %715 = vector.extract_strided_slice %705 {offsets = [0, 32], sizes = [4, 32], strides = [1, 1]} : vector<4x96xf32> to vector<4x32xf32>
    %716 = arith.addf %714, %715 : vector<4x32xf32>
    %717 = arith.negf %716 : vector<4x32xf32>
    %718 = math.exp %717 : vector<4x32xf32>
    %cst_183 = arith.constant 1.000000e+00 : f32
    %719 = vector.broadcast %cst_183 : f32 to vector<4x32xf32>
    %720 = arith.addf %719, %718 : vector<4x32xf32>
    %721 = arith.divf %719, %720 : vector<4x32xf32>
    %722 = vector.extract_strided_slice %703 {offsets = [0, 64], sizes = [4, 32], strides = [1, 1]} : vector<4x96xf32> to vector<4x32xf32>
    %723 = vector.extract_strided_slice %705 {offsets = [0, 64], sizes = [4, 32], strides = [1, 1]} : vector<4x96xf32> to vector<4x32xf32>
    %724 = arith.mulf %713, %723 : vector<4x32xf32>
    %725 = arith.addf %722, %724 : vector<4x32xf32>
    %726 = math.tanh %725 : vector<4x32xf32>
    %cst_184 = arith.constant 1.000000e+00 : f32
    %727 = vector.broadcast %cst_184 : f32 to vector<4x32xf32>
    %728 = arith.subf %727, %721 : vector<4x32xf32>
    %729 = arith.mulf %728, %726 : vector<4x32xf32>
    %730 = arith.mulf %721, %699 : vector<4x32xf32>
    %731 = arith.addf %729, %730 : vector<4x32xf32>
    %c7_i32_185 = arith.constant 7 : i32
    %732 = arith.addi %3, %c7_i32_185 : i32
    %733 = vector.broadcast %732 : i32 to vector<4x1xi32>
    %734 = arith.cmpi sgt, %4, %733 : vector<4x1xi32>
    %735 = arith.extui %734 : vector<4x1xi1> to vector<4x1xi32>
    %736 = arith.sitofp %735 : vector<4x1xi32> to vector<4x1xf32>
    %737 = vector.broadcast %736 : vector<4x1xf32> to vector<4x32xf32>
    %738 = arith.mulf %737, %731 : vector<4x32xf32>
    %cst_186 = arith.constant 1.000000e+00 : f32
    %739 = vector.broadcast %cst_186 : f32 to vector<4x1xf32>
    %740 = arith.subf %739, %736 : vector<4x1xf32>
    %741 = vector.broadcast %740 : vector<4x1xf32> to vector<4x32xf32>
    %742 = arith.mulf %741, %699 : vector<4x32xf32>
    %743 = arith.addf %738, %742 : vector<4x32xf32>
    %744 = vector.broadcast %736 : vector<4x1xf32> to vector<4x32xf32>
    %745 = arith.mulf %744, %743 : vector<4x32xf32>
    %c28_187 = arith.constant 28 : index
    %c0_188 = arith.constant 0 : index
    %746 = vector.load %arg16[%c28_187, %c0_188] : memref<32x32xf32, #tpu.memory_space<vmem>>, vector<4x32xf32>
    tpu.vector_store %arg16[%c28_187, %c0_188], %745 {strides = array<i32>} : memref<32x32xf32, #tpu.memory_space<vmem>>, vector<4x32xf32>,
    %c1_189 = arith.constant 1 : index
    %c0_190 = arith.constant 0 : index
    %c0_191 = arith.constant 0 : index
    %747 = vector.load %arg15[%c1_189, %c0_190, %c0_191] : memref<2x4x32xf32, #tpu.memory_space<vmem>>, vector<1x4x32xf32>
    %748 = vector.shape_cast %747 : vector<1x4x32xf32> to vector<4x32xf32>
    %749 = vector.shape_cast %743 : vector<4x32xf32> to vector<1x4x32xf32>
    tpu.vector_store %arg15[%c1_189, %c0_190, %c0_191], %749 {strides = array<i32>} : memref<2x4x32xf32, #tpu.memory_space<vmem>>, vector<1x4x32xf32>,
    %c0_192 = arith.constant 0 : index
    %c0_193 = arith.constant 0 : index
    %750 = vector.load %arg16[%c0_192, %c0_193] : memref<32x32xf32, #tpu.memory_space<vmem>>, vector<32x32xf32>
    %751 = arith.truncf %750 : vector<32x32xf32> to vector<32x32xbf16>
    %c0_194 = arith.constant 0 : index
    %c0_195 = arith.constant 0 : index
    %c0_196 = arith.constant 0 : index
    %752 = vector.load %arg12[%c0_194, %c0_195, %c0_196] : memref<1x32x16xbf16, #tpu.memory_space<vmem>>, vector<1x32x16xbf16>
    %753 = vector.shape_cast %752 : vector<1x32x16xbf16> to vector<32x16xbf16>
    %cst_197 = arith.constant dense<0.000000e+00> : vector<32x16xf32>
    %754 = tpu.matmul %751, %753, %cst_197 {dimension_numbers = #tpu.dot_dimension_numbers<[1], [0], [0], [1], [0, 0, 1, 1], [], []>} : vector<32x32xbf16>, vector<32x16xbf16>, vector<32x16xf32> -> vector<32x16xf32>
    %c0_198 = arith.constant 0 : index
    %c0_199 = arith.constant 0 : index
    %c0_200 = arith.constant 0 : index
    %755 = vector.load %arg13[%c0_198, %c0_199, %c0_200] : memref<1x1x16xf32, #tpu.memory_space<vmem>>, vector<1x1x16xf32>
    %756 = vector.shape_cast %755 : vector<1x1x16xf32> to vector<1x16xf32>
    %757 = vector.broadcast %756 : vector<1x16xf32> to vector<32x16xf32>
    %758 = arith.addf %754, %757 : vector<32x16xf32>
    %c0_201 = arith.constant 0 : index
    %c0_202 = arith.constant 0 : index
    %c0_203 = arith.constant 0 : index
    %759 = vector.load %arg14[%c0_201, %c0_202, %c0_203] : memref<1x32x16xf32, #tpu.memory_space<vmem>>, vector<1x32x16xf32>
    %760 = vector.shape_cast %759 : vector<1x32x16xf32> to vector<32x16xf32>
    %761 = vector.shape_cast %758 : vector<32x16xf32> to vector<1x32x16xf32>
    tpu.vector_store %arg14[%c0_201, %c0_202, %c0_203], %761 {strides = array<i32>} : memref<1x32x16xf32, #tpu.memory_space<vmem>>, vector<1x32x16xf32>,
    return
  }
  func.func @transform_0(%arg0: i32, %arg1: i32) -> (i32, i32) {
    %c0_i32 = arith.constant 0 : i32
    %c0_i32_0 = arith.constant 0 : i32
    %c0_i32_1 = arith.constant 0 : i32
    return %c0_i32, %c0_i32_0 : i32, i32
  }
  func.func @transform_1(%arg0: i32, %arg1: i32) -> (i32, i32) {
    %c0_i32 = arith.constant 0 : i32
    %c0_i32_0 = arith.constant 0 : i32
    return %arg1, %c0_i32 : i32, i32
  }
  func.func @transform_2(%arg0: i32, %arg1: i32) -> (i32, i32, i32) {
    %c0_i32 = arith.constant 0 : i32
    %c0_i32_0 = arith.constant 0 : i32
    %c0_i32_1 = arith.constant 0 : i32
    return %arg0, %c0_i32, %c0_i32_0 : i32, i32, i32
  }
  func.func @transform_3(%arg0: i32, %arg1: i32) -> (i32, i32, i32) {
    %c0_i32 = arith.constant 0 : i32
    %c0_i32_0 = arith.constant 0 : i32
    %c0_i32_1 = arith.constant 0 : i32
    return %arg0, %c0_i32, %c0_i32_0 : i32, i32, i32
  }
  func.func @transform_4(%arg0: i32, %arg1: i32) -> (i32, i32, i32) {
    %c0_i32 = arith.constant 0 : i32
    %c0_i32_0 = arith.constant 0 : i32
    %c0_i32_1 = arith.constant 0 : i32
    return %arg0, %c0_i32, %c0_i32_0 : i32, i32, i32
  }
  func.func @transform_5(%arg0: i32, %arg1: i32) -> (i32, i32, i32) {
    %c0_i32 = arith.constant 0 : i32
    %c0_i32_0 = arith.constant 0 : i32
    %c0_i32_1 = arith.constant 0 : i32
    return %arg0, %c0_i32, %c0_i32_0 : i32, i32, i32
  }
  func.func @transform_6(%arg0: i32, %arg1: i32) -> (i32, i32, i32) {
    %c0_i32 = arith.constant 0 : i32
    %c0_i32_0 = arith.constant 0 : i32
    %c0_i32_1 = arith.constant 0 : i32
    return %arg0, %c0_i32, %c0_i32_0 : i32, i32, i32
  }
  func.func @transform_7(%arg0: i32, %arg1: i32) -> (i32, i32, i32) {
    %c0_i32 = arith.constant 0 : i32
    %c0_i32_0 = arith.constant 0 : i32
    %c0_i32_1 = arith.constant 0 : i32
    return %arg0, %c0_i32, %c0_i32_0 : i32, i32, i32
  }
  func.func @transform_8(%arg0: i32, %arg1: i32) -> (i32, i32, i32) {
    %c0_i32 = arith.constant 0 : i32
    %c0_i32_0 = arith.constant 0 : i32
    %c0_i32_1 = arith.constant 0 : i32
    return %arg0, %c0_i32, %c0_i32_0 : i32, i32, i32
  }
  func.func @transform_9(%arg0: i32, %arg1: i32) -> (i32, i32, i32) {
    %c0_i32 = arith.constant 0 : i32
    %c0_i32_0 = arith.constant 0 : i32
    %c0_i32_1 = arith.constant 0 : i32
    return %arg0, %c0_i32, %c0_i32_0 : i32, i32, i32
  }
  func.func @transform_10(%arg0: i32, %arg1: i32) -> (i32, i32, i32) {
    %c0_i32 = arith.constant 0 : i32
    %c0_i32_0 = arith.constant 0 : i32
    %c0_i32_1 = arith.constant 0 : i32
    return %arg0, %c0_i32, %c0_i32_0 : i32, i32, i32
  }
  func.func @transform_11(%arg0: i32, %arg1: i32) -> (i32, i32, i32) {
    %c0_i32 = arith.constant 0 : i32
    %c0_i32_0 = arith.constant 0 : i32
    %c0_i32_1 = arith.constant 0 : i32
    return %arg0, %c0_i32, %c0_i32_0 : i32, i32, i32
  }
  func.func @transform_12(%arg0: i32, %arg1: i32) -> (i32, i32, i32) {
    %c0_i32 = arith.constant 0 : i32
    %c0_i32_0 = arith.constant 0 : i32
    return %arg0, %arg1, %c0_i32 : i32, i32, i32
  }
}

</mosaic_0001>

<bundles_post_ra>
// kernel: nnet_arvae_forward.3
= control target key start
LH: loop header
LB: loop body
LE: loop exit
PB: predicated region body
PF: predicated region fallthrough
CT: control target
= control target key end

     0   :  { %s3754_s21 = smov 0   ;;  %s3756_s22 = smov 0   ;;  %s4356_s0 = inlined_call_operand.vmem [shape: s32[4,1], index: 0, kind: input, shape index: {}]   ;;  %s4357_s1 = inlined_call_operand.vmem [shape: bf16[64,8], index: 1, kind: input, shape index: {}]   ;;  %s4358_s2 = inlined_call_operand.vmem [shape: bf16[3,8,96], index: 2, kind: input, shape index: {}]   ;;  %s4359_s3 = inlined_call_operand.vmem [shape: f32[3,1,96], index: 3, kind: input, shape index: {}]   ;;  %s4360_s4 = inlined_call_operand.vmem [shape: f32[3,32,96], index: 4, kind: input, shape index: {}]   ;;  %s4361_s5 = inlined_call_operand.vmem [shape: f32[3,1,96], index: 5, kind: input, shape index: {}]   ;;  %s4362_s6 = inlined_call_operand.vmem [shape: bf16[3,32,96], index: 6, kind: input, shape index: {}]   ;;  %s4363_s7 = inlined_call_operand.vmem [shape: f32[3,32,96], index: 7, kind: input, shape index: {}]   ;;  %s4364_s8 = inlined_call_operand.vmem [shape: f32[3,1,96], index: 8, kind: input, shape index: {}]   ;;  %s4365_s9 = inlined_call_operand.vmem [shape: f32[3,1,96], index: 9, kind: input, shape index: {}]   ;;  %s4366_s10 = inlined_call_operand.vmem [shape: bf16[3,32,16], index: 10, kind: input, shape index: {}]   ;;  %s4367_s11 = inlined_call_operand.vmem [shape: f32[3,1,16], index: 11, kind: input, shape index: {}]   ;;  %s4368_s12 = inlined_call_operand.vmem [shape: f32[3,64,16], index: 12, kind: output, shape index: {}]  }
   0x1   :  { %4373 = sst [smem:[#allocation11_spill]] %s4356_s0  ;;  %s3758_s23 = smov 0  }
   0x2   :  { %4374 = sst [smem:[#allocation12_spill]] %s4357_s1  ;;  %s3760_s24 = smov 0  }
   0x3   :  { %4375 = sst [smem:[#allocation13_spill]] %s4358_s2  ;;  %s3762_s25 = smov 0  }
   0x4   :  { %4376 = sst [smem:[#allocation14_spill]] %s4359_s3 }
   0x5   :  { %4377 = sst [smem:[#allocation15_spill]] %s4360_s4 }
   0x6   :  { %4378 = sst [smem:[#allocation16_spill]] %s4362_s6 }
   0x7   :  { %4379 = sst [smem:[#allocation17_spill]] %s4363_s7 }
   0x8 LB: > { %4380 = sst [smem:[#allocation5_spill]] %s3663_s21  ;;  %s31_s26 = sadd.s32 1, %s3671_s23  ;;  %s3679_s25 = sphi %s3762_s25, %s22_s25   ;;  %s3675_s24 = sphi %s3760_s24, %s4402_s24   ;;  %s3671_s23 = sphi %s3758_s23, %s4401_s23   ;;  %s3667_s22 = sphi %s3756_s22, %s4400_s22   ;;  %s3663_s21 = sphi %s3754_s21, %s4399_s21  }
   0x9   : > { %4381 = sst [smem:[#allocation6_spill]] %s3671_s23  ;;  %s34_s27 = sadd.s32 1, %s3675_s24 }
   0xa   : > { %4382 = sst [smem:[#allocation7_spill]] %s3675_s24  ;;  %p32_p0 = scmp.ge.s32.totalorder %s31_s26, 2 }
   0xb   : > { %4383 = sst [smem:[#allocation8_spill]] %s3679_s25  ;;  %p3023_p1 = scmp.ge.s32.totalorder %s3679_s25, 1 }
   0xc   : > { %p466_p2 = scmp.lt.s32.totalorder %s3679_s25, 7  ;;  %s4404_s26 = smov (%p32_p0, %s31_s26), 0 }
   0xd   : > { %4384 = sst [smem:[#allocation9_spill]] %s4404_s26  ;;  %s4406_s27 = smov (!%p32_p0, %s34_s27), %s3675_s24 }
   0xe   : > { %p467_p3 = pnand %p3023_p1, %p466_p2  ;;  %p36_p4 = scmp.ge.s32.totalorder %s4406_s27, 3 }
   0xf   : > { %s3024_s28 = sshll.u32 (!%p467_p3), %s3663_s21, 2  ;;  %p557_p5 = scmp.lt.s32.totalorder (!%p467_p3), %s3667_s22, 2 }
  0x10   : > { %s4408_s27 = smov (%p36_p4, %s4406_s27), 0  ;;  %470 = sbr.rel (%p467_p3) target bundleno = 11369 (0x2c69), region = 68 }
  0x11   : > { %4385 = sst [smem:[#allocation10_spill]] %s4408_s27  ;;  %p552_p6 = scmp.lt.s32.totalorder (!%p467_p3), %s3024_s28, 7 }
  0x12   : > { %s4387_s2 = sld [smem:[#allocation13_spill]] (!%p467_p3)  ;;  %s4388_s1 = sld [smem:[#allocation12_spill]] (!%p467_p3) }
  0x13   : > { %s4389_s4 = sld [smem:[#allocation15_spill]] (!%p467_p3)  ;;  %s4390_s7 = sld [smem:[#allocation17_spill]] (!%p467_p3) }
  0x14   : > { %s4391_s6 = sld [smem:[#allocation16_spill]] (!%p467_p3)  ;;  %s4392_s20 = sld [smem:[#allocation5_spill]] (!%p467_p3) }
  0x17   : > { %s4410_s22 = smov (!%p557_p5, %s3667_s22), 2  ;;  %s4412_s28 = smov (!%p552_p6, %s3024_s28), 7 }
  0x18   : > { %s3026_s29 = sshll.u32 %s4410_s22, 2  ;;  %s3025_s15 = sshll.u32 %s4412_s28, 2 }
  0x19   : > { %s560_s18 = scalar_lea.vmem %s4387_s2, %s3026_s29  ;;  %s555_s27 = scalar_lea.vmem %s4388_s1, %s3025_s15 }
  0x1a   : > { %s3099_s26 = sshll.u32 %s4410_s22, 5  ;;  %s3100_s13 = sshll.u32 %s4410_s22, 4 }
  0x1b   : > { %s3804_s25 = scalar_lea.vmem %s4389_s4, %s3099_s26  ;;  %s3814_s16 = scalar_lea.vmem %s4390_s7, %s3099_s26 }
  0x1c   : > { %s3819_s15 = scalar_lea.vmem %s4391_s6, %s3100_s13  ;;  %s584_s23 = scalar_lea.vmem %s4364_s8, %s4410_s22 }
  0x1d   : > { %s587_s0 = scalar_lea.vmem %s4365_s9, %s4410_s22  ;;  %s3832_s2 = scalar_lea.vmem %s4366_s10, %s3100_s13 }
  0x1e   : > { %s595_s14 = scalar_lea.vmem %s4367_s11, %s4410_s22  ;;  %s3036_s29 = sshll.u32 %s4410_s22, 3 }
  0x1f   : > { %s602_s17 = sadd.s32 %s3036_s29, %s4412_s28  ;;  %p3038_p7 = scmp.ne.s32.totalorder %s4392_s20, 0 }
  0x20   : > { %s3037_s4 = sshll.u32 %s602_s17, 3  ;;  %vm611_vm0 = vcmask (!%p3038_p7), 257024   ;;  %v3681_v0 = vmov (!%p3038_p7), 0.0  }
  0x21   : > { %s3842_s19 = scalar_lea.vmem %s4368_s12, %s3037_s4  ;;  %610 = sbr.rel (%p3038_p7) target bundleno = 40 (0x28), region = 72  ;;  %612 = vst.msk [vmem:[#allocation2] sm:$0xf] (!%p3038_p7), %vm611_vm0, %v3681_v0  ;;  %613 = vst.msk [vmem:[#allocation2 + $0x4] sm:$0xf] (!%p3038_p7), %vm611_vm0, %v3681_v0 }
  0x28 PF: > { %v620_v1 = vld [vmem:[%s560_s18] sm:$0xf]  ;;  %vm645_vm1 = vcmask 1043456   ;;  %s4393_s1 = sld [smem:[#allocation5_spill]]  ;;  %vm638_vm2 = vcmask 64512   ;;  %v3540_v4 = vld [vmem:[%s555_s27 + $0x8] sm:$0xff]   ;;  %s4397_s3 = scalar_lea.vmem %s4361_s5, %s4410_s22 }
  0x29   : > { %v3539_v2 = vld [vmem:[%s555_s27] sm:$0xff]   ;;  %3488 = vmatprep.subr.msk.bf16.mxu1 %vm645_vm1, %v620_v1  ;;  %v647_v3 = vsel %vm645_vm1, %v620_v1, 0  ;;  %v3682_v6 = vmov 0.0|0.0   ;;  %v704_v7 = vld [vmem:[%s3804_s25 + $0x8] sm:$0xff]  ;;  %v705_v8 = vld [vmem:[%s3804_s25 + $0x10] sm:$0xff]  ;;  %v3683_v11 = vmov 0  }
  0x2a   : > { %3195 = vmatpush3.bf16.msra.mxu1 %v647_v3  ;;  %3196 = vmatprep.mubr.msk.bf16.mxu1 %vm638_vm2, %v3539_v2  ;;  %v703_v5 = vld [vmem:[%s3804_s25] sm:$0xff]  ;;  %v706_v9 = vld [vmem:[%s3804_s25 + $0x18] sm:$0xff]  ;;  %s4394_s28 = sld [smem:[#allocation11_spill]]  ;;  %vm3684_vm3 = vmmov 0   ;;  %v3685_v13 = vmov 0.0   ;;  %vm716_vm5 = vcmask 261120  }
  0x2b   : > { %3392 = vmatprep.subr.bf16.mxu1 %v3682_v6  ;;  %3398 = vmatprep.subr.bf16.mxu0 %v3682_v6  ;;  %v3852_v10 = vpack.c.bf16 %v704_v7, %v703_v5  ;;  %v3867_v15 = vpack.c.bf16 %v706_v9, %v705_v8  ;;  %v714_v18 = vld [vmem:[#allocation2] sm:$0xf]  ;;  %s3686_s25 = smov 32   ;;  %s4395_s30 = sld [smem:[#allocation14_spill]]  ;;  %vm698_vm6 = vcmask 785408   ;;  %vm846_vm14 = vcmask 257024  }
  0x2c   : > { %3537 = vset.pattern.permute.xlu1 %v3683_v11  ;;  %3219 = vmatprep.mubr.msk.f32.mxu0 %vm3684_vm3, %v3685_v13  ;;  %v3902_v28 = vld [vmem:[%s4397_s3] ss:$0 sm:$0xff]  ;;  %s3687_s26 = smov 64   ;;  %s3688_s29 = smov 96   ;;  %vm2825_vm15 = vcmask 130048  }
  0x2d   : > { %3197 = vmatmul.mubr.msk.bf16.vlgmr.msra.gmra.mrb[0].mxu1 %vm638_vm2, %v3540_v4  ;;  %3538 = vset.pattern.permute.xlu0 %v3683_v11 }
  0x2e   : > { %s3855_s4 = sshll.u32 %s4393_s1, 3  ;;  %3394 = vmatpush3.bf16.msra.mxu1 %v3852_v10  ;;  %3208 = vmatprep.mubr.msk.f32.mxu1 %vm3684_vm3, %v3685_v13 }
  0x2f   : > { %v819_v14 = vstv %s3855_s4  ;;  %3395 = vmatprep.subr.bf16.mxu1 %v3682_v6  ;;  %3400 = vmatpush3.bf16.msra.mxu0 %v3852_v10  ;;  %s950_s17 = sadd.s32 1, %s3855_s4  ;;  %s1077_s20 = sadd.s32 2, %s3855_s4 }
  0x30   : > { %v3860_v12 = vld [vmem:[%s4394_s28] sm:$0xf]  ;;  %3401 = vmatprep.subr.bf16.mxu0 %v3682_v6  ;;  %v951_v57 = vstv %s950_s17  ;;  %s1204_s1 = sadd.s32 3, %s3855_s4  ;;  %s1331_s6 = sadd.s32 4, %s3855_s4 }
  0x31   : > { %vm820_vm4 = vcmp.gt.s32.totalorder %v3860_v12, %v819_v14  ;;  %s4396_s13 = scalar_lea.vmem %s4395_s30, %s4410_s22  ;;  %vm952_vm7 = vcmp.gt.s32.totalorder %v3860_v12, %v951_v57  ;;  %v1205_v57 = vstv %s1204_s1  ;;  %s1458_s7 = sadd.s32 5, %s3855_s4 }
  0x32   : > { %v3048_v16 = vsel %vm820_vm4, 1.0, %v3685_v13  ;;  %3397 = vmatpush3.bf16.msra.mxu1 %v3867_v15  ;;  %v3040_v19 = vld [vmem:[%s4396_s13] ss:$0 sm:$0xff]  ;;  %v3051_v60 = vsel %vm952_vm7, 1.0, %v3685_v13  ;;  %vm1206_vm9 = vcmp.gt.s32.totalorder %v3860_v12, %v1205_v57  ;;  %s1585_s28 = sadd.s32 6, %s3855_s4  ;;  %s1712_s27 = sadd.s32 7, %s3855_s4 }
  0x33   : > { %v829_v17 = vsub.f32 1.0, %v3048_v16  ;;  %3403 = vmatpush3.bf16.msra.mxu0 %v3867_v15  ;;  %3404 = vmatprep.subr.bf16.mxu1 %v3682_v6  ;;  %v961_v5 = vsub.f32 1.0, %v3051_v60 }
  0x34   : > { %3410 = vmatprep.subr.bf16.mxu0 %v3682_v6 }
  0x35   : > { %832 = vperm.xlu1 %3537, %v829_v17   ;;  %3209 = vmatmul.mubr.msk.f32.vlgmr.msra.gmra.mrb[4].mxu1 %vm716_vm5, %v714_v18 }
  0x36   : > { %3406 = vmatpush3.bf16.msra.mxu1 %v3852_v10  ;;  %3230 = vmatprep.mubr.msk.f32.mxu1 %vm3684_vm3, %v3685_v13 }
  0x37   : > { %3407 = vmatprep.subr.bf16.mxu1 %v3682_v6 }
  0x39   : > { %825 = vperm.xlu1 %3537, %v3048_v16  }
  0x3a   : > { %3409 = vmatpush3.bf16.msra.mxu1 %v3867_v15 }
  0x3b   : > { %3416 = vmatprep.subr.bf16.mxu1 %v3682_v6 }
  0x3d   : > { %814 = vrot.lane.b32.xlu1 %v714_v18, %s3686_s25 }
  0xb4   : > { %v3907_v43 = vpop.permute.xlu1 %832 }
  0xb5   : > { %v835_v44 = vmul.f32 %v3907_v43, %v714_v18 }
  0xb8   : > { %v3912_v45 = vpop.permute.xlu1 %825 }
  0xbc   : > { %v815_v46 = vpop.permute.xlu1 %814 }
 0x100   : > { %v3198_v20 = vpop.f32.mrb[0].mxu1 }
 0x101   : > { %v692_v21 = vadd.f32 %v3198_v20, %v3040_v19  ;;  %v683_v22 = vpop.f32.mrb[1].mxu1 }
 0x102   : > { %v684_v23 = vadd.f32 %v3040_v19, %v683_v22  ;;  %v3199_v24 = vpop.f32.mrb[2].mxu1 }
 0x103   : > { %701 = vst.msk [vmem:[#allocation4 + $0x10] sm:$0xff] %vm698_vm6, %v692_v21  ;;  %v695_v25 = vadd.f32 %v3199_v24, %v3040_v19  ;;  %v686_v26 = vpop.f32.mrb[3].mxu1 }
 0x104   : > { %699 = vst.msk [vmem:[#allocation4] sm:$0xff] %vm698_vm6, %v684_v23  ;;  %v687_v27 = vadd.f32 %v3040_v19, %v686_v26 }
 0x105   : > { %702 = vst.msk [vmem:[#allocation4 + $0x18] sm:$0xff] %vm698_vm6, %v695_v25  ;;  %v1078_v25 = vstv %s1077_s20 }
 0x106   : > { %700 = vst.msk [vmem:[#allocation4 + $0x8] sm:$0xff] %vm698_vm6, %v687_v27  ;;  %vm1079_vm8 = vcmp.gt.s32.totalorder %v3860_v12, %v1078_v25 }
 0x108   : > { %v786_v29 = vpop.f32.mrb[4].mxu1 }
 0x109   : > { %v787_v30 = vadd.f32 %v3902_v28, %v786_v29  ;;  %v3210_v31 = vpop.f32.mrb[5].mxu1 }
 0x10b   : > { %798 = vrot.lane.b32.xlu0 %v787_v30, %s3687_s26  ;;  %v715_v32 = vld [vmem:[#allocation4] sm:$0xf]  ;;  %v848_v61 = vld [vmem:[#allocation4 + $0x4] sm:$0xf] }
 0x10c   : > { %v790_v33 = vadd.f32 %v787_v30, %v715_v32  ;;  %v3054_v30 = vsel %vm1079_vm8, 1.0, %v3685_v13 }
 0x10d   : > { %v975_v31 = vld [vmem:[#allocation4 + $0x8] sm:$0xf] }
 0x10e   : > { %v3047_v34 = vmul.f32 -1.442695, %v790_v33 }
 0x110   : > { %3545 = vpow2.f32 %v3047_v34 }
 0x11a   : > { %v3546_v35 = vpop.eup %3545 }
 0x11b   : > { %v794_v36 = vadd.f32 1.0, %v3546_v35 }
 0x11d   : > { %3547 = vrcp.f32 %v794_v36 }
 0x127   : > { %v3548_v37 = vpop.eup %3547 }
 0x128   : > { %v808_v47 = vsub.f32 1.0, %v3548_v37  ;;  %v817_v49 = vmul.f32 %v3548_v37, %v815_v46 }
 0x17d   : > { %v799_v38 = vpop.permute.xlu0 %798 }
 0x17e   : > { %v801_v39 = vmul.f32 %v3548_v37, %v799_v38 }
 0x180   : > { %803 = vrot.lane.b32.xlu0 %v801_v39, %s3687_s26  ;;  %v1088_v39 = vsub.f32 1.0, %v3054_v30 }
 0x1f2   : > { %v804_v40 = vpop.permute.xlu0 %803 }
 0x1f3   : > { %v806_v41 = vadd.f32 %v804_v40, %v715_v32 }
 0x1f5   : > { %3549 = vtanh.f32 %v806_v41 }
 0x1ff   : > { %v3550_v42 = vpop.eup %3549 }
 0x200   : > { %810 = vrot.lane.b32.xlu0 %v3550_v42, %s3688_s29 }
 0x204   : > { %837 = vrot.lane.b32.xlu0 %v835_v44, %s3686_s25 }
 0x272   : > { %v811_v48 = vpop.permute.xlu0 %810 }
 0x273   : > { %v813_v50 = vmul.f32 %v811_v48, %v808_v47 }
 0x275   : > { %v818_v51 = vadd.f32 %v817_v49, %v813_v50 }
 0x276   : > { %v838_v52 = vpop.permute.xlu0 %837 }
 0x277   : > { %v828_v53 = vmul.f32 %v3912_v45, %v818_v51 }
 0x279   : > { %v3915_v54 = vadd.f32 %v838_v52, %v828_v53 }
 0x27b   : > { %850 = vrot.lane.b32.xlu1 %v3915_v54, %s3688_s29 }
 0x2ed   : > { %v851_v55 = vpop.permute.xlu1 %850 }
 0x2ee   : > { %3220 = vmatmul.mubr.msk.f32.vlgmr.msra.gmra.mrb[0].mxu0 %vm716_vm5, %v851_v55 }
 0x2ef   : > { %3412 = vmatpush3.bf16.msra.mxu0 %v3852_v10  ;;  %3241 = vmatprep.mubr.msk.f32.mxu0 %vm3684_vm3, %v3685_v13 }
 0x2f0   : > { %3413 = vmatprep.subr.bf16.mxu0 %v3682_v6 }
 0x2f3   : > { %3415 = vmatpush3.bf16.msra.mxu0 %v3867_v15 }
 0x2f4   : > { %3422 = vmatprep.subr.bf16.mxu0 %v3682_v6 }
 0x3c1   : > { %v920_v56 = vpop.f32.mrb[0].mxu0 }
 0x3c2   : > { %v921_v58 = vadd.f32 %v3902_v28, %v920_v56  ;;  %v3221_v59 = vpop.f32.mrb[1].mxu0 }
 0x3c4   : > { %932 = vrot.lane.b32.xlu0 %v921_v58, %s3687_s26  ;;  %v924_v62 = vadd.f32 %v921_v58, %v848_v61 }
 0x3c6   : > { %v3050_v63 = vmul.f32 -1.442695, %v924_v62  ;;  %v1102_v62 = vld [vmem:[#allocation4 + $0xc] sm:$0xf] }
 0x3c8   : > { %957 = vperm.xlu0 %3538, %v3051_v60   ;;  %3551 = vpow2.f32 %v3050_v63 }
 0x3d2   : > { %v3552_v0 = vpop.eup %3551 }
 0x3d3   : > { %v928_v1 = vadd.f32 1.0, %v3552_v0 }
 0x3d5   : > { %3553 = vrcp.f32 %v928_v1 }
 0x3df   : > { %v3554_v2 = vpop.eup %3553 }
 0x3e0   : > { %v942_v14 = vsub.f32 1.0, %v3554_v2  ;;  %v948_v17 = vmul.f32 %v3554_v2, %v3915_v54 }
 0x436   : > { %v933_v3 = vpop.permute.xlu0 %932 }
 0x437   : > { %v935_v4 = vmul.f32 %v3554_v2, %v933_v3 }
 0x439   : > { %937 = vrot.lane.b32.xlu1 %v935_v4, %s3687_s26 }
 0x43d   : > { %964 = vperm.xlu1 %3537, %v961_v5  }
 0x447   : > { %v3936_v19 = vpop.permute.xlu0 %957 }
 0x4ab   : > { %v938_v7 = vpop.permute.xlu1 %937 }
 0x4ac   : > { %v940_v8 = vadd.f32 %v938_v7, %v848_v61  ;;  %v3057_v61 = vsel %vm1206_vm9, 1.0, %v3685_v13 }
 0x4ad   : > { %v1215_v7 = vsub.f32 1.0, %v3057_v61 }
 0x4ae   : > { %3555 = vtanh.f32 %v940_v8 }
 0x4b8   : > { %v3556_v9 = vpop.eup %3555 }
 0x4b9   : > { %944 = vrot.lane.b32.xlu1 %v3556_v9, %s3688_s29 }
 0x4bc   : > { %v3933_v11 = vpop.permute.xlu1 %964 }
 0x4bd   : > { %v967_v21 = vmul.f32 %v3933_v11, %v3915_v54 }
 0x52b   : > { %v945_v16 = vpop.permute.xlu1 %944 }
 0x52c   : > { %v947_v18 = vmul.f32 %v945_v16, %v942_v14 }
 0x52e   : > { %v949_v20 = vadd.f32 %v948_v17, %v947_v18 }
 0x530   : > { %v960_v22 = vmul.f32 %v3936_v19, %v949_v20 }
 0x532   : > { %v3941_v23 = vadd.f32 %v967_v21, %v960_v22 }
 0x534   : > { %977 = vrot.lane.b32.xlu0 %v3941_v23, %s3688_s29 }
 0x5a6   : > { %v978_v24 = vpop.permute.xlu0 %977 }
 0x5a7   : > { %3231 = vmatmul.mubr.msk.f32.vlgmr.msra.gmra.mrb[6].mxu1 %vm716_vm5, %v978_v24 }
 0x5a8   : > { %3418 = vmatpush3.bf16.msra.mxu1 %v3852_v10  ;;  %3252 = vmatprep.mubr.msk.f32.mxu1 %vm3684_vm3, %v3685_v13 }
 0x5a9   : > { %3419 = vmatprep.subr.bf16.mxu1 %v3682_v6 }
 0x5ac   : > { %3421 = vmatpush3.bf16.msra.mxu1 %v3867_v15 }
 0x5ad   : > { %3428 = vmatprep.subr.bf16.mxu1 %v3682_v6 }
 0x67a   : > { %v1047_v26 = vpop.f32.mrb[6].mxu1 }
 0x67b   : > { %v1048_v27 = vadd.f32 %v3902_v28, %v1047_v26  ;;  %v3232_v29 = vpop.f32.mrb[7].mxu1 }
 0x67d   : > { %1059 = vrot.lane.b32.xlu1 %v1048_v27, %s3687_s26  ;;  %v1051_v32 = vadd.f32 %v1048_v27, %v975_v31 }
 0x67f   : > { %v3053_v33 = vmul.f32 -1.442695, %v1051_v32 }
 0x681   : > { %1084 = vperm.xlu1 %3537, %v3054_v30   ;;  %3557 = vpow2.f32 %v3053_v33  ;;  %v1332_v30 = vstv %s1331_s6 }
 0x682   : > { %vm1333_vm10 = vcmp.gt.s32.totalorder %v3860_v12, %v1332_v30 }
 0x68b   : > { %v3558_v34 = vpop.eup %3557 }
 0x68c   : > { %v1055_v35 = vadd.f32 1.0, %v3558_v34  ;;  %v3060_v34 = vsel %vm1333_vm10, 1.0, %v3685_v13 }
 0x68e   : > { %3559 = vrcp.f32 %v1055_v35  ;;  %v1229_v35 = vld [vmem:[#allocation4 + $0x10] sm:$0xf] }
 0x698   : > { %v3560_v36 = vpop.eup %3559 }
 0x699   : > { %v1069_v46 = vsub.f32 1.0, %v3560_v36  ;;  %v1075_v48 = vmul.f32 %v3560_v36, %v3941_v23 }
 0x6ef   : > { %v1060_v37 = vpop.permute.xlu1 %1059 }
 0x6f0   : > { %v1062_v38 = vmul.f32 %v3560_v36, %v1060_v37 }
 0x6f2   : > { %1064 = vrot.lane.b32.xlu0 %v1062_v38, %s3687_s26 }
 0x6f6   : > { %1091 = vperm.xlu0 %3538, %v1088_v39  }
 0x700   : > { %v3959_v44 = vpop.permute.xlu1 %1084 }
 0x764   : > { %v1065_v40 = vpop.permute.xlu0 %1064 }
 0x765   : > { %v1067_v41 = vadd.f32 %v1065_v40, %v975_v31 }
 0x767   : > { %3561 = vtanh.f32 %v1067_v41 }
 0x771   : > { %v3562_v42 = vpop.eup %3561 }
 0x772   : > { %1071 = vrot.lane.b32.xlu1 %v3562_v42, %s3688_s29 }
 0x775   : > { %v3962_v50 = vpop.permute.xlu0 %1091 }
 0x776   : > { %v1094_v52 = vmul.f32 %v3962_v50, %v3941_v23 }
 0x7e4   : > { %v1072_v47 = vpop.permute.xlu1 %1071 }
 0x7e5   : > { %v1074_v49 = vmul.f32 %v1072_v47, %v1069_v46  ;;  %v1342_v46 = vsub.f32 1.0, %v3060_v34 }
 0x7e7   : > { %v1076_v51 = vadd.f32 %v1075_v48, %v1074_v49 }
 0x7e9   : > { %v1087_v53 = vmul.f32 %v3959_v44, %v1076_v51 }
 0x7eb   : > { %v3967_v55 = vadd.f32 %v1094_v52, %v1087_v53 }
 0x7ed   : > { %1104 = vrot.lane.b32.xlu0 %v3967_v55, %s3688_s29 }
 0x85f   : > { %v1105_v56 = vpop.permute.xlu0 %1104 }
 0x860   : > { %3242 = vmatmul.mubr.msk.f32.vlgmr.msra.gmra.mrb[2].mxu0 %vm716_vm5, %v1105_v56 }
 0x861   : > { %3424 = vmatpush3.bf16.msra.mxu0 %v3852_v10  ;;  %3263 = vmatprep.mubr.msk.f32.mxu0 %vm3684_vm3, %v3685_v13 }
 0x862   : > { %3425 = vmatprep.subr.bf16.mxu0 %v3682_v6 }
 0x865   : > { %3427 = vmatpush3.bf16.msra.mxu0 %v3867_v15 }
 0x866   : > { %3434 = vmatprep.subr.bf16.mxu0 %v3682_v6 }
 0x933   : > { %v1174_v58 = vpop.f32.mrb[2].mxu0 }
 0x934   : > { %v1175_v59 = vadd.f32 %v3902_v28, %v1174_v58  ;;  %v3243_v60 = vpop.f32.mrb[3].mxu0 }
 0x936   : > { %1186 = vrot.lane.b32.xlu1 %v1175_v59, %s3687_s26  ;;  %v1178_v63 = vadd.f32 %v1175_v59, %v1102_v62 }
 0x938   : > { %v3056_v0 = vmul.f32 -1.442695, %v1178_v63 }
 0x93a   : > { %1211 = vperm.xlu1 %3537, %v3057_v61   ;;  %3563 = vpow2.f32 %v3056_v0  ;;  %v1459_v0 = vstv %s1458_s7 }
 0x93b   : > { %vm1460_vm11 = vcmp.gt.s32.totalorder %v3860_v12, %v1459_v0 }
 0x944   : > { %v3564_v1 = vpop.eup %3563 }
 0x945   : > { %v1182_v2 = vadd.f32 1.0, %v3564_v1 }
 0x947   : > { %3565 = vrcp.f32 %v1182_v2 }
 0x951   : > { %v3566_v3 = vpop.eup %3565 }
 0x952   : > { %v1196_v17 = vsub.f32 1.0, %v3566_v3  ;;  %v1202_v20 = vmul.f32 %v3566_v3, %v3967_v55 }
 0x9a8   : > { %v1187_v4 = vpop.permute.xlu1 %1186 }
 0x9a9   : > { %v1189_v5 = vmul.f32 %v3566_v3, %v1187_v4  ;;  %v1356_v4 = vld [vmem:[#allocation4 + $0x14] sm:$0xf] }
 0x9ab   : > { %1191 = vrot.lane.b32.xlu0 %v1189_v5, %s3687_s26 }
 0x9af   : > { %1218 = vperm.xlu0 %3538, %v1215_v7  }
 0x9b9   : > { %v3985_v16 = vpop.permute.xlu1 %1211 }
 0xa1d   : > { %v1192_v8 = vpop.permute.xlu0 %1191 }
 0xa1e   : > { %v1194_v9 = vadd.f32 %v1192_v8, %v1102_v62 }
 0xa20   : > { %3567 = vtanh.f32 %v1194_v9 }
 0xa2a   : > { %v3568_v14 = vpop.eup %3567 }
 0xa2b   : > { %1198 = vrot.lane.b32.xlu1 %v3568_v14, %s3688_s29 }
 0xa2e   : > { %v3988_v22 = vpop.permute.xlu0 %1218 }
 0xa2f   : > { %v1221_v25 = vmul.f32 %v3988_v22, %v3967_v55 }
 0xa9d   : > { %v1199_v18 = vpop.permute.xlu1 %1198 }
 0xa9e   : > { %v1201_v21 = vmul.f32 %v1199_v18, %v1196_v17 }
 0xaa0   : > { %v1203_v24 = vadd.f32 %v1202_v20, %v1201_v21 }
 0xaa2   : > { %v1214_v26 = vmul.f32 %v3985_v16, %v1203_v24 }
 0xaa4   : > { %v3993_v27 = vadd.f32 %v1221_v25, %v1214_v26 }
 0xaa6   : > { %1231 = vrot.lane.b32.xlu0 %v3993_v27, %s3688_s29 }
 0xb18   : > { %v1232_v29 = vpop.permute.xlu0 %1231 }
 0xb19   : > { %3253 = vmatmul.mubr.msk.f32.vlgmr.msra.gmra.mrb[8].mxu1 %vm716_vm5, %v1232_v29 }
 0xb1a   : > { %3430 = vmatpush3.bf16.msra.mxu1 %v3852_v10  ;;  %3274 = vmatprep.mubr.msk.f32.mxu1 %vm3684_vm3, %v3685_v13 }
 0xb1b   : > { %3431 = vmatprep.subr.bf16.mxu1 %v3682_v6 }
 0xb1e   : > { %3433 = vmatpush3.bf16.msra.mxu1 %v3867_v15 }
 0xbec   : > { %v1301_v31 = vpop.f32.mrb[8].mxu1 }
 0xbed   : > { %v1302_v32 = vadd.f32 %v3902_v28, %v1301_v31  ;;  %v3254_v33 = vpop.f32.mrb[9].mxu1 }
 0xbef   : > { %1313 = vrot.lane.b32.xlu1 %v1302_v32, %s3687_s26  ;;  %v1305_v36 = vadd.f32 %v1302_v32, %v1229_v35 }
 0xbf1   : > { %v3059_v37 = vmul.f32 -1.442695, %v1305_v36 }
 0xbf3   : > { %1338 = vperm.xlu1 %3537, %v3060_v34   ;;  %3569 = vpow2.f32 %v3059_v37 }
 0xbfd   : > { %v3570_v38 = vpop.eup %3569 }
 0xbfe   : > { %v1309_v39 = vadd.f32 1.0, %v3570_v38  ;;  %v1586_v38 = vstv %s1585_s28 }
 0xbff   : > { %vm1587_vm12 = vcmp.gt.s32.totalorder %v3860_v12, %v1586_v38 }
 0xc00   : > { %3571 = vrcp.f32 %v1309_v39 }
 0xc0a   : > { %v3572_v40 = vpop.eup %3571 }
 0xc0b   : > { %v1323_v52 = vsub.f32 1.0, %v3572_v40  ;;  %v1329_v56 = vmul.f32 %v3572_v40, %v3993_v27 }
 0xc61   : > { %v1314_v41 = vpop.permute.xlu1 %1313 }
 0xc62   : > { %v1316_v42 = vmul.f32 %v3572_v40, %v1314_v41 }
 0xc64   : > { %1318 = vrot.lane.b32.xlu0 %v1316_v42, %s3687_s26  ;;  %v3066_v42 = vsel %vm1587_vm12, 1.0, %v3685_v13 }
 0xc68   : > { %1345 = vperm.xlu0 %3538, %v1342_v46   ;;  %v1483_v46 = vld [vmem:[#allocation4 + $0x18] sm:$0xf] }
 0xc72   : > { %v4010_v51 = vpop.permute.xlu1 %1338 }
 0xcd6   : > { %v1319_v47 = vpop.permute.xlu0 %1318 }
 0xcd7   : > { %v1321_v48 = vadd.f32 %v1319_v47, %v1229_v35 }
 0xcd9   : > { %3573 = vtanh.f32 %v1321_v48 }
 0xce3   : > { %v3574_v49 = vpop.eup %3573 }
 0xce4   : > { %1325 = vrot.lane.b32.xlu1 %v3574_v49, %s3688_s29 }
 0xce7   : > { %v4013_v58 = vpop.permute.xlu0 %1345 }
 0xce8   : > { %v1348_v60 = vmul.f32 %v4013_v58, %v3993_v27 }
 0xd56   : > { %v1326_v53 = vpop.permute.xlu1 %1325 }
 0xd57   : > { %v1328_v57 = vmul.f32 %v1326_v53, %v1323_v52 }
 0xd59   : > { %v1330_v59 = vadd.f32 %v1329_v56, %v1328_v57 }
 0xd5b   : > { %v1341_v61 = vmul.f32 %v4010_v51, %v1330_v59  ;;  %v1596_v59 = vsub.f32 1.0, %v3066_v42 }
 0xd5d   : > { %v4018_v62 = vadd.f32 %v1348_v60, %v1341_v61 }
 0xd5f   : > { %1358 = vrot.lane.b32.xlu0 %v4018_v62, %s3688_s29  ;;  %v1350_v38 = vmul.f32 %v4018_v62, %v4010_v51 }
 0xdd1   : > { %v1359_v63 = vpop.permute.xlu0 %1358 }
 0xdd2   : > { %3264 = vmatmul.mubr.msk.f32.vlgmr.msra.gmra.mrb[4].mxu0 %vm716_vm5, %v1359_v63 }
 0xdd3   : > { %3436 = vmatpush3.bf16.msra.mxu0 %v3852_v10  ;;  %3285 = vmatprep.mubr.msk.f32.mxu0 %vm3684_vm3, %v3685_v13  ;;  %v3063_v10 = vsel %vm1460_vm11, 1.0, %v3685_v13 }
 0xdd4   : > { %3437 = vmatprep.subr.bf16.mxu0 %v3682_v6  ;;  %v1469_v18 = vsub.f32 1.0, %v3063_v10 }
 0xdd7   : > { %3439 = vmatpush3.bf16.msra.mxu0 %v3867_v15 }
 0xdd8   : > { %3440 = vmatprep.subr.bf16.mxu0 %v3682_v6 }
 0xea5   : > { %v1428_v1 = vpop.f32.mrb[4].mxu0 }
 0xea6   : > { %v1429_v2 = vadd.f32 %v3902_v28, %v1428_v1  ;;  %v3265_v3 = vpop.f32.mrb[5].mxu0 }
 0xea8   : > { %1440 = vrot.lane.b32.xlu1 %v1429_v2, %s3687_s26  ;;  %v1432_v5 = vadd.f32 %v1429_v2, %v1356_v4 }
 0xeaa   : > { %v3062_v7 = vmul.f32 -1.442695, %v1432_v5 }
 0xeac   : > { %1465 = vperm.xlu1 %3537, %v3063_v10   ;;  %3575 = vpow2.f32 %v3062_v7 }
 0xeb6   : > { %v3576_v15 = vpop.eup %3575 }
 0xeb7   : > { %v1436_v8 = vadd.f32 1.0, %v3576_v15 }
 0xeb9   : > { %3577 = vrcp.f32 %v1436_v8 }
 0xec3   : > { %v3578_v9 = vpop.eup %3577 }
 0xec4   : > { %v1450_v26 = vsub.f32 1.0, %v3578_v9  ;;  %v1456_v30 = vmul.f32 %v3578_v9, %v4018_v62 }
 0xf1a   : > { %v1441_v14 = vpop.permute.xlu1 %1440 }
 0xf1b   : > { %v1443_v17 = vmul.f32 %v3578_v9, %v1441_v14  ;;  %v1713_v14 = vstv %s1712_s27 }
 0xf1c   : > { %vm1714_vm13 = vcmp.gt.s32.totalorder %v3860_v12, %v1713_v14  ;;  %v841_v12 = vmul.f32 %v3915_v54, %v3912_v45 }
 0xf1d   : > { %1445 = vrot.lane.b32.xlu0 %v1443_v17, %s3687_s26 }
 0xf21   : > { %1472 = vperm.xlu0 %3538, %v1469_v18  }
 0xf2b   : > { %v4036_v25 = vpop.permute.xlu1 %1465 }
 0xf8f   : > { %v1446_v20 = vpop.permute.xlu0 %1445 }
 0xf90   : > { %v1448_v21 = vadd.f32 %v1446_v20, %v1356_v4 }
 0xf92   : > { %3579 = vtanh.f32 %v1448_v21  ;;  %v3069_v21 = vsel %vm1714_vm13, 1.0, %v3685_v13 }
 0xf9c   : > { %v3580_v24 = vpop.eup %3579 }
 0xf9d   : > { %1452 = vrot.lane.b32.xlu1 %v3580_v24, %s3688_s29  ;;  %v1610_v24 = vld [vmem:[#allocation4 + $0x1c] sm:$0xf] }
 0xfa0   : > { %v4039_v32 = vpop.permute.xlu0 %1472 }
 0xfa1   : > { %v1475_v34 = vmul.f32 %v4039_v32, %v4018_v62  ;;  %v1830_v62 = vld [vmem:[%s3814_s16] sm:$0xff] }
0x100f   : > { %v1453_v29 = vpop.permute.xlu1 %1452 }
0x1010   : > { %v1455_v31 = vmul.f32 %v1453_v29, %v1450_v26 }
0x1012   : > { %v1457_v33 = vadd.f32 %v1456_v30, %v1455_v31 }
0x1014   : > { %v1468_v35 = vmul.f32 %v4036_v25, %v1457_v33 }
0x1016   : > { %v4044_v36 = vadd.f32 %v1475_v34, %v1468_v35 }
0x1018   : > { %1485 = vrot.lane.b32.xlu0 %v4044_v36, %s3688_s29 }
0x108a   : > { %v1486_v37 = vpop.permute.xlu0 %1485 }
0x108b   : > { %3275 = vmatmul.mubr.msk.f32.vlgmr.msra.gmra.mrb[10].mxu1 %vm716_vm5, %v1486_v37  ;;  %v1723_v37 = vsub.f32 1.0, %v3069_v21 }
0x115e   : > { %v1555_v39 = vpop.f32.mrb[10].mxu1 }
0x115f   : > { %v1556_v40 = vadd.f32 %v3902_v28, %v1555_v39  ;;  %v3276_v41 = vpop.f32.mrb[11].mxu1 }
0x1161   : > { %1567 = vrot.lane.b32.xlu1 %v1556_v40, %s3687_s26  ;;  %v1559_v47 = vadd.f32 %v1556_v40, %v1483_v46 }
0x1163   : > { %v3065_v48 = vmul.f32 -1.442695, %v1559_v47  ;;  %v1832_v47 = vld [vmem:[%s3814_s16 + $0x10] sm:$0xff] }
0x1165   : > { %1592 = vperm.xlu1 %3537, %v3066_v42   ;;  %3581 = vpow2.f32 %v3065_v48  ;;  %v1223_v48 = vmul.f32 %v3993_v27, %v3985_v16  ;;  %v4115_v27 = vld [vmem:[#allocation2 + $0x4] sm:$0xf] }
0x116f   : > { %v3582_v49 = vpop.eup %3581 }
0x1170   : > { %v1563_v52 = vadd.f32 1.0, %v3582_v49 }
0x1172   : > { %3583 = vrcp.f32 %v1563_v52  ;;  %v1833_v52 = vld [vmem:[%s3814_s16 + $0x18] sm:$0xff] }
0x117c   : > { %v3584_v53 = vpop.eup %3583 }
0x117d   : > { %v1577_v1 = vsub.f32 1.0, %v3584_v53  ;;  %v1583_v3 = vmul.f32 %v3584_v53, %v4044_v36 }
0x11d3   : > { %v1568_v56 = vpop.permute.xlu1 %1567 }
0x11d4   : > { %v1570_v57 = vmul.f32 %v3584_v53, %v1568_v56  ;;  %v1477_v56 = vmul.f32 %v4044_v36, %v4036_v25 }
0x11d6   : > { %1572 = vrot.lane.b32.xlu0 %v1570_v57, %s3687_s26 }
0x11da   : > { %1599 = vperm.xlu0 %3538, %v1596_v59  }
0x11e4   : > { %v4056_v0 = vpop.permute.xlu1 %1592 }
0x1248   : > { %v1573_v60 = vpop.permute.xlu0 %1572 }
0x1249   : > { %v1575_v61 = vadd.f32 %v1573_v60, %v1483_v46  ;;  %v1831_v46 = vld [vmem:[%s3814_s16 + $0x8] sm:$0xff] }
0x124a   : > { %v4100_v49 = vpack.c.bf16 %v1831_v46, %v1830_v62 }
0x124b   : > { %3585 = vtanh.f32 %v1575_v61  ;;  %v3541_v61 = vld [vmem:[%s3819_s15] sm:$0xff]  }
0x124c   : > { %3288 = vmatprep.subr.bf16.mxu1 %v3541_v61 }
0x124d   : > { %3289 = vmatpush3.bf16.msra.mxu1 %v3541_v61 }
0x1255   : > { %v3586_v63 = vpop.eup %3585 }
0x1256   : > { %1579 = vrot.lane.b32.xlu1 %v3586_v63, %s3688_s29  ;;  %v3542_v63 = vld [vmem:[%s3819_s15 + $0x8] sm:$0xff]  }
0x1257   : > { %3290 = vmatprep.subr.bf16.mxu1 %v3542_v63 }
0x1258   : > { %3291 = vmatpush3.bf16.msra.mxu1 %v3542_v63 }
0x1259   : > { %v4059_v4 = vpop.permute.xlu0 %1599  ;;  %3446 = vmatprep.subr.bf16.mxu1 %v3682_v6 }
0x125a   : > { %v1602_v7 = vmul.f32 %v4059_v4, %v4044_v36 }
0x12c8   : > { %v1580_v2 = vpop.permute.xlu1 %1579 }
0x12c9   : > { %v1582_v10 = vmul.f32 %v1580_v2, %v1577_v1 }
0x12cb   : > { %v1584_v5 = vadd.f32 %v1583_v3, %v1582_v10 }
0x12cd   : > { %v1595_v15 = vmul.f32 %v4056_v0, %v1584_v5 }
0x12cf   : > { %v4064_v8 = vadd.f32 %v1602_v7, %v1595_v15 }
0x12d1   : > { %1612 = vrot.lane.b32.xlu0 %v4064_v8, %s3688_s29  ;;  %v1604_v39 = vmul.f32 %v4064_v8, %v4056_v0 }
0x1343   : > { %v1613_v9 = vpop.permute.xlu0 %1612 }
0x1344   : > { %3286 = vmatmul.mubr.msk.f32.vlgmr.msra.gmra.mrb[6].mxu0 %vm716_vm5, %v1613_v9 }
0x1345   : > { %3304 = vmatprep.mubr.msk.f32.mxu0 %vm3684_vm3, %v3685_v13  ;;  %3442 = vmatpush3.bf16.msra.mxu0 %v4100_v49 }
0x1346   : > { %3443 = vmatprep.subr.bf16.mxu0 %v3682_v6 }
0x1417   : > { %v1682_v17 = vpop.f32.mrb[6].mxu0 }
0x1418   : > { %v1683_v18 = vadd.f32 %v3902_v28, %v1682_v17  ;;  %v3287_v20 = vpop.f32.mrb[7].mxu0  ;;  %v1096_v28 = vmul.f32 %v3967_v55, %v3959_v44  ;;  %v969_v55 = vmul.f32 %v3941_v23, %v3936_v19  ;;  %v4106_v23 = vpack.c.bf16 %v1833_v52, %v1832_v47 }
0x141a   : > { %1694 = vrot.lane.b32.xlu1 %v1683_v18, %s3687_s26  ;;  %v1686_v26 = vadd.f32 %v1683_v18, %v1610_v24  ;;  %3445 = vmatpush3.bf16.msra.mxu0 %v4106_v23 }
0x141b   : > { %3452 = vmatprep.subr.bf16.mxu0 %v3682_v6 }
0x141c   : > { %v3068_v29 = vmul.f32 -1.442695, %v1686_v26  ;;  %v4150_v26 = vld [vmem:[%s587_s0] ss:$0 sm:$0xff] }
0x141d   : > { %3305 = vmatmul.mubr.msk.f32.vlgmr.msra.gmra.mrb[8].mxu0 %vm716_vm5, %v4115_v27 }
0x141e   : > { %1719 = vperm.xlu1 %3537, %v3069_v21   ;;  %3587 = vpow2.f32 %v3068_v29  ;;  %3454 = vmatpush3.bf16.msra.mxu0 %v4100_v49 }
0x141f   : > { %3326 = vmatprep.mubr.msk.f32.mxu0 %vm3684_vm3, %v3685_v13  ;;  %3455 = vmatprep.subr.bf16.mxu0 %v3682_v6 }
0x1422   : > { %3457 = vmatpush3.bf16.msra.mxu0 %v4106_v23 }
0x1423   : > { %3464 = vmatprep.subr.bf16.mxu0 %v3682_v6 }
0x1428   : > { %v3588_v30 = vpop.eup %3587 }
0x1429   : > { %v1690_v31 = vadd.f32 1.0, %v3588_v30 }
0x142b   : > { %3589 = vrcp.f32 %v1690_v31 }
0x1435   : > { %v3590_v33 = vpop.eup %3589 }
0x1436   : > { %v1704_v1 = vsub.f32 1.0, %v3590_v33  ;;  %v1710_v3 = vmul.f32 %v3590_v33, %v4064_v8 }
0x148c   : > { %v1695_v34 = vpop.permute.xlu1 %1694 }
0x148d   : > { %v1697_v35 = vmul.f32 %v3590_v33, %v1695_v34 }
0x148f   : > { %1699 = vrot.lane.b32.xlu0 %v1697_v35, %s3687_s26 }
0x1493   : > { %1726 = vperm.xlu0 %3538, %v1723_v37  }
0x1497   : > { %843 = vrot.lane.b32.xlu0 %v841_v12, %s3688_s29  ;;  %v3070_v12 = vld [vmem:[%s584_s23] ss:$0 sm:$0xff] }
0x149b   : > { %1098 = vrot.lane.b32.xlu0 %v1096_v28, %s3688_s29 }
0x149d   : > { %v4127_v60 = vpop.permute.xlu1 %1719 }
0x149f   : > { %1352 = vrot.lane.b32.xlu0 %v1350_v38, %s3688_s29 }
0x14a3   : > { %1606 = vrot.lane.b32.xlu0 %v1604_v39, %s3688_s29 }
0x14f0   : > { %v1913_v29 = vpop.f32.mrb[8].mxu0 }
0x14f1   : > { %v1914_v30 = vadd.f32 %v4150_v26, %v1913_v29  ;;  %v3306_v31 = vpop.f32.mrb[9].mxu0 }
0x14f3   : > { %1925 = vrot.lane.b32.xlu0 %v1914_v30, %s3687_s26 }
0x1501   : > { %v1700_v54 = vpop.permute.xlu0 %1699 }
0x1502   : > { %v1702_v40 = vadd.f32 %v1700_v54, %v1610_v24 }
0x1504   : > { %3591 = vtanh.f32 %v1702_v40 }
0x150e   : > { %v3592_v41 = vpop.eup %3591 }
0x150f   : > { %1706 = vrot.lane.b32.xlu1 %v3592_v41, %s3688_s29 }
0x1512   : > { %v4092_v42 = vpop.permute.xlu0 %1726 }
0x1513   : > { %971 = vrot.lane.b32.xlu1 %v969_v55, %s3688_s29  ;;  %v1729_v15 = vmul.f32 %v4092_v42, %v4064_v8 }
0x1516   : > { %v844_v53 = vpop.permute.xlu0 %843 }
0x1517   : > { %847 = vst.msk [vmem:[#allocation3] sm:$0xf] %vm846_vm14, %v844_v53  ;;  %1225 = vrot.lane.b32.xlu1 %v1223_v48, %s3688_s29 }
0x151a   : > { %v1099_v57 = vpop.permute.xlu0 %1098 }
0x151b   : > { %1101 = vst.msk [vmem:[#allocation3 + $0x8] sm:$0xf] %vm846_vm14, %v1099_v57  ;;  %1479 = vrot.lane.b32.xlu1 %v1477_v56, %s3688_s29 }
0x151e   : > { %v1353_v59 = vpop.permute.xlu0 %1352 }
0x151f   : > { %1355 = vst.msk [vmem:[#allocation3 + $0x10] sm:$0xf] %vm846_vm14, %v1353_v59 }
0x1522   : > { %v1607_v36 = vpop.permute.xlu0 %1606 }
0x1523   : > { %1609 = vst.msk [vmem:[#allocation3 + $0x18] sm:$0xf] %vm846_vm14, %v1607_v36 }
0x1565   : > { %v1926_v56 = vpop.permute.xlu0 %1925 }
0x1581   : > { %v1707_v2 = vpop.permute.xlu1 %1706 }
0x1582   : > { %v1709_v10 = vmul.f32 %v1707_v2, %v1704_v1  ;;  %v1947_v1 = vmul.f32 %v4115_v27, %v3907_v43 }
0x1584   : > { %v1711_v5 = vadd.f32 %v1710_v3, %v1709_v10 }
0x1585   : > { %v972_v7 = vpop.permute.xlu1 %971 }
0x1586   : > { %v1722_v9 = vmul.f32 %v4127_v60, %v1711_v5  ;;  %974 = vst.msk [vmem:[#allocation3 + $0x4] sm:$0xf] %vm846_vm14, %v972_v7 }
0x1588   : > { %v4137_v14 = vadd.f32 %v1729_v15, %v1722_v9 }
0x1589   : > { %v1226_v17 = vpop.permute.xlu1 %1225 }
0x158a   : > { %1228 = vst.msk [vmem:[#allocation3 + $0xc] sm:$0xf] %vm846_vm14, %v1226_v17  ;;  %v1731_v18 = vmul.f32 %v4137_v14, %v4127_v60 }
0x158c   : > { %1733 = vrot.lane.b32.xlu1 %v1731_v18, %s3688_s29 }
0x158d   : > { %v1480_v20 = vpop.permute.xlu1 %1479  ;;  %v1742_v8 = vld [vmem:[#allocation3] sm:$0xff] }
0x158e   : > { %1482 = vst.msk [vmem:[#allocation3 + $0x14] sm:$0xf] %vm846_vm14, %v1480_v20 }
0x1591   : > { %v1743_v21 = vld [vmem:[#allocation3 + $0x8] sm:$0xff] }
0x1592   : > { %v1746_v24 = vpack.c.bf16 %v1743_v21, %v1742_v8 }
0x1594   : > { %3292 = vmatprep.mubr.msk.bf16.mxu1 %vm716_vm5, %v1746_v24 }
0x1595   : > { %v1744_v34 = vld [vmem:[#allocation3 + $0x10] sm:$0xff] }
0x15fe   : > { %v1734_v33 = vpop.permute.xlu1 %1733 }
0x15ff   : > { %1736 = vst.msk [vmem:[#allocation3 + $0x1c] sm:$0xf] %vm846_vm14, %v1734_v33 }
0x1606   : > { %v1745_v35 = vld [vmem:[#allocation3 + $0x18] sm:$0xff] }
0x1607   : > { %v1747_v37 = vpack.c.bf16 %v1745_v35, %v1744_v34 }
0x1609   : > { %3293 = vmatmul.mubr.msk.bf16.vlgmr.msra.gmra.mrb[12].mxu1 %vm716_vm5, %v1747_v37 }
0x160a   : > { %3448 = vmatpush3.bf16.msra.mxu1 %v4100_v49  ;;  %3315 = vmatprep.mubr.msk.f32.mxu1 %vm3684_vm3, %v3685_v13 }
0x160b   : > { %3449 = vmatprep.subr.bf16.mxu1 %v3682_v6 }
0x160e   : > { %3451 = vmatpush3.bf16.msra.mxu1 %v4106_v23 }
0x160f   : > { %3458 = vmatprep.subr.bf16.mxu1 %v3682_v6 }
0x16dc   : > { %v3294_v28 = vpop.f32.mrb[12].mxu1 }
0x16dd   : > { %v1820_v38 = vadd.f32 %v3294_v28, %v3070_v12  ;;  %v1811_v39 = vpop.f32.mrb[13].mxu1 }
0x16de   : > { %v1812_v54 = vadd.f32 %v3070_v12, %v1811_v39  ;;  %v3295_v40 = vpop.f32.mrb[14].mxu1 }
0x16df   : > { %1828 = vst.msk [vmem:[#allocation4 + $0x10] sm:$0xff] %vm698_vm6, %v1820_v38  ;;  %v1823_v41 = vadd.f32 %v3295_v40, %v3070_v12  ;;  %v1814_v55 = vpop.f32.mrb[15].mxu1 }
0x16e0   : > { %1826 = vst.msk [vmem:[#allocation4] sm:$0xff] %vm698_vm6, %v1812_v54  ;;  %v1815_v62 = vadd.f32 %v3070_v12, %v1814_v55 }
0x16e1   : > { %1829 = vst.msk [vmem:[#allocation4 + $0x18] sm:$0xff] %vm698_vm6, %v1823_v41 }
0x16e2   : > { %1827 = vst.msk [vmem:[#allocation4 + $0x8] sm:$0xff] %vm698_vm6, %v1815_v62 }
0x16e7   : > { %v1843_v46 = vld [vmem:[#allocation4] sm:$0xf]  ;;  %v1959_v21 = vld [vmem:[#allocation4 + $0x4] sm:$0xf] }
0x16e8   : > { %v1917_v47 = vadd.f32 %v1914_v30, %v1843_v46 }
0x16ea   : > { %v3077_v48 = vmul.f32 -1.442695, %v1917_v47 }
0x16ec   : > { %3593 = vpow2.f32 %v3077_v48 }
0x16f6   : > { %v3594_v52 = vpop.eup %3593 }
0x16f7   : > { %v1921_v53 = vadd.f32 1.0, %v3594_v52 }
0x16f9   : > { %3595 = vrcp.f32 %v1921_v53  ;;  %v2070_v53 = vld [vmem:[#allocation4 + $0x8] sm:$0xf] }
0x1703   : > { %v3596_v57 = vpop.eup %3595 }
0x1704   : > { %v1928_v59 = vmul.f32 %v3596_v57, %v1926_v56  ;;  %v1935_v3 = vsub.f32 1.0, %v3596_v57 }
0x1706   : > { %1930 = vrot.lane.b32.xlu1 %v1928_v59, %s3687_s26 }
0x170a   : > { %1941 = vrot.lane.b32.xlu1 %v4115_v27, %s3686_s25 }
0x1778   : > { %v1931_v36 = vpop.permute.xlu1 %1930 }
0x1779   : > { %v1933_v61 = vadd.f32 %v1931_v36, %v1843_v46 }
0x177b   : > { %3597 = vtanh.f32 %v1933_v61 }
0x177c   : > { %v1942_v2 = vpop.permute.xlu1 %1941 }
0x177d   : > { %v1944_v5 = vmul.f32 %v3596_v57, %v1942_v2 }
0x1785   : > { %v3598_v63 = vpop.eup %3597 }
0x1786   : > { %1937 = vrot.lane.b32.xlu0 %v3598_v63, %s3688_s29 }
0x178a   : > { %1949 = vrot.lane.b32.xlu0 %v1947_v1, %s3686_s25 }
0x17f8   : > { %v1938_v10 = vpop.permute.xlu0 %1937 }
0x17f9   : > { %v1940_v7 = vmul.f32 %v1938_v10, %v1935_v3 }
0x17fb   : > { %v1945_v15 = vadd.f32 %v1944_v5, %v1940_v7 }
0x17fc   : > { %v1950_v17 = vpop.permute.xlu0 %1949 }
0x17fd   : > { %v1946_v9 = vmul.f32 %v1945_v15, %v3912_v45 }
0x17ff   : > { %v4179_v18 = vadd.f32 %v1950_v17, %v1946_v9 }
0x1801   : > { %1961 = vrot.lane.b32.xlu1 %v4179_v18, %s3688_s29  ;;  %v2062_v62 = vmul.f32 %v4179_v18, %v3933_v11 }
0x1873   : > { %v1962_v20 = vpop.permute.xlu1 %1961 }
0x1874   : > { %3316 = vmatmul.mubr.msk.f32.vlgmr.msra.gmra.mrb[16].mxu1 %vm716_vm5, %v1962_v20 }
0x1875   : > { %3460 = vmatpush3.bf16.msra.mxu1 %v4100_v49  ;;  %3337 = vmatprep.mubr.msk.f32.mxu1 %vm3684_vm3, %v3685_v13 }
0x1876   : > { %3461 = vmatprep.subr.bf16.mxu1 %v3682_v6 }
0x1879   : > { %3463 = vmatpush3.bf16.msra.mxu1 %v4106_v23 }
0x187a   : > { %3470 = vmatprep.subr.bf16.mxu1 %v3682_v6 }
0x1947   : > { %v2031_v43 = vpop.f32.mrb[16].mxu1 }
0x1948   : > { %v2032_v27 = vadd.f32 %v4150_v26, %v2031_v43  ;;  %v3317_v8 = vpop.f32.mrb[17].mxu1 }
0x194a   : > { %2043 = vrot.lane.b32.xlu0 %v2032_v27, %s3687_s26  ;;  %v2035_v24 = vadd.f32 %v2032_v27, %v1959_v21 }
0x194c   : > { %v3079_v29 = vmul.f32 -1.442695, %v2035_v24 }
0x194e   : > { %3599 = vpow2.f32 %v3079_v29  ;;  %v2181_v29 = vld [vmem:[#allocation4 + $0xc] sm:$0xf] }
0x1958   : > { %v3600_v30 = vpop.eup %3599 }
0x1959   : > { %v2039_v31 = vadd.f32 1.0, %v3600_v30 }
0x195b   : > { %3601 = vrcp.f32 %v2039_v31 }
0x1965   : > { %v3602_v33 = vpop.eup %3601 }
0x1966   : > { %v2053_v38 = vsub.f32 1.0, %v3602_v33  ;;  %v2059_v54 = vmul.f32 %v3602_v33, %v4179_v18 }
0x19bc   : > { %v2044_v34 = vpop.permute.xlu0 %2043 }
0x19bd   : > { %v2046_v35 = vmul.f32 %v3602_v33, %v2044_v34 }
0x19bf   : > { %2048 = vrot.lane.b32.xlu1 %v2046_v35, %s3687_s26 }
0x1a31   : > { %v2049_v37 = vpop.permute.xlu1 %2048 }
0x1a32   : > { %v2051_v12 = vadd.f32 %v2049_v37, %v1959_v21 }
0x1a34   : > { %3603 = vtanh.f32 %v2051_v12 }
0x1a3e   : > { %v3604_v28 = vpop.eup %3603 }
0x1a3f   : > { %2055 = vrot.lane.b32.xlu0 %v3604_v28, %s3688_s29 }
0x1ab1   : > { %v2056_v39 = vpop.permute.xlu0 %2055 }
0x1ab2   : > { %v2058_v40 = vmul.f32 %v2056_v39, %v2053_v38 }
0x1ab4   : > { %v2060_v41 = vadd.f32 %v2059_v54, %v2058_v40 }
0x1ab6   : > { %v2061_v55 = vmul.f32 %v2060_v41, %v3936_v19 }
0x1ab8   : > { %v4198_v46 = vadd.f32 %v2062_v62, %v2061_v55 }
0x1aba   : > { %2072 = vrot.lane.b32.xlu1 %v4198_v46, %s3688_s29  ;;  %v2173_v43 = vmul.f32 %v4198_v46, %v3962_v50 }
0x1b2c   : > { %v2073_v47 = vpop.permute.xlu1 %2072 }
0x1b2d   : > { %3327 = vmatmul.mubr.msk.f32.vlgmr.msra.gmra.mrb[10].mxu0 %vm716_vm5, %v2073_v47 }
0x1b2e   : > { %3466 = vmatpush3.bf16.msra.mxu0 %v4100_v49  ;;  %3348 = vmatprep.mubr.msk.f32.mxu0 %vm3684_vm3, %v3685_v13 }
0x1b2f   : > { %3467 = vmatprep.subr.bf16.mxu0 %v3682_v6 }
0x1b32   : > { %3469 = vmatpush3.bf16.msra.mxu0 %v4106_v23 }
0x1b33   : > { %3476 = vmatprep.subr.bf16.mxu0 %v3682_v6 }
0x1c00   : > { %v2142_v11 = vpop.f32.mrb[10].mxu0 }
0x1c01   : > { %v2143_v48 = vadd.f32 %v4150_v26, %v2142_v11  ;;  %v3328_v52 = vpop.f32.mrb[11].mxu0 }
0x1c03   : > { %2154 = vrot.lane.b32.xlu0 %v2143_v48, %s3687_s26  ;;  %v2146_v56 = vadd.f32 %v2143_v48, %v2070_v53 }
0x1c05   : > { %v3081_v57 = vmul.f32 -1.442695, %v2146_v56 }
0x1c07   : > { %3605 = vpow2.f32 %v3081_v57  ;;  %v2292_v57 = vld [vmem:[#allocation4 + $0x10] sm:$0xf] }
0x1c11   : > { %v3606_v59 = vpop.eup %3605 }
0x1c12   : > { %v2150_v36 = vadd.f32 1.0, %v3606_v59 }
0x1c14   : > { %3607 = vrcp.f32 %v2150_v36 }
0x1c1e   : > { %v3608_v61 = vpop.eup %3607 }
0x1c1f   : > { %v2164_v5 = vsub.f32 1.0, %v3608_v61  ;;  %v2170_v15 = vmul.f32 %v3608_v61, %v4198_v46 }
0x1c75   : > { %v2155_v63 = vpop.permute.xlu0 %2154 }
0x1c76   : > { %v2157_v1 = vmul.f32 %v3608_v61, %v2155_v63 }
0x1c78   : > { %2159 = vrot.lane.b32.xlu1 %v2157_v1, %s3687_s26 }
0x1cea   : > { %v2160_v2 = vpop.permute.xlu1 %2159 }
0x1ceb   : > { %v2162_v3 = vadd.f32 %v2160_v2, %v2070_v53 }
0x1ced   : > { %3609 = vtanh.f32 %v2162_v3 }
0x1cf7   : > { %v3610_v10 = vpop.eup %3609 }
0x1cf8   : > { %2166 = vrot.lane.b32.xlu0 %v3610_v10, %s3688_s29 }
0x1d6a   : > { %v2167_v7 = vpop.permute.xlu0 %2166 }
0x1d6b   : > { %v2169_v9 = vmul.f32 %v2167_v7, %v2164_v5 }
0x1d6d   : > { %v2171_v17 = vadd.f32 %v2170_v15, %v2169_v9 }
0x1d6f   : > { %v2172_v20 = vmul.f32 %v2171_v17, %v3959_v44 }
0x1d71   : > { %v4217_v27 = vadd.f32 %v2173_v43, %v2172_v20 }
0x1d73   : > { %2183 = vrot.lane.b32.xlu1 %v4217_v27, %s3688_s29  ;;  %v2284_v11 = vmul.f32 %v4217_v27, %v3988_v22 }
0x1de5   : > { %v2184_v8 = vpop.permute.xlu1 %2183 }
0x1de6   : > { %3338 = vmatmul.mubr.msk.f32.vlgmr.msra.gmra.mrb[18].mxu1 %vm716_vm5, %v2184_v8 }
0x1de7   : > { %3472 = vmatpush3.bf16.msra.mxu1 %v4100_v49  ;;  %3359 = vmatprep.mubr.msk.f32.mxu1 %vm3684_vm3, %v3685_v13 }
0x1de8   : > { %3473 = vmatprep.subr.bf16.mxu1 %v3682_v6 }
0x1deb   : > { %3475 = vmatpush3.bf16.msra.mxu1 %v4106_v23 }
0x1dec   : > { %3482 = vmatprep.subr.bf16.mxu1 %v3682_v6 }
0x1eb9   : > { %v2253_v50 = vpop.f32.mrb[18].mxu1 }
0x1eba   : > { %v2254_v21 = vadd.f32 %v4150_v26, %v2253_v50  ;;  %v3339_v24 = vpop.f32.mrb[19].mxu1 }
0x1ebc   : > { %2265 = vrot.lane.b32.xlu0 %v2254_v21, %s3687_s26  ;;  %v2257_v30 = vadd.f32 %v2254_v21, %v2181_v29 }
0x1ebe   : > { %v3083_v31 = vmul.f32 -1.442695, %v2257_v30 }
0x1ec0   : > { %3611 = vpow2.f32 %v3083_v31  ;;  %v2403_v31 = vld [vmem:[#allocation4 + $0x14] sm:$0xf] }
0x1eca   : > { %v3612_v33 = vpop.eup %3611 }
0x1ecb   : > { %v2261_v34 = vadd.f32 1.0, %v3612_v33 }
0x1ecd   : > { %3613 = vrcp.f32 %v2261_v34 }
0x1ed7   : > { %v3614_v35 = vpop.eup %3613 }
0x1ed8   : > { %v2275_v54 = vsub.f32 1.0, %v3614_v35  ;;  %v2281_v41 = vmul.f32 %v3614_v35, %v4217_v27 }
0x1f2e   : > { %v2266_v37 = vpop.permute.xlu0 %2265 }
0x1f2f   : > { %v2268_v12 = vmul.f32 %v3614_v35, %v2266_v37 }
0x1f31   : > { %2270 = vrot.lane.b32.xlu1 %v2268_v12, %s3687_s26 }
0x1fa3   : > { %v2271_v28 = vpop.permute.xlu1 %2270 }
0x1fa4   : > { %v2273_v38 = vadd.f32 %v2271_v28, %v2181_v29 }
0x1fa6   : > { %3615 = vtanh.f32 %v2273_v38 }
0x1fb0   : > { %v3616_v39 = vpop.eup %3615 }
0x1fb1   : > { %2277 = vrot.lane.b32.xlu0 %v3616_v39, %s3688_s29 }
0x2023   : > { %v2278_v40 = vpop.permute.xlu0 %2277 }
0x2024   : > { %v2280_v55 = vmul.f32 %v2278_v40, %v2275_v54 }
0x2026   : > { %v2282_v62 = vadd.f32 %v2281_v41, %v2280_v55 }
0x2028   : > { %v2283_v47 = vmul.f32 %v2282_v62, %v3985_v16 }
0x202a   : > { %v4236_v48 = vadd.f32 %v2284_v11, %v2283_v47 }
0x202c   : > { %2294 = vrot.lane.b32.xlu1 %v4236_v48, %s3688_s29  ;;  %v2395_v50 = vmul.f32 %v4236_v48, %v4013_v58 }
0x209e   : > { %v2295_v52 = vpop.permute.xlu1 %2294 }
0x209f   : > { %3349 = vmatmul.mubr.msk.f32.vlgmr.msra.gmra.mrb[12].mxu0 %vm716_vm5, %v2295_v52 }
0x20a0   : > { %3478 = vmatpush3.bf16.msra.mxu0 %v4100_v49  ;;  %3370 = vmatprep.mubr.msk.f32.mxu0 %vm3684_vm3, %v3685_v13 }
0x20a1   : > { %3479 = vmatprep.subr.bf16.mxu0 %v3682_v6 }
0x20a4   : > { %3481 = vmatpush3.bf16.msra.mxu0 %v4106_v23 }
0x2172   : > { %v2364_v53 = vpop.f32.mrb[12].mxu0 }
0x2173   : > { %v2365_v22 = vadd.f32 %v4150_v26, %v2364_v53  ;;  %v3350_v56 = vpop.f32.mrb[13].mxu0 }
0x2174   : > { %v2514_v56 = vld [vmem:[#allocation4 + $0x18] sm:$0xf] }
0x2175   : > { %2376 = vrot.lane.b32.xlu0 %v2365_v22, %s3687_s26  ;;  %v2368_v59 = vadd.f32 %v2365_v22, %v2292_v57 }
0x2177   : > { %v3085_v36 = vmul.f32 -1.442695, %v2368_v59 }
0x2179   : > { %3617 = vpow2.f32 %v3085_v36 }
0x2183   : > { %v3618_v61 = vpop.eup %3617 }
0x2184   : > { %v2372_v63 = vadd.f32 1.0, %v3618_v61 }
0x2186   : > { %3619 = vrcp.f32 %v2372_v63 }
0x2190   : > { %v3620_v1 = vpop.eup %3619 }
0x2191   : > { %v2386_v15 = vsub.f32 1.0, %v3620_v1  ;;  %v2392_v17 = vmul.f32 %v3620_v1, %v4236_v48 }
0x21e7   : > { %v2377_v2 = vpop.permute.xlu0 %2376 }
0x21e8   : > { %v2379_v3 = vmul.f32 %v3620_v1, %v2377_v2 }
0x21ea   : > { %2381 = vrot.lane.b32.xlu1 %v2379_v3, %s3687_s26 }
0x225c   : > { %v2382_v10 = vpop.permute.xlu1 %2381 }
0x225d   : > { %v2384_v5 = vadd.f32 %v2382_v10, %v2292_v57 }
0x225f   : > { %3621 = vtanh.f32 %v2384_v5 }
0x2269   : > { %v3622_v7 = vpop.eup %3621 }
0x226a   : > { %2388 = vrot.lane.b32.xlu0 %v3622_v7, %s3688_s29 }
0x22dc   : > { %v2389_v9 = vpop.permute.xlu0 %2388 }
0x22dd   : > { %v2391_v20 = vmul.f32 %v2389_v9, %v2386_v15 }
0x22df   : > { %v2393_v43 = vadd.f32 %v2392_v17, %v2391_v20 }
0x22e1   : > { %v2394_v8 = vmul.f32 %v2393_v43, %v4010_v51 }
0x22e3   : > { %v4254_v21 = vadd.f32 %v2395_v50, %v2394_v8 }
0x22e5   : > { %2405 = vrot.lane.b32.xlu1 %v4254_v21, %s3688_s29  ;;  %v2506_v62 = vmul.f32 %v4254_v21, %v4039_v32 }
0x2357   : > { %v2406_v24 = vpop.permute.xlu1 %2405 }
0x2358   : > { %3360 = vmatmul.mubr.msk.f32.vlgmr.msra.gmra.mrb[20].mxu1 %vm716_vm5, %v2406_v24 }
0x2359   : > { %3484 = vmatpush3.bf16.msra.mxu1 %v4100_v49  ;;  %3381 = vmatprep.mubr.msk.f32.mxu1 %vm3684_vm3, %v3685_v13 }
0x235a   : > { %3485 = vmatprep.subr.bf16.mxu1 %v3682_v6 }
0x235d   : > { %3487 = vmatpush3.bf16.msra.mxu1 %v4106_v23 }
0x242b   : > { %v2475_v29 = vpop.f32.mrb[20].mxu1 }
0x242c   : > { %v2476_v58 = vadd.f32 %v4150_v26, %v2475_v29  ;;  %v3361_v30 = vpop.f32.mrb[21].mxu1 }
0x242d   : > { %v2625_v30 = vld [vmem:[#allocation4 + $0x1c] sm:$0xf] }
0x242e   : > { %2487 = vrot.lane.b32.xlu0 %v2476_v58, %s3687_s26  ;;  %v2479_v33 = vadd.f32 %v2476_v58, %v2403_v31 }
0x2430   : > { %v3087_v34 = vmul.f32 -1.442695, %v2479_v33 }
0x2432   : > { %3623 = vpow2.f32 %v3087_v34 }
0x243c   : > { %v3624_v35 = vpop.eup %3623 }
0x243d   : > { %v2483_v37 = vadd.f32 1.0, %v3624_v35 }
0x243f   : > { %3625 = vrcp.f32 %v2483_v37 }
0x2449   : > { %v3626_v49 = vpop.eup %3625 }
0x244a   : > { %v2497_v38 = vsub.f32 1.0, %v3626_v49  ;;  %v2503_v54 = vmul.f32 %v3626_v49, %v4254_v21 }
0x24a0   : > { %v2488_v12 = vpop.permute.xlu0 %2487 }
0x24a1   : > { %v2490_v13 = vmul.f32 %v3626_v49, %v2488_v12  ;;  %v1953_v12 = vmul.f32 %v4179_v18, %v3912_v45 }
0x24a3   : > { %2492 = vrot.lane.b32.xlu1 %v2490_v13, %s3687_s26  ;;  %v2397_v13 = vmul.f32 %v4254_v21, %v4010_v51 }
0x2515   : > { %v2493_v6 = vpop.permute.xlu1 %2492 }
0x2516   : > { %v2495_v23 = vadd.f32 %v2493_v6, %v2403_v31 }
0x2518   : > { %3627 = vtanh.f32 %v2495_v23 }
0x2522   : > { %v3628_v28 = vpop.eup %3627 }
0x2523   : > { %2499 = vrot.lane.b32.xlu0 %v3628_v28, %s3688_s29  ;;  %v2286_v28 = vmul.f32 %v4236_v48, %v3985_v16 }
0x2595   : > { %v2500_v39 = vpop.permute.xlu0 %2499 }
0x2596   : > { %v2502_v40 = vmul.f32 %v2500_v39, %v2497_v38  ;;  %v3543_v39 = vld [vmem:[%s3832_s2] sm:$0xff]  }
0x2597   : > { %3384 = vmatprep.subr.bf16.mxu0 %v3543_v39 }
0x2598   : > { %v2504_v41 = vadd.f32 %v2503_v54, %v2502_v40 }
0x259a   : > { %v2505_v55 = vmul.f32 %v2504_v41, %v4036_v25  ;;  %v3544_v41 = vld [vmem:[%s3832_s2 + $0x8] sm:$0xff]  }
0x259c   : > { %v4272_v47 = vadd.f32 %v2506_v62, %v2505_v55 }
0x259e   : > { %2516 = vrot.lane.b32.xlu1 %v4272_v47, %s3688_s29  ;;  %v2617_v43 = vmul.f32 %v4272_v47, %v4059_v4  ;;  %v2508_v38 = vmul.f32 %v4272_v47, %v4036_v25 }
0x2610   : > { %v2517_v11 = vpop.permute.xlu1 %2516 }
0x2611   : > { %3371 = vmatmul.mubr.msk.f32.vlgmr.msra.gmra.mrb[14].mxu0 %vm716_vm5, %v2517_v11 }
0x2612   : > { %3385 = vmatpush3.bf16.msra.mxu0 %v3543_v39 }
0x2613   : > { %3386 = vmatprep.subr.bf16.mxu0 %v3544_v41 }
0x2616   : > { %3387 = vmatpush3.bf16.msra.mxu0 %v3544_v41 }
0x26e4   : > { %v2586_v52 = vpop.f32.mrb[14].mxu0 }
0x26e5   : > { %v2587_v53 = vadd.f32 %v4150_v26, %v2586_v52  ;;  %v3372_v22 = vpop.f32.mrb[15].mxu0 }
0x26e7   : > { %2598 = vrot.lane.b32.xlu0 %v2587_v53, %s3687_s26  ;;  %v2590_v57 = vadd.f32 %v2587_v53, %v2514_v56 }
0x26e9   : > { %v3089_v59 = vmul.f32 -1.442695, %v2590_v57 }
0x26eb   : > { %3629 = vpow2.f32 %v3089_v59 }
0x26f5   : > { %v3630_v36 = vpop.eup %3629 }
0x26f6   : > { %v2594_v32 = vadd.f32 1.0, %v3630_v36 }
0x26f8   : > { %3631 = vrcp.f32 %v2594_v32  ;;  %v3092_v32 = vld [vmem:[%s595_s14] ss:$0 sm:$0xff] }
0x2702   : > { %v3632_v61 = vpop.eup %3631 }
0x2703   : > { %v2608_v5 = vsub.f32 1.0, %v3632_v61  ;;  %v2614_v15 = vmul.f32 %v3632_v61, %v4272_v47 }
0x2759   : > { %v2599_v63 = vpop.permute.xlu0 %2598 }
0x275a   : > { %v2601_v1 = vmul.f32 %v3632_v61, %v2599_v63 }
0x275c   : > { %2603 = vrot.lane.b32.xlu1 %v2601_v1, %s3687_s26 }
0x27ce   : > { %v2604_v2 = vpop.permute.xlu1 %2603 }
0x27cf   : > { %v2606_v3 = vadd.f32 %v2604_v2, %v2514_v56 }
0x27d1   : > { %3633 = vtanh.f32 %v2606_v3 }
0x27db   : > { %v3634_v10 = vpop.eup %3633 }
0x27dc   : > { %2610 = vrot.lane.b32.xlu0 %v3634_v10, %s3688_s29 }
0x284e   : > { %v2611_v7 = vpop.permute.xlu0 %2610 }
0x284f   : > { %v2613_v9 = vmul.f32 %v2611_v7, %v2608_v5 }
0x2851   : > { %v2615_v17 = vadd.f32 %v2614_v15, %v2613_v9 }
0x2853   : > { %v2616_v20 = vmul.f32 %v2615_v17, %v4056_v0 }
0x2855   : > { %v2618_v8 = vadd.f32 %v2617_v43, %v2616_v20 }
0x2857   : > { %2627 = vrot.lane.b32.xlu1 %v2618_v8, %s3688_s29  ;;  %v2619_v6 = vmul.f32 %v2618_v8, %v4056_v0  ;;  %v2728_v48 = vmul.f32 %v2618_v8, %v4092_v42 }
0x28c9   : > { %v2628_v50 = vpop.permute.xlu1 %2627 }
0x28ca   : > { %3382 = vmatmul.mubr.msk.f32.vlgmr.msra.gmra.mrb[22].mxu1 %vm716_vm5, %v2628_v50 }
0x299d   : > { %v2697_v24 = vpop.f32.mrb[22].mxu1 }
0x299e   : > { %v2698_v29 = vadd.f32 %v4150_v26, %v2697_v24  ;;  %v3383_v58 = vpop.f32.mrb[23].mxu1  ;;  %v2175_v26 = vmul.f32 %v4217_v27, %v3959_v44 }
0x29a0   : > { %2709 = vrot.lane.b32.xlu0 %v2698_v29, %s3687_s26  ;;  %v2701_v31 = vadd.f32 %v2698_v29, %v2625_v30 }
0x29a2   : > { %v3091_v33 = vmul.f32 -1.442695, %v2701_v31 }
0x29a4   : > { %3635 = vpow2.f32 %v3091_v33 }
0x29ae   : > { %v3636_v34 = vpop.eup %3635 }
0x29af   : > { %v2705_v35 = vadd.f32 1.0, %v3636_v34 }
0x29b1   : > { %3637 = vrcp.f32 %v2705_v35 }
0x29bb   : > { %v3638_v4 = vpop.eup %3637 }
0x29bc   : > { %v2725_v54 = vmul.f32 %v3638_v4, %v2618_v8 }
0x2a12   : > { %v2710_v37 = vpop.permute.xlu0 %2709 }
0x2a13   : > { %v2712_v49 = vmul.f32 %v3638_v4, %v2710_v37 }
0x2a15   : > { %2714 = vrot.lane.b32.xlu1 %v2712_v49, %s3687_s26 }
0x2a19   : > { %1955 = vrot.lane.b32.xlu1 %v1953_v12, %s3688_s29 }
0x2a1d   : > { %2177 = vrot.lane.b32.xlu1 %v2175_v26, %s3688_s29 }
0x2a21   : > { %2399 = vrot.lane.b32.xlu1 %v2397_v13, %s3688_s29 }
0x2a25   : > { %2621 = vrot.lane.b32.xlu1 %v2619_v6, %s3688_s29 }
0x2a29   : > { %1738 = vrot.lane.b32.xlu1 %v4137_v14, %s3688_s29  ;;  %v2064_v14 = vmul.f32 %v4198_v46, %v3936_v19  ;;  %v2719_v19 = vsub.f32 1.0, %v3638_v4 }
0x2a87   : > { %v2715_v45 = vpop.permute.xlu1 %2714 }
0x2a88   : > { %v2717_v18 = vadd.f32 %v2715_v45, %v2625_v30 }
0x2a8a   : > { %3639 = vtanh.f32 %v2717_v18 }
0x2a8b   : > { %v1956_v23 = vpop.permute.xlu1 %1955 }
0x2a8c   : > { %1958 = vst.msk [vmem:[#allocation3] sm:$0xf] %vm846_vm14, %v1956_v23 }
0x2a8f   : > { %v2178_v44 = vpop.permute.xlu1 %2177 }
0x2a90   : > { %2180 = vst.msk [vmem:[#allocation3 + $0x8] sm:$0xf] %vm846_vm14, %v2178_v44 }
0x2a93   : > { %v2400_v51 = vpop.permute.xlu1 %2399 }
0x2a94   : > { %v3640_v27 = vpop.eup %3639  ;;  %2402 = vst.msk [vmem:[#allocation3 + $0x10] sm:$0xf] %vm846_vm14, %v2400_v51 }
0x2a95   : > { %2721 = vrot.lane.b32.xlu0 %v3640_v27, %s3688_s29 }
0x2a97   : > { %v2622_v0 = vpop.permute.xlu1 %2621 }
0x2a98   : > { %2624 = vst.msk [vmem:[#allocation3 + $0x18] sm:$0xf] %vm846_vm14, %v2622_v0 }
0x2a99   : > { %2066 = vrot.lane.b32.xlu0 %v2064_v14, %s3688_s29 }
0x2a9b   : > { %v1739_v21 = vpop.permute.xlu1 %1738 }
0x2a9c   : > { %1741 = vst.msk [vmem:[#allocation2] sm:$0xf] %vm846_vm14, %v1739_v21 }
0x2a9d   : > { %2288 = vrot.lane.b32.xlu0 %v2286_v28, %s3688_s29 }
0x2aa1   : > { %2510 = vrot.lane.b32.xlu0 %v2508_v38, %s3688_s29 }
0x2b07   : > { %v2722_v46 = vpop.permute.xlu0 %2721 }
0x2b08   : > { %v2724_v40 = vmul.f32 %v2722_v46, %v2719_v19 }
0x2b0a   : > { %v2726_v55 = vadd.f32 %v2725_v54, %v2724_v40 }
0x2b0b   : > { %v2067_v62 = vpop.permute.xlu0 %2066 }
0x2b0c   : > { %v2727_v16 = vmul.f32 %v2726_v55, %v4127_v60  ;;  %2069 = vst.msk [vmem:[#allocation3 + $0x4] sm:$0xf] %vm846_vm14, %v2067_v62 }
0x2b0e   : > { %v2729_v25 = vadd.f32 %v2728_v48, %v2727_v16 }
0x2b0f   : > { %v2289_v47 = vpop.permute.xlu0 %2288 }
0x2b10   : > { %2291 = vst.msk [vmem:[#allocation3 + $0xc] sm:$0xf] %vm846_vm14, %v2289_v47  ;;  %v2730_v11 = vmul.f32 %v2729_v25, %v4127_v60 }
0x2b12   : > { %2732 = vrot.lane.b32.xlu0 %v2730_v11, %s3688_s29 }
0x2b13   : > { %v2511_v52 = vpop.permute.xlu0 %2510  ;;  %v2741_v53 = vld [vmem:[#allocation3] sm:$0xff] }
0x2b14   : > { %2513 = vst.msk [vmem:[#allocation3 + $0x14] sm:$0xf] %vm846_vm14, %v2511_v52 }
0x2b16   : > { %2737 = vrot.lane.b32.xlu0 %v2729_v25, %s3688_s29 }
0x2b17   : > { %v2742_v22 = vld [vmem:[#allocation3 + $0x8] sm:$0xff] }
0x2b18   : > { %v2745_v56 = vpack.c.bf16 %v2742_v22, %v2741_v53 }
0x2b1a   : > { %3388 = vmatprep.mubr.msk.bf16.mxu0 %vm716_vm5, %v2745_v56 }
0x2b1b   : > { %v2743_v60 = vld [vmem:[#allocation3 + $0x10] sm:$0xff] }
0x2b84   : > { %v2733_v42 = vpop.permute.xlu0 %2732 }
0x2b85   : > { %2735 = vst.msk [vmem:[#allocation3 + $0x1c] sm:$0xf] %vm846_vm14, %v2733_v42 }
0x2b88   : > { %v2738_v57 = vpop.permute.xlu0 %2737 }
0x2b89   : > { %2740 = vst.msk [vmem:[#allocation2 + $0x4] sm:$0xf] %vm846_vm14, %v2738_v57 }
0x2b8c   : > { %v2744_v59 = vld [vmem:[#allocation3 + $0x18] sm:$0xff] }
0x2b8d   : > { %v2746_v36 = vpack.c.bf16 %v2744_v59, %v2743_v60 }
0x2b8f   : > { %3389 = vmatmul.mubr.msk.bf16.vlgmr.msra.gmra.mrb[16].mxu0 %vm716_vm5, %v2746_v36 }
0x2c62   : > { %v3390_v61 = vpop.f32.mrb[16].mxu0 }
0x2c63   : > { %v2819_v63 = vadd.f32 %v3390_v61, %v3092_v32  ;;  %v2810_v1 = vpop.f32.mrb[17].mxu0 }
0x2c64   : > { %v2811_v2 = vadd.f32 %v3092_v32, %v2810_v1  ;;  %v3391_v3 = vpop.f32.mrb[18].mxu0 }
0x2c65   : > { %2828 = vst.msk [vmem:[%s3842_s19 + $0x10] sm:$0xff] %vm2825_vm15, %v2819_v63  ;;  %v2822_v10 = vadd.f32 %v3391_v3, %v3092_v32  ;;  %v2813_v5 = vpop.f32.mrb[19].mxu0 }
0x2c66   : > { %2826 = vst.msk [vmem:[%s3842_s19] sm:$0xff] %vm2825_vm15, %v2811_v2  ;;  %v2814_v7 = vadd.f32 %v3092_v32, %v2813_v5 }
0x2c67   : > { %2829 = vst.msk [vmem:[%s3842_s19 + $0x18] sm:$0xff] %vm2825_vm15, %v2822_v10 }
0x2c68   : > { %2827 = vst.msk [vmem:[%s3842_s19 + $0x8] sm:$0xff] %vm2825_vm15, %v2814_v7 }
0x2c69 PF: > { %s4398_s25 = sld [smem:[#allocation8_spill]]  ;;  %s4399_s21 = sld [smem:[#allocation6_spill]] }
0x2c6a   : > { %s4400_s22 = sld [smem:[#allocation7_spill]]  ;;  %s4401_s23 = sld [smem:[#allocation9_spill]] }
0x2c6b   : > { %s4402_s24 = sld [smem:[#allocation10_spill]] }
0x2c6f   : > { %s22_s25 = sadd.s32 1, %s4398_s25  }
0x2c70   : > { %p19_p8 = scmp.ge.s32.totalorder %s22_s25, 8  }
0x2c72   :  { %21 = sbr.rel (!%p19_p8) target bundleno = 8 (0x8), region = 133 }

// kernel: nnet_arvae_forward.2
= control target key start
LH: loop header
LB: loop body
LE: loop exit
PB: predicated region body
PF: predicated region fallthrough
CT: control target
= control target key end

     0   :  { %s3886_s27 = smov 0   ;;  %s4503_s0 = inlined_call_operand.vmem [shape: s32[4,1], index: 0, kind: input, shape index: {}]   ;;  %s4504_s1 = inlined_call_operand.vmem [shape: bf16[64,16], index: 1, kind: input, shape index: {}]   ;;  %s4505_s2 = inlined_call_operand.vmem [shape: f32[64,8], index: 2, kind: input, shape index: {}]   ;;  %s4506_s3 = inlined_call_operand.vmem [shape: bf16[16,96], index: 3, kind: input, shape index: {}]   ;;  %s4507_s4 = inlined_call_operand.vmem [shape: f32[1,96], index: 4, kind: input, shape index: {}]   ;;  %s4508_s5 = inlined_call_operand.vmem [shape: f32[32,96], index: 5, kind: input, shape index: {}]   ;;  %s4509_s6 = inlined_call_operand.vmem [shape: f32[1,96], index: 6, kind: input, shape index: {}]   ;;  %s4510_s7 = inlined_call_operand.vmem [shape: bf16[32,96], index: 7, kind: input, shape index: {}]   ;;  %s4511_s8 = inlined_call_operand.vmem [shape: f32[32,96], index: 8, kind: input, shape index: {}]   ;;  %s4512_s9 = inlined_call_operand.vmem [shape: f32[1,96], index: 9, kind: input, shape index: {}]   ;;  %s4513_s10 = inlined_call_operand.vmem [shape: f32[1,96], index: 10, kind: input, shape index: {}]   ;;  %s4514_s11 = inlined_call_operand.vmem [shape: bf16[32,8], index: 11, kind: input, shape index: {}]   ;;  %s4515_s12 = inlined_call_operand.vmem [shape: f32[1,8], index: 12, kind: input, shape index: {}]   ;;  %s4516_s13 = inlined_call_operand.vmem [shape: bf16[32,8], index: 13, kind: input, shape index: {}]   ;;  %s4517_s14 = inlined_call_operand.vmem [shape: f32[1,8], index: 14, kind: input, shape index: {}]   ;;  %s4518_s15 = inlined_call_operand.vmem [shape: f32[64,32], index: 15, kind: output, shape index: {0}]   ;;  %s4519_s16 = inlined_call_operand.vmem [shape: f32[64,8], index: 16, kind: output, shape index: {1}]   ;;  %s4520_s17 = inlined_call_operand.vmem [shape: f32[64,8], index: 17, kind: output, shape index: {2}]   ;;  %s4521_s18 = inlined_call_operand.vmem [shape: bf16[64,8], index: 18, kind: output, shape index: {3}]  }
   0x1   :  { %4525 = sst [smem:[#allocation5_spill]] %s4503_s0 }
   0x2   :  { %4526 = sst [smem:[#allocation6_spill]] %s4504_s1 }
   0x3   :  { %4527 = sst [smem:[#allocation7_spill]] %s4505_s2 }
   0x4   :  { %4528 = sst [smem:[#allocation8_spill]] %s4514_s11 }
   0x5   :  { %4529 = sst [smem:[#allocation9_spill]] %s4515_s12 }
   0x6   :  { %4530 = sst [smem:[#allocation10_spill]] %s4516_s13 }
   0x7   :  { %4531 = sst [smem:[#allocation11_spill]] %s4517_s14 }
   0x8 LB: > { %4532 = sst [smem:[#allocation4_spill]] %s3781_s27  ;;  %s3892_s28 = sadd.s32 4294967295, %s3781_s27   ;;  %s3781_s27 = sphi %s3886_s27, %s29_s27  }
   0x9   : > { %p3159_p0 = scmp.ge.s32.totalorder %s3781_s27, 1  ;;  %p531_p1 = scmp.lt.s32.totalorder %s3781_s27, 3 }
   0xb   : > { %p532_p2 = pnand %p3159_p0, %p531_p1 }
   0xc   : > { %s3160_s29 = sshll.u32 (!%p532_p2), %s3892_s28, 2  ;;  %s4533_s20 = sld [smem:[#allocation6_spill]] (!%p532_p2) }
   0xd   : > { %535 = sbr.rel (%p532_p2) target bundleno = 11373 (0x2c6d), region = 80  ;;  %p606_p3 = scmp.lt.s32.totalorder (!%p532_p2), %s3160_s29, 7 }
   0xe   : > { %s4534_s23 = sld [smem:[#allocation7_spill]] (!%p532_p2)  ;;  %p3172_p4 = scmp.ne.s32.totalorder (!%p532_p2), %s3892_s28, 0 }
  0x14   : > { %s4542_s29 = smov (!%p606_p3, %s3160_s29), 7  ;;  %645 = sbr.rel (%p3172_p4) target bundleno = 27 (0x1b), region = 84 }
  0x15   : > { %s3161_s30 = sshll.u32 %s4542_s29, 2  ;;  %s3163_s0 = sshll.u32 %s4542_s29, 3  ;;  %vm646_vm0 = vcmask (!%p3172_p4), 257024   ;;  %v3783_v0 = vmov (!%p3172_p4), 0.0  }
  0x16   : > { %s609_s21 = scalar_lea.vmem %s4533_s20, %s3161_s30  ;;  %s3903_s24 = scalar_lea.vmem %s4534_s23, %s3163_s0  ;;  %647 = vst.msk [vmem:[#allocation2] sm:$0xf] (!%p3172_p4), %vm646_vm0, %v3783_v0  ;;  %648 = vst.msk [vmem:[#allocation2 + $0x4] sm:$0xf] (!%p3172_p4), %vm646_vm0, %v3783_v0 }
  0x17   : > { %s3908_s27 = scalar_lea.vmem %s4518_s15, %s3163_s0  ;;  %s3913_s13 = scalar_lea.vmem %s4519_s16, %s3163_s0 }
  0x18   : > { %s3918_s19 = scalar_lea.vmem %s4520_s17, %s3163_s0  ;;  %s3923_s22 = scalar_lea.vmem %s4521_s18, %s3161_s30 }
  0x1b PF: > { %v3662_v1 = vld [vmem:[%s4506_s3] sm:$0xff]   ;;  %v3784_v2 = vmov 0.0|0.0   ;;  %v742_v4 = vld [vmem:[%s4508_s5 + $0x8] sm:$0xff]  ;;  %vm680_vm1 = vcmask 130048   ;;  %v743_v8 = vld [vmem:[%s4508_s5 + $0x10] sm:$0xff]  ;;  %vm3785_vm2 = vmmov 0  }
  0x1c   : > { %3548 = vmatprep.subr.bf16.mxu1 %v3784_v2  ;;  %v741_v3 = vld [vmem:[%s4508_s5] sm:$0xff]  ;;  %3342 = vmatprep.subr.bf16.mxu0 %v3662_v1  ;;  %v3664_v7 = vld [vmem:[%s609_s21 + $0x8] sm:$0xff]   ;;  %v3786_v9 = vmov 0.0   ;;  %v744_v10 = vld [vmem:[%s4508_s5 + $0x18] sm:$0xff]  ;;  %s3949_s1 = sshll.u32 %s3892_s28, 3  ;;  %s4535_s12 = sld [smem:[#allocation5_spill]] }
  0x1d   : > { %v3936_v5 = vpack.c.bf16 %v742_v4, %v741_v3  ;;  %v3663_v6 = vld [vmem:[%s609_s21] sm:$0xff]   ;;  %3343 = vmatpush3.bf16.msra.mxu0 %v3662_v1  ;;  %3356 = vmatprep.mubr.msk.f32.mxu1 %vm3785_vm2, %v3786_v9  ;;  %v3957_v12 = vpack.c.bf16 %v744_v10, %v743_v8  ;;  %v3787_v13 = vmov 0   ;;  %v857_v14 = vstv %s3949_s1  ;;  %s3788_s28 = smov 32   ;;  %s3789_s2 = smov 64  }
  0x1e   : > { %3344 = vmatprep.mubr.msk.bf16.mxu0 %vm680_vm1, %v3663_v6  ;;  %3660 = vset.pattern.permute.xlu1 %v3787_v13  ;;  %v752_v15 = vld [vmem:[#allocation2] sm:$0xf]  ;;  %vm754_vm4 = vcmask 261120   ;;  %vm736_vm5 = vcmask 785408   ;;  %s3790_s23 = smov 96   ;;  %s988_s25 = sadd.s32 1, %s3949_s1 }
  0x1f   : > { %3550 = vmatpush3.bf16.msra.mxu1 %v3936_v5  ;;  %3554 = vmatprep.subr.bf16.mxu0 %v3784_v2  ;;  %v3174_v18 = vld [vmem:[%s4507_s4] ss:$0 sm:$0xff]  ;;  %v989_v56 = vstv %s988_s25  ;;  %s1115_s26 = sadd.s32 2, %s3949_s1  ;;  %s1242_s29 = sadd.s32 3, %s3949_s1  ;;  %vm884_vm13 = vcmask 257024   ;;  %vm2935_vm14 = vcmask 64512  }
  0x20   : > { %3551 = vmatprep.subr.bf16.mxu1 %v3784_v2  ;;  %3345 = vmatmul.mubr.msk.bf16.vlgmr.msra.gmra.mrb[0].mxu0 %vm680_vm1, %v3664_v7  ;;  %v3987_v24 = vld [vmem:[%s4509_s6] ss:$0 sm:$0xff]  ;;  %s1369_s21 = sadd.s32 4, %s3949_s1  ;;  %s1496_s20 = sadd.s32 5, %s3949_s1  ;;  %vm2980_vm15 = vcmask 60416  }
  0x21   : > { %3556 = vmatpush3.bf16.msra.mxu0 %v3936_v5  ;;  %3367 = vmatprep.mubr.msk.f32.mxu0 %vm3785_vm2, %v3786_v9  ;;  %s1750_s14 = sadd.s32 7, %s3949_s1  ;;  %s4538_s30 = sld [smem:[#allocation11_spill]] }
  0x22   : > { %v3954_v11 = vld [vmem:[%s4535_s12] sm:$0xf]  ;;  %3557 = vmatprep.subr.bf16.mxu0 %v3784_v2  ;;  %3661 = vset.pattern.permute.xlu0 %v3787_v13  ;;  %s1623_s12 = sadd.s32 6, %s3949_s1 }
  0x23   : > { %vm858_vm3 = vcmp.gt.s32.totalorder %v3954_v11, %v857_v14  ;;  %3553 = vmatpush3.bf16.msra.mxu1 %v3957_v12  ;;  %vm990_vm6 = vcmp.gt.s32.totalorder %v3954_v11, %v989_v56  ;;  %v1243_v56 = vstv %s1242_s29 }
  0x24   : > { %v3183_v16 = vsel %vm858_vm3, 1.0, %v3786_v9  ;;  %3560 = vmatprep.subr.bf16.mxu1 %v3784_v2  ;;  %v3186_v59 = vsel %vm990_vm6, 1.0, %v3786_v9  ;;  %vm1244_vm8 = vcmp.gt.s32.totalorder %v3954_v11, %v1243_v56 }
  0x25   : > { %v867_v17 = vsub.f32 1.0, %v3183_v16  ;;  %3559 = vmatpush3.bf16.msra.mxu0 %v3957_v12  ;;  %v999_v6 = vsub.f32 1.0, %v3186_v59 }
  0x26   : > { %3357 = vmatmul.mubr.msk.f32.vlgmr.msra.gmra.mrb[0].mxu1 %vm754_vm4, %v752_v15  ;;  %3566 = vmatprep.subr.bf16.mxu0 %v3784_v2 }
  0x27   : > { %870 = vperm.xlu1 %3660, %v867_v17   ;;  %3562 = vmatpush3.bf16.msra.mxu1 %v3936_v5 }
  0x28   : > { %3378 = vmatprep.mubr.msk.f32.mxu1 %vm3785_vm2, %v3786_v9  ;;  %3563 = vmatprep.subr.bf16.mxu1 %v3784_v2 }
  0x2b   : > { %863 = vperm.xlu1 %3660, %v3183_v16   ;;  %3565 = vmatpush3.bf16.msra.mxu1 %v3957_v12 }
  0x2c   : > { %3572 = vmatprep.subr.bf16.mxu1 %v3784_v2 }
  0x2f   : > { %852 = vrot.lane.b32.xlu1 %v752_v15, %s3788_s28 }
  0xa6   : > { %v3995_v42 = vpop.permute.xlu1 %870 }
  0xa7   : > { %v873_v43 = vmul.f32 %v3995_v42, %v752_v15 }
  0xaa   : > { %v4000_v44 = vpop.permute.xlu1 %863 }
  0xae   : > { %v853_v45 = vpop.permute.xlu1 %852 }
  0xf3   : > { %v3346_v19 = vpop.f32.mrb[0].mxu0 }
  0xf4   : > { %v730_v20 = vadd.f32 %v3346_v19, %v3174_v18  ;;  %v721_v21 = vpop.f32.mrb[1].mxu0 }
  0xf5   : > { %v722_v22 = vadd.f32 %v3174_v18, %v721_v21  ;;  %v3347_v23 = vpop.f32.mrb[2].mxu0 }
  0xf6   : > { %739 = vst.msk [vmem:[#allocation3 + $0x10] sm:$0xff] %vm736_vm5, %v730_v20  ;;  %v733_v25 = vadd.f32 %v3347_v23, %v3174_v18  ;;  %v724_v26 = vpop.f32.mrb[3].mxu0 }
  0xf7   : > { %737 = vst.msk [vmem:[#allocation3] sm:$0xff] %vm736_vm5, %v722_v22  ;;  %v725_v27 = vadd.f32 %v3174_v18, %v724_v26 }
  0xf8   : > { %740 = vst.msk [vmem:[#allocation3 + $0x18] sm:$0xff] %vm736_vm5, %v733_v25  ;;  %v1116_v25 = vstv %s1115_s26  ;;  %s4536_s26 = sld [smem:[#allocation8_spill]] }
  0xf9   : > { %v824_v28 = vpop.f32.mrb[0].mxu1  ;;  %738 = vst.msk [vmem:[#allocation3 + $0x8] sm:$0xff] %vm736_vm5, %v725_v27  ;;  %vm1117_vm7 = vcmp.gt.s32.totalorder %v3954_v11, %v1116_v25 }
  0xfa   : > { %v825_v29 = vadd.f32 %v3987_v24, %v824_v28  ;;  %v3358_v30 = vpop.f32.mrb[1].mxu1 }
  0xfc   : > { %836 = vrot.lane.b32.xlu0 %v825_v29, %s3789_s2 }
  0xfe   : > { %v753_v31 = vld [vmem:[#allocation3] sm:$0xf]  ;;  %v886_v60 = vld [vmem:[#allocation3 + $0x4] sm:$0xf] }
  0xff   : > { %v828_v32 = vadd.f32 %v825_v29, %v753_v31  ;;  %v3189_v29 = vsel %vm1117_vm7, 1.0, %v3786_v9 }
 0x100   : > { %v1013_v30 = vld [vmem:[#allocation3 + $0x8] sm:$0xf] }
 0x101   : > { %v3182_v33 = vmul.f32 -1.442695, %v828_v32 }
 0x103   : > { %3671 = vpow2.f32 %v3182_v33 }
 0x10d   : > { %v3672_v34 = vpop.eup %3671 }
 0x10e   : > { %v832_v35 = vadd.f32 1.0, %v3672_v34 }
 0x110   : > { %3673 = vrcp.f32 %v832_v35 }
 0x11a   : > { %v3674_v36 = vpop.eup %3673 }
 0x11b   : > { %v846_v46 = vsub.f32 1.0, %v3674_v36  ;;  %v855_v48 = vmul.f32 %v3674_v36, %v853_v45 }
 0x16e   : > { %v837_v37 = vpop.permute.xlu0 %836 }
 0x16f   : > { %v839_v38 = vmul.f32 %v3674_v36, %v837_v37 }
 0x171   : > { %841 = vrot.lane.b32.xlu0 %v839_v38, %s3789_s2  ;;  %v1126_v38 = vsub.f32 1.0, %v3189_v29 }
 0x1e3   : > { %v842_v39 = vpop.permute.xlu0 %841 }
 0x1e4   : > { %v844_v40 = vadd.f32 %v842_v39, %v753_v31 }
 0x1e6   : > { %3675 = vtanh.f32 %v844_v40 }
 0x1f0   : > { %v3676_v41 = vpop.eup %3675 }
 0x1f1   : > { %848 = vrot.lane.b32.xlu0 %v3676_v41, %s3790_s23 }
 0x1f5   : > { %875 = vrot.lane.b32.xlu0 %v873_v43, %s3788_s28 }
 0x263   : > { %v849_v47 = vpop.permute.xlu0 %848 }
 0x264   : > { %v851_v49 = vmul.f32 %v849_v47, %v846_v46 }
 0x266   : > { %v856_v50 = vadd.f32 %v855_v48, %v851_v49 }
 0x267   : > { %v876_v51 = vpop.permute.xlu0 %875 }
 0x268   : > { %v866_v52 = vmul.f32 %v4000_v44, %v856_v50 }
 0x26a   : > { %v4003_v53 = vadd.f32 %v876_v51, %v866_v52 }
 0x26c   : > { %888 = vrot.lane.b32.xlu1 %v4003_v53, %s3790_s23 }
 0x2de   : > { %v889_v54 = vpop.permute.xlu1 %888 }
 0x2df   : > { %3368 = vmatmul.mubr.msk.f32.vlgmr.msra.gmra.mrb[4].mxu0 %vm754_vm4, %v889_v54 }
 0x2e0   : > { %3568 = vmatpush3.bf16.msra.mxu0 %v3936_v5  ;;  %3389 = vmatprep.mubr.msk.f32.mxu0 %vm3785_vm2, %v3786_v9 }
 0x2e1   : > { %3569 = vmatprep.subr.bf16.mxu0 %v3784_v2 }
 0x2e4   : > { %3571 = vmatpush3.bf16.msra.mxu0 %v3957_v12 }
 0x2e5   : > { %3578 = vmatprep.subr.bf16.mxu0 %v3784_v2 }
 0x3b2   : > { %v958_v55 = vpop.f32.mrb[4].mxu0 }
 0x3b3   : > { %v959_v57 = vadd.f32 %v3987_v24, %v958_v55  ;;  %v3369_v58 = vpop.f32.mrb[5].mxu0 }
 0x3b5   : > { %970 = vrot.lane.b32.xlu0 %v959_v57, %s3789_s2  ;;  %v962_v61 = vadd.f32 %v959_v57, %v886_v60 }
 0x3b7   : > { %v3185_v62 = vmul.f32 -1.442695, %v962_v61  ;;  %v1140_v61 = vld [vmem:[#allocation3 + $0xc] sm:$0xf] }
 0x3b9   : > { %995 = vperm.xlu0 %3661, %v3186_v59   ;;  %3677 = vpow2.f32 %v3185_v62 }
 0x3c3   : > { %v3678_v63 = vpop.eup %3677 }
 0x3c4   : > { %v966_v0 = vadd.f32 1.0, %v3678_v63 }
 0x3c6   : > { %3679 = vrcp.f32 %v966_v0 }
 0x3d0   : > { %v3680_v1 = vpop.eup %3679 }
 0x3d1   : > { %v980_v14 = vsub.f32 1.0, %v3680_v1  ;;  %v986_v16 = vmul.f32 %v3680_v1, %v4003_v53 }
 0x427   : > { %v971_v3 = vpop.permute.xlu0 %970 }
 0x428   : > { %v973_v4 = vmul.f32 %v3680_v1, %v971_v3 }
 0x42a   : > { %975 = vrot.lane.b32.xlu1 %v973_v4, %s3789_s2 }
 0x42e   : > { %1002 = vperm.xlu1 %3660, %v999_v6  }
 0x438   : > { %v4024_v18 = vpop.permute.xlu0 %995 }
 0x49c   : > { %v976_v7 = vpop.permute.xlu1 %975 }
 0x49d   : > { %v978_v8 = vadd.f32 %v976_v7, %v886_v60  ;;  %v3192_v60 = vsel %vm1244_vm8, 1.0, %v3786_v9 }
 0x49e   : > { %v1253_v7 = vsub.f32 1.0, %v3192_v60 }
 0x49f   : > { %3681 = vtanh.f32 %v978_v8 }
 0x4a9   : > { %v3682_v10 = vpop.eup %3681 }
 0x4aa   : > { %982 = vrot.lane.b32.xlu1 %v3682_v10, %s3790_s23 }
 0x4ad   : > { %v4021_v13 = vpop.permute.xlu1 %1002 }
 0x4ae   : > { %v1005_v20 = vmul.f32 %v4021_v13, %v4003_v53 }
 0x51c   : > { %v983_v15 = vpop.permute.xlu1 %982 }
 0x51d   : > { %v985_v17 = vmul.f32 %v983_v15, %v980_v14 }
 0x51f   : > { %v987_v19 = vadd.f32 %v986_v16, %v985_v17 }
 0x521   : > { %v998_v21 = vmul.f32 %v4024_v18, %v987_v19 }
 0x523   : > { %v4029_v22 = vadd.f32 %v1005_v20, %v998_v21 }
 0x525   : > { %1015 = vrot.lane.b32.xlu0 %v4029_v22, %s3790_s23 }
 0x597   : > { %v1016_v23 = vpop.permute.xlu0 %1015 }
 0x598   : > { %3379 = vmatmul.mubr.msk.f32.vlgmr.msra.gmra.mrb[2].mxu1 %vm754_vm4, %v1016_v23 }
 0x599   : > { %3574 = vmatpush3.bf16.msra.mxu1 %v3936_v5  ;;  %3400 = vmatprep.mubr.msk.f32.mxu1 %vm3785_vm2, %v3786_v9 }
 0x59a   : > { %3575 = vmatprep.subr.bf16.mxu1 %v3784_v2 }
 0x59d   : > { %3577 = vmatpush3.bf16.msra.mxu1 %v3957_v12 }
 0x59e   : > { %3584 = vmatprep.subr.bf16.mxu1 %v3784_v2 }
 0x66b   : > { %v1085_v26 = vpop.f32.mrb[2].mxu1 }
 0x66c   : > { %v1086_v27 = vadd.f32 %v3987_v24, %v1085_v26  ;;  %v3380_v28 = vpop.f32.mrb[3].mxu1 }
 0x66e   : > { %1097 = vrot.lane.b32.xlu1 %v1086_v27, %s3789_s2  ;;  %v1089_v31 = vadd.f32 %v1086_v27, %v1013_v30 }
 0x670   : > { %v3188_v32 = vmul.f32 -1.442695, %v1089_v31 }
 0x672   : > { %1122 = vperm.xlu1 %3660, %v3189_v29   ;;  %3683 = vpow2.f32 %v3188_v32  ;;  %v1370_v29 = vstv %s1369_s21 }
 0x673   : > { %vm1371_vm9 = vcmp.gt.s32.totalorder %v3954_v11, %v1370_v29 }
 0x67c   : > { %v3684_v33 = vpop.eup %3683 }
 0x67d   : > { %v1093_v34 = vadd.f32 1.0, %v3684_v33  ;;  %v3195_v33 = vsel %vm1371_vm9, 1.0, %v3786_v9 }
 0x67f   : > { %3685 = vrcp.f32 %v1093_v34  ;;  %v1267_v34 = vld [vmem:[#allocation3 + $0x10] sm:$0xf] }
 0x689   : > { %v3686_v35 = vpop.eup %3685 }
 0x68a   : > { %v1107_v45 = vsub.f32 1.0, %v3686_v35  ;;  %v1113_v47 = vmul.f32 %v3686_v35, %v4029_v22 }
 0x6e0   : > { %v1098_v36 = vpop.permute.xlu1 %1097 }
 0x6e1   : > { %v1100_v37 = vmul.f32 %v3686_v35, %v1098_v36 }
 0x6e3   : > { %1102 = vrot.lane.b32.xlu0 %v1100_v37, %s3789_s2 }
 0x6e7   : > { %1129 = vperm.xlu0 %3661, %v1126_v38  }
 0x6f1   : > { %v4047_v43 = vpop.permute.xlu1 %1122 }
 0x755   : > { %v1103_v39 = vpop.permute.xlu0 %1102 }
 0x756   : > { %v1105_v40 = vadd.f32 %v1103_v39, %v1013_v30 }
 0x758   : > { %3687 = vtanh.f32 %v1105_v40 }
 0x762   : > { %v3688_v41 = vpop.eup %3687 }
 0x763   : > { %1109 = vrot.lane.b32.xlu1 %v3688_v41, %s3790_s23 }
 0x766   : > { %v4050_v49 = vpop.permute.xlu0 %1129 }
 0x767   : > { %v1132_v51 = vmul.f32 %v4050_v49, %v4029_v22 }
 0x7d5   : > { %v1110_v46 = vpop.permute.xlu1 %1109 }
 0x7d6   : > { %v1112_v48 = vmul.f32 %v1110_v46, %v1107_v45  ;;  %v1380_v45 = vsub.f32 1.0, %v3195_v33 }
 0x7d8   : > { %v1114_v50 = vadd.f32 %v1113_v47, %v1112_v48 }
 0x7da   : > { %v1125_v52 = vmul.f32 %v4047_v43, %v1114_v50 }
 0x7dc   : > { %v4055_v54 = vadd.f32 %v1132_v51, %v1125_v52 }
 0x7de   : > { %1142 = vrot.lane.b32.xlu0 %v4055_v54, %s3790_s23 }
 0x850   : > { %v1143_v55 = vpop.permute.xlu0 %1142 }
 0x851   : > { %3390 = vmatmul.mubr.msk.f32.vlgmr.msra.gmra.mrb[6].mxu0 %vm754_vm4, %v1143_v55 }
 0x852   : > { %3580 = vmatpush3.bf16.msra.mxu0 %v3936_v5  ;;  %3411 = vmatprep.mubr.msk.f32.mxu0 %vm3785_vm2, %v3786_v9 }
 0x853   : > { %3581 = vmatprep.subr.bf16.mxu0 %v3784_v2 }
 0x856   : > { %3583 = vmatpush3.bf16.msra.mxu0 %v3957_v12 }
 0x857   : > { %3590 = vmatprep.subr.bf16.mxu0 %v3784_v2 }
 0x924   : > { %v1212_v57 = vpop.f32.mrb[6].mxu0 }
 0x925   : > { %v1213_v58 = vadd.f32 %v3987_v24, %v1212_v57  ;;  %v3391_v59 = vpop.f32.mrb[7].mxu0 }
 0x927   : > { %1224 = vrot.lane.b32.xlu1 %v1213_v58, %s3789_s2  ;;  %v1216_v62 = vadd.f32 %v1213_v58, %v1140_v61 }
 0x929   : > { %v3191_v63 = vmul.f32 -1.442695, %v1216_v62 }
 0x92b   : > { %1249 = vperm.xlu1 %3660, %v3192_v60   ;;  %3689 = vpow2.f32 %v3191_v63  ;;  %v1497_v63 = vstv %s1496_s20  ;;  %s4537_s20 = sld [smem:[#allocation10_spill]] }
 0x92c   : > { %vm1498_vm10 = vcmp.gt.s32.totalorder %v3954_v11, %v1497_v63 }
 0x935   : > { %v3690_v0 = vpop.eup %3689 }
 0x936   : > { %v1220_v1 = vadd.f32 1.0, %v3690_v0 }
 0x938   : > { %3691 = vrcp.f32 %v1220_v1 }
 0x942   : > { %v3692_v3 = vpop.eup %3691 }
 0x943   : > { %v1234_v16 = vsub.f32 1.0, %v3692_v3  ;;  %v1240_v19 = vmul.f32 %v3692_v3, %v4055_v54 }
 0x999   : > { %v1225_v4 = vpop.permute.xlu1 %1224 }
 0x99a   : > { %v1227_v6 = vmul.f32 %v3692_v3, %v1225_v4  ;;  %v1394_v4 = vld [vmem:[#allocation3 + $0x14] sm:$0xf] }
 0x99c   : > { %1229 = vrot.lane.b32.xlu0 %v1227_v6, %s3789_s2 }
 0x9a0   : > { %1256 = vperm.xlu0 %3661, %v1253_v7  }
 0x9aa   : > { %v4073_v15 = vpop.permute.xlu1 %1249 }
 0xa0e   : > { %v1230_v8 = vpop.permute.xlu0 %1229 }
 0xa0f   : > { %v1232_v10 = vadd.f32 %v1230_v8, %v1140_v61 }
 0xa11   : > { %3693 = vtanh.f32 %v1232_v10 }
 0xa1b   : > { %v3694_v14 = vpop.eup %3693 }
 0xa1c   : > { %1236 = vrot.lane.b32.xlu1 %v3694_v14, %s3790_s23 }
 0xa1f   : > { %v4076_v21 = vpop.permute.xlu0 %1256 }
 0xa20   : > { %v1259_v25 = vmul.f32 %v4076_v21, %v4055_v54 }
 0xa8e   : > { %v1237_v17 = vpop.permute.xlu1 %1236 }
 0xa8f   : > { %v1239_v20 = vmul.f32 %v1237_v17, %v1234_v16 }
 0xa91   : > { %v1241_v23 = vadd.f32 %v1240_v19, %v1239_v20 }
 0xa93   : > { %v1252_v26 = vmul.f32 %v4073_v15, %v1241_v23 }
 0xa95   : > { %v4081_v27 = vadd.f32 %v1259_v25, %v1252_v26 }
 0xa97   : > { %1269 = vrot.lane.b32.xlu0 %v4081_v27, %s3790_s23 }
 0xb09   : > { %v1270_v28 = vpop.permute.xlu0 %1269 }
 0xb0a   : > { %3401 = vmatmul.mubr.msk.f32.vlgmr.msra.gmra.mrb[4].mxu1 %vm754_vm4, %v1270_v28 }
 0xb0b   : > { %3586 = vmatpush3.bf16.msra.mxu1 %v3936_v5  ;;  %3422 = vmatprep.mubr.msk.f32.mxu1 %vm3785_vm2, %v3786_v9 }
 0xb0c   : > { %3587 = vmatprep.subr.bf16.mxu1 %v3784_v2 }
 0xb0f   : > { %3589 = vmatpush3.bf16.msra.mxu1 %v3957_v12 }
 0xbdd   : > { %v1339_v30 = vpop.f32.mrb[4].mxu1 }
 0xbde   : > { %v1340_v31 = vadd.f32 %v3987_v24, %v1339_v30  ;;  %v3402_v32 = vpop.f32.mrb[5].mxu1 }
 0xbe0   : > { %1351 = vrot.lane.b32.xlu1 %v1340_v31, %s3789_s2  ;;  %v1343_v35 = vadd.f32 %v1340_v31, %v1267_v34 }
 0xbe2   : > { %v3194_v36 = vmul.f32 -1.442695, %v1343_v35 }
 0xbe4   : > { %1376 = vperm.xlu1 %3660, %v3195_v33   ;;  %3695 = vpow2.f32 %v3194_v36 }
 0xbee   : > { %v3696_v37 = vpop.eup %3695 }
 0xbef   : > { %v1347_v38 = vadd.f32 1.0, %v3696_v37  ;;  %v1624_v37 = vstv %s1623_s12 }
 0xbf0   : > { %vm1625_vm11 = vcmp.gt.s32.totalorder %v3954_v11, %v1624_v37 }
 0xbf1   : > { %3697 = vrcp.f32 %v1347_v38 }
 0xbfb   : > { %v3698_v39 = vpop.eup %3697 }
 0xbfc   : > { %v1361_v51 = vsub.f32 1.0, %v3698_v39  ;;  %v1367_v55 = vmul.f32 %v3698_v39, %v4081_v27 }
 0xc52   : > { %v1352_v40 = vpop.permute.xlu1 %1351 }
 0xc53   : > { %v1354_v41 = vmul.f32 %v3698_v39, %v1352_v40 }
 0xc55   : > { %1356 = vrot.lane.b32.xlu0 %v1354_v41, %s3789_s2  ;;  %v3201_v41 = vsel %vm1625_vm11, 1.0, %v3786_v9 }
 0xc59   : > { %1383 = vperm.xlu0 %3661, %v1380_v45   ;;  %v1521_v45 = vld [vmem:[#allocation3 + $0x18] sm:$0xf] }
 0xc63   : > { %v4098_v50 = vpop.permute.xlu1 %1376 }
 0xcc7   : > { %v1357_v46 = vpop.permute.xlu0 %1356 }
 0xcc8   : > { %v1359_v47 = vadd.f32 %v1357_v46, %v1267_v34 }
 0xcca   : > { %3699 = vtanh.f32 %v1359_v47 }
 0xcd4   : > { %v3700_v48 = vpop.eup %3699 }
 0xcd5   : > { %1363 = vrot.lane.b32.xlu1 %v3700_v48, %s3790_s23 }
 0xcd8   : > { %v4101_v57 = vpop.permute.xlu0 %1383 }
 0xcd9   : > { %v1386_v59 = vmul.f32 %v4101_v57, %v4081_v27 }
 0xd47   : > { %v1364_v52 = vpop.permute.xlu1 %1363 }
 0xd48   : > { %v1366_v56 = vmul.f32 %v1364_v52, %v1361_v51 }
 0xd4a   : > { %v1368_v58 = vadd.f32 %v1367_v55, %v1366_v56 }
 0xd4c   : > { %v1379_v60 = vmul.f32 %v4098_v50, %v1368_v58  ;;  %v1634_v58 = vsub.f32 1.0, %v3201_v41 }
 0xd4e   : > { %v4106_v61 = vadd.f32 %v1386_v59, %v1379_v60 }
 0xd50   : > { %1396 = vrot.lane.b32.xlu0 %v4106_v61, %s3790_s23  ;;  %v1388_v37 = vmul.f32 %v4106_v61, %v4098_v50 }
 0xdc2   : > { %v1397_v62 = vpop.permute.xlu0 %1396 }
 0xdc3   : > { %3412 = vmatmul.mubr.msk.f32.vlgmr.msra.gmra.mrb[8].mxu0 %vm754_vm4, %v1397_v62 }
 0xdc4   : > { %3592 = vmatpush3.bf16.msra.mxu0 %v3936_v5  ;;  %3433 = vmatprep.mubr.msk.f32.mxu0 %vm3785_vm2, %v3786_v9  ;;  %v3198_v5 = vsel %vm1498_vm10, 1.0, %v3786_v9 }
 0xdc5   : > { %3593 = vmatprep.subr.bf16.mxu0 %v3784_v2  ;;  %v1507_v17 = vsub.f32 1.0, %v3198_v5 }
 0xdc8   : > { %3595 = vmatpush3.bf16.msra.mxu0 %v3957_v12 }
 0xdc9   : > { %3596 = vmatprep.subr.bf16.mxu0 %v3784_v2 }
 0xe96   : > { %v1466_v0 = vpop.f32.mrb[8].mxu0 }
 0xe97   : > { %v1467_v1 = vadd.f32 %v3987_v24, %v1466_v0  ;;  %v3413_v3 = vpop.f32.mrb[9].mxu0 }
 0xe99   : > { %1478 = vrot.lane.b32.xlu1 %v1467_v1, %s3789_s2  ;;  %v1470_v6 = vadd.f32 %v1467_v1, %v1394_v4 }
 0xe9b   : > { %v3197_v7 = vmul.f32 -1.442695, %v1470_v6 }
 0xe9d   : > { %1503 = vperm.xlu1 %3660, %v3198_v5   ;;  %3701 = vpow2.f32 %v3197_v7 }
 0xea7   : > { %v3702_v12 = vpop.eup %3701 }
 0xea8   : > { %v1474_v8 = vadd.f32 1.0, %v3702_v12 }
 0xeaa   : > { %3703 = vrcp.f32 %v1474_v8 }
 0xeb4   : > { %v3704_v10 = vpop.eup %3703 }
 0xeb5   : > { %v1488_v26 = vsub.f32 1.0, %v3704_v10  ;;  %v1494_v29 = vmul.f32 %v3704_v10, %v4106_v61 }
 0xf0b   : > { %v1479_v14 = vpop.permute.xlu1 %1478 }
 0xf0c   : > { %v1481_v16 = vmul.f32 %v3704_v10, %v1479_v14  ;;  %v1751_v14 = vstv %s1750_s14 }
 0xf0d   : > { %vm1752_vm12 = vcmp.gt.s32.totalorder %v3954_v11, %v1751_v14  ;;  %v879_v11 = vmul.f32 %v4003_v53, %v4000_v44 }
 0xf0e   : > { %1483 = vrot.lane.b32.xlu0 %v1481_v16, %s3789_s2 }
 0xf12   : > { %1510 = vperm.xlu0 %3661, %v1507_v17  }
 0xf1c   : > { %v4124_v25 = vpop.permute.xlu1 %1503 }
 0xf80   : > { %v1484_v19 = vpop.permute.xlu0 %1483 }
 0xf81   : > { %v1486_v20 = vadd.f32 %v1484_v19, %v1394_v4 }
 0xf83   : > { %3705 = vtanh.f32 %v1486_v20  ;;  %v3204_v20 = vsel %vm1752_vm12, 1.0, %v3786_v9 }
 0xf8d   : > { %v3706_v23 = vpop.eup %3705 }
 0xf8e   : > { %1490 = vrot.lane.b32.xlu1 %v3706_v23, %s3790_s23  ;;  %v1648_v23 = vld [vmem:[#allocation3 + $0x1c] sm:$0xf] }
 0xf91   : > { %v4127_v31 = vpop.permute.xlu0 %1510 }
 0xf92   : > { %v1513_v33 = vmul.f32 %v4127_v31, %v4106_v61  ;;  %v1870_v61 = vld [vmem:[%s4511_s8 + $0x10] sm:$0xff] }
0x1000   : > { %v1491_v28 = vpop.permute.xlu1 %1490 }
0x1001   : > { %v1493_v30 = vmul.f32 %v1491_v28, %v1488_v26 }
0x1003   : > { %v1495_v32 = vadd.f32 %v1494_v29, %v1493_v30 }
0x1005   : > { %v1506_v34 = vmul.f32 %v4124_v25, %v1495_v32 }
0x1007   : > { %v4132_v35 = vadd.f32 %v1513_v33, %v1506_v34 }
0x1009   : > { %1523 = vrot.lane.b32.xlu0 %v4132_v35, %s3790_s23 }
0x107b   : > { %v1524_v36 = vpop.permute.xlu0 %1523 }
0x107c   : > { %3423 = vmatmul.mubr.msk.f32.vlgmr.msra.gmra.mrb[6].mxu1 %vm754_vm4, %v1524_v36  ;;  %v1761_v36 = vsub.f32 1.0, %v3204_v20 }
0x114f   : > { %v1593_v38 = vpop.f32.mrb[6].mxu1 }
0x1150   : > { %v1594_v39 = vadd.f32 %v3987_v24, %v1593_v38  ;;  %v3424_v40 = vpop.f32.mrb[7].mxu1 }
0x1152   : > { %1605 = vrot.lane.b32.xlu1 %v1594_v39, %s3789_s2  ;;  %v1597_v46 = vadd.f32 %v1594_v39, %v1521_v45 }
0x1154   : > { %v3200_v47 = vmul.f32 -1.442695, %v1597_v46  ;;  %v1871_v46 = vld [vmem:[%s4511_s8 + $0x18] sm:$0xff] }
0x1156   : > { %1630 = vperm.xlu1 %3660, %v3201_v41   ;;  %3707 = vpow2.f32 %v3200_v47  ;;  %v1869_v41 = vld [vmem:[%s4511_s8 + $0x8] sm:$0xff]  ;;  %v1007_v47 = vmul.f32 %v4029_v22, %v4024_v18  ;;  %v4205_v22 = vld [vmem:[#allocation2 + $0x4] sm:$0xf] }
0x1160   : > { %v3708_v48 = vpop.eup %3707 }
0x1161   : > { %v1601_v51 = vadd.f32 1.0, %v3708_v48  ;;  %v4195_v48 = vpack.c.bf16 %v1871_v46, %v1870_v61 }
0x1163   : > { %3709 = vrcp.f32 %v1601_v51 }
0x116d   : > { %v3710_v52 = vpop.eup %3709 }
0x116e   : > { %v1615_v0 = vsub.f32 1.0, %v3710_v52  ;;  %v1621_v3 = vmul.f32 %v3710_v52, %v4132_v35 }
0x11c4   : > { %v1606_v55 = vpop.permute.xlu1 %1605 }
0x11c5   : > { %v1608_v56 = vmul.f32 %v3710_v52, %v1606_v55  ;;  %v1261_v52 = vmul.f32 %v4081_v27, %v4073_v15 }
0x11c7   : > { %1610 = vrot.lane.b32.xlu0 %v1608_v56, %s3789_s2  ;;  %v1515_v56 = vmul.f32 %v4132_v35, %v4124_v25 }
0x11cb   : > { %1637 = vperm.xlu0 %3661, %v1634_v58  }
0x11d5   : > { %v4144_v63 = vpop.permute.xlu1 %1630 }
0x1239   : > { %v1611_v59 = vpop.permute.xlu0 %1610 }
0x123a   : > { %v1613_v60 = vadd.f32 %v1611_v59, %v1521_v45 }
0x123c   : > { %3711 = vtanh.f32 %v1613_v60  ;;  %v3665_v60 = vld [vmem:[%s4510_s7] sm:$0xff]  }
0x123d   : > { %3436 = vmatprep.subr.bf16.mxu1 %v3665_v60 }
0x123e   : > { %3437 = vmatpush3.bf16.msra.mxu1 %v3665_v60 }
0x1246   : > { %v3712_v62 = vpop.eup %3711 }
0x1247   : > { %1617 = vrot.lane.b32.xlu1 %v3712_v62, %s3790_s23  ;;  %v3666_v62 = vld [vmem:[%s4510_s7 + $0x8] sm:$0xff]  }
0x1248   : > { %3438 = vmatprep.subr.bf16.mxu1 %v3666_v62 }
0x1249   : > { %3439 = vmatpush3.bf16.msra.mxu1 %v3666_v62 }
0x124a   : > { %v4147_v4 = vpop.permute.xlu0 %1637  ;;  %3602 = vmatprep.subr.bf16.mxu1 %v3784_v2 }
0x124b   : > { %v1640_v7 = vmul.f32 %v4147_v4, %v4132_v35 }
0x12b9   : > { %v1618_v1 = vpop.permute.xlu1 %1617 }
0x12ba   : > { %v1620_v5 = vmul.f32 %v1618_v1, %v1615_v0 }
0x12bc   : > { %v1622_v6 = vadd.f32 %v1621_v3, %v1620_v5 }
0x12be   : > { %v1633_v12 = vmul.f32 %v4144_v63, %v1622_v6 }
0x12c0   : > { %v4152_v8 = vadd.f32 %v1640_v7, %v1633_v12 }
0x12c2   : > { %1650 = vrot.lane.b32.xlu0 %v4152_v8, %s3790_s23  ;;  %v1642_v38 = vmul.f32 %v4152_v8, %v4144_v63 }
0x1334   : > { %v1651_v10 = vpop.permute.xlu0 %1650 }
0x1335   : > { %3434 = vmatmul.mubr.msk.f32.vlgmr.msra.gmra.mrb[10].mxu0 %vm754_vm4, %v1651_v10 }
0x1336   : > { %3452 = vmatprep.mubr.msk.f32.mxu0 %vm3785_vm2, %v3786_v9 }
0x1408   : > { %v1720_v16 = vpop.f32.mrb[10].mxu0 }
0x1409   : > { %v1721_v17 = vadd.f32 %v3987_v24, %v1720_v16  ;;  %v3435_v19 = vpop.f32.mrb[11].mxu0  ;;  %v1134_v24 = vmul.f32 %v4055_v54, %v4047_v43  ;;  %v1868_v54 = vld [vmem:[%s4511_s8] sm:$0xff] }
0x140a   : > { %v4187_v45 = vpack.c.bf16 %v1869_v41, %v1868_v54  ;;  %v4254_v19 = vld [vmem:[%s4513_s10] ss:$0 sm:$0xff] }
0x140b   : > { %1732 = vrot.lane.b32.xlu1 %v1721_v17, %s3789_s2  ;;  %v1724_v26 = vadd.f32 %v1721_v17, %v1648_v23 }
0x140c   : > { %3598 = vmatpush3.bf16.msra.mxu0 %v4187_v45 }
0x140d   : > { %v3203_v28 = vmul.f32 -1.442695, %v1724_v26  ;;  %3599 = vmatprep.subr.bf16.mxu0 %v3784_v2 }
0x140f   : > { %1757 = vperm.xlu1 %3660, %v3204_v20   ;;  %3713 = vpow2.f32 %v3203_v28 }
0x1410   : > { %3601 = vmatpush3.bf16.msra.mxu0 %v4195_v48 }
0x1411   : > { %3608 = vmatprep.subr.bf16.mxu0 %v3784_v2 }
0x1413   : > { %3453 = vmatmul.mubr.msk.f32.vlgmr.msra.gmra.mrb[12].mxu0 %vm754_vm4, %v4205_v22 }
0x1414   : > { %3610 = vmatpush3.bf16.msra.mxu0 %v4187_v45  ;;  %3474 = vmatprep.mubr.msk.f32.mxu0 %vm3785_vm2, %v3786_v9 }
0x1415   : > { %3611 = vmatprep.subr.bf16.mxu0 %v3784_v2 }
0x1418   : > { %3613 = vmatpush3.bf16.msra.mxu0 %v4195_v48 }
0x1419   : > { %v3714_v29 = vpop.eup %3713  ;;  %3620 = vmatprep.subr.bf16.mxu0 %v3784_v2 }
0x141a   : > { %v1728_v30 = vadd.f32 1.0, %v3714_v29 }
0x141c   : > { %3715 = vrcp.f32 %v1728_v30 }
0x1426   : > { %v3716_v32 = vpop.eup %3715 }
0x1427   : > { %v1742_v0 = vsub.f32 1.0, %v3716_v32  ;;  %v1748_v3 = vmul.f32 %v3716_v32, %v4152_v8 }
0x147d   : > { %v1733_v33 = vpop.permute.xlu1 %1732 }
0x147e   : > { %v1735_v34 = vmul.f32 %v3716_v32, %v1733_v33 }
0x1480   : > { %1737 = vrot.lane.b32.xlu0 %v1735_v34, %s3789_s2 }
0x1484   : > { %1764 = vperm.xlu0 %3661, %v1761_v36  }
0x1488   : > { %881 = vrot.lane.b32.xlu0 %v879_v11, %s3790_s23  ;;  %v3205_v11 = vld [vmem:[%s4512_s9] ss:$0 sm:$0xff] }
0x148c   : > { %1136 = vrot.lane.b32.xlu0 %v1134_v24, %s3790_s23 }
0x148e   : > { %v4227_v59 = vpop.permute.xlu1 %1757 }
0x1490   : > { %1390 = vrot.lane.b32.xlu0 %v1388_v37, %s3790_s23 }
0x1494   : > { %1644 = vrot.lane.b32.xlu0 %v1642_v38, %s3790_s23 }
0x14e6   : > { %v1951_v20 = vpop.f32.mrb[12].mxu0 }
0x14e7   : > { %v3454_v26 = vpop.f32.mrb[13].mxu0 }
0x14f2   : > { %v1738_v39 = vpop.permute.xlu0 %1737 }
0x14f3   : > { %v1740_v40 = vadd.f32 %v1738_v39, %v1648_v23  ;;  %v1952_v23 = vadd.f32 %v4254_v19, %v1951_v20 }
0x14f5   : > { %3717 = vtanh.f32 %v1740_v40  ;;  %1963 = vrot.lane.b32.xlu0 %v1952_v23, %s3789_s2 }
0x14ff   : > { %v3718_v53 = vpop.eup %3717 }
0x1500   : > { %1744 = vrot.lane.b32.xlu1 %v3718_v53, %s3790_s23 }
0x1503   : > { %v4197_v51 = vpop.permute.xlu0 %1764 }
0x1504   : > { %1009 = vrot.lane.b32.xlu1 %v1007_v47, %s3790_s23  ;;  %v1767_v12 = vmul.f32 %v4197_v51, %v4152_v8 }
0x1507   : > { %v882_v55 = vpop.permute.xlu0 %881 }
0x1508   : > { %885 = vst.msk [vmem:[%s3908_s27] sm:$0xf] %vm884_vm13, %v882_v55  ;;  %1263 = vrot.lane.b32.xlu1 %v1261_v52, %s3790_s23 }
0x150b   : > { %v1137_v27 = vpop.permute.xlu0 %1136 }
0x150c   : > { %1139 = vst.msk [vmem:[%s3908_s27 + $0x8] sm:$0xf] %vm884_vm13, %v1137_v27  ;;  %1517 = vrot.lane.b32.xlu1 %v1515_v56, %s3790_s23 }
0x150f   : > { %v1391_v58 = vpop.permute.xlu0 %1390 }
0x1510   : > { %1393 = vst.msk [vmem:[%s3908_s27 + $0x10] sm:$0xf] %vm884_vm13, %v1391_v58 }
0x1513   : > { %v1645_v35 = vpop.permute.xlu0 %1644 }
0x1514   : > { %1647 = vst.msk [vmem:[%s3908_s27 + $0x18] sm:$0xf] %vm884_vm13, %v1645_v35 }
0x1567   : > { %v1964_v56 = vpop.permute.xlu0 %1963 }
0x1572   : > { %v1745_v1 = vpop.permute.xlu1 %1744 }
0x1573   : > { %v1747_v5 = vmul.f32 %v1745_v1, %v1742_v0  ;;  %v1985_v0 = vmul.f32 %v4205_v22, %v3995_v42 }
0x1575   : > { %v1749_v6 = vadd.f32 %v1748_v3, %v1747_v5 }
0x1576   : > { %v1010_v7 = vpop.permute.xlu1 %1009 }
0x1577   : > { %v1760_v10 = vmul.f32 %v4227_v59, %v1749_v6  ;;  %1012 = vst.msk [vmem:[%s3908_s27 + $0x4] sm:$0xf] %vm884_vm13, %v1010_v7 }
0x1579   : > { %v4242_v14 = vadd.f32 %v1767_v12, %v1760_v10 }
0x157a   : > { %v1264_v16 = vpop.permute.xlu1 %1263 }
0x157b   : > { %1266 = vst.msk [vmem:[%s3908_s27 + $0xc] sm:$0xf] %vm884_vm13, %v1264_v16  ;;  %v1769_v8 = vmul.f32 %v4242_v14, %v4227_v59 }
0x157d   : > { %1771 = vrot.lane.b32.xlu1 %v1769_v8, %s3790_s23 }
0x157e   : > { %v1518_v17 = vpop.permute.xlu1 %1517  ;;  %v1780_v29 = vld [vmem:[%s3908_s27] sm:$0xff] }
0x157f   : > { %1520 = vst.msk [vmem:[%s3908_s27 + $0x14] sm:$0xf] %vm884_vm13, %v1518_v17 }
0x1582   : > { %v1781_v30 = vld [vmem:[%s3908_s27 + $0x8] sm:$0xff] }
0x1583   : > { %v1784_v33 = vpack.c.bf16 %v1781_v30, %v1780_v29 }
0x1585   : > { %3440 = vmatprep.mubr.msk.bf16.mxu1 %vm754_vm4, %v1784_v33 }
0x1586   : > { %v1782_v32 = vld [vmem:[%s3908_s27 + $0x10] sm:$0xff] }
0x15ef   : > { %v1772_v28 = vpop.permute.xlu1 %1771 }
0x15f0   : > { %1774 = vst.msk [vmem:[%s3908_s27 + $0x1c] sm:$0xf] %vm884_vm13, %v1772_v28 }
0x15f7   : > { %v1783_v34 = vld [vmem:[%s3908_s27 + $0x18] sm:$0xff] }
0x15f8   : > { %v1785_v36 = vpack.c.bf16 %v1783_v34, %v1782_v32 }
0x15fa   : > { %3441 = vmatmul.mubr.msk.bf16.vlgmr.msra.gmra.mrb[8].mxu1 %vm754_vm4, %v1785_v36 }
0x15fb   : > { %3604 = vmatpush3.bf16.msra.mxu1 %v4187_v45  ;;  %3463 = vmatprep.mubr.msk.f32.mxu1 %vm3785_vm2, %v3786_v9 }
0x15fc   : > { %3605 = vmatprep.subr.bf16.mxu1 %v3784_v2 }
0x15ff   : > { %3607 = vmatpush3.bf16.msra.mxu1 %v4195_v48 }
0x1600   : > { %3614 = vmatprep.subr.bf16.mxu1 %v3784_v2 }
0x16cd   : > { %v3442_v24 = vpop.f32.mrb[8].mxu1 }
0x16ce   : > { %v1858_v37 = vadd.f32 %v3442_v24, %v3205_v11  ;;  %v1849_v38 = vpop.f32.mrb[9].mxu1 }
0x16cf   : > { %v1850_v39 = vadd.f32 %v3205_v11, %v1849_v38  ;;  %v3443_v40 = vpop.f32.mrb[10].mxu1 }
0x16d0   : > { %1866 = vst.msk [vmem:[#allocation3 + $0x10] sm:$0xff] %vm736_vm5, %v1858_v37  ;;  %v1861_v53 = vadd.f32 %v3443_v40, %v3205_v11  ;;  %v1852_v54 = vpop.f32.mrb[11].mxu1 }
0x16d1   : > { %1864 = vst.msk [vmem:[#allocation3] sm:$0xff] %vm736_vm5, %v1850_v39  ;;  %v1853_v41 = vadd.f32 %v3205_v11, %v1852_v54 }
0x16d2   : > { %1867 = vst.msk [vmem:[#allocation3 + $0x18] sm:$0xff] %vm736_vm5, %v1861_v53 }
0x16d3   : > { %1865 = vst.msk [vmem:[#allocation3 + $0x8] sm:$0xff] %vm736_vm5, %v1853_v41 }
0x16d8   : > { %v1881_v61 = vld [vmem:[#allocation3] sm:$0xf] }
0x16d9   : > { %v1955_v46 = vadd.f32 %v1952_v23, %v1881_v61  ;;  %v1997_v23 = vld [vmem:[#allocation3 + $0x4] sm:$0xf] }
0x16db   : > { %v3212_v47 = vmul.f32 -1.442695, %v1955_v46 }
0x16dd   : > { %3719 = vpow2.f32 %v3212_v47 }
0x16e7   : > { %v3720_v52 = vpop.eup %3719 }
0x16e8   : > { %v1959_v55 = vadd.f32 1.0, %v3720_v52 }
0x16ea   : > { %3721 = vrcp.f32 %v1959_v55  ;;  %v2108_v55 = vld [vmem:[#allocation3 + $0x8] sm:$0xf] }
0x16f4   : > { %v3722_v27 = vpop.eup %3721 }
0x16f5   : > { %v1966_v58 = vmul.f32 %v3722_v27, %v1964_v56  ;;  %v1973_v3 = vsub.f32 1.0, %v3722_v27 }
0x16f7   : > { %1968 = vrot.lane.b32.xlu1 %v1966_v58, %s3789_s2 }
0x16fb   : > { %1979 = vrot.lane.b32.xlu1 %v4205_v22, %s3788_s28 }
0x1769   : > { %v1969_v35 = vpop.permute.xlu1 %1968 }
0x176a   : > { %v1971_v60 = vadd.f32 %v1969_v35, %v1881_v61 }
0x176c   : > { %3723 = vtanh.f32 %v1971_v60 }
0x176d   : > { %v1980_v1 = vpop.permute.xlu1 %1979 }
0x176e   : > { %v1982_v6 = vmul.f32 %v3722_v27, %v1980_v1 }
0x1776   : > { %v3724_v62 = vpop.eup %3723 }
0x1777   : > { %1975 = vrot.lane.b32.xlu0 %v3724_v62, %s3790_s23 }
0x177b   : > { %1987 = vrot.lane.b32.xlu0 %v1985_v0, %s3788_s28 }
0x17e9   : > { %v1976_v5 = vpop.permute.xlu0 %1975 }
0x17ea   : > { %v1978_v7 = vmul.f32 %v1976_v5, %v1973_v3 }
0x17ec   : > { %v1983_v12 = vadd.f32 %v1982_v6, %v1978_v7 }
0x17ed   : > { %v1988_v16 = vpop.permute.xlu0 %1987 }
0x17ee   : > { %v1984_v10 = vmul.f32 %v1983_v12, %v4000_v44 }
0x17f0   : > { %v4287_v8 = vadd.f32 %v1988_v16, %v1984_v10 }
0x17f2   : > { %1999 = vrot.lane.b32.xlu1 %v4287_v8, %s3790_s23  ;;  %v2100_v41 = vmul.f32 %v4287_v8, %v4021_v13 }
0x1864   : > { %v2000_v17 = vpop.permute.xlu1 %1999 }
0x1865   : > { %3464 = vmatmul.mubr.msk.f32.vlgmr.msra.gmra.mrb[12].mxu1 %vm754_vm4, %v2000_v17 }
0x1866   : > { %3616 = vmatpush3.bf16.msra.mxu1 %v4187_v45  ;;  %3485 = vmatprep.mubr.msk.f32.mxu1 %vm3785_vm2, %v3786_v9 }
0x1867   : > { %3617 = vmatprep.subr.bf16.mxu1 %v3784_v2 }
0x186a   : > { %3619 = vmatpush3.bf16.msra.mxu1 %v4195_v48 }
0x186b   : > { %3626 = vmatprep.subr.bf16.mxu1 %v3784_v2 }
0x1938   : > { %v2069_v42 = vpop.f32.mrb[12].mxu1 }
0x1939   : > { %v2070_v22 = vadd.f32 %v4254_v19, %v2069_v42  ;;  %v3465_v20 = vpop.f32.mrb[13].mxu1 }
0x193b   : > { %2081 = vrot.lane.b32.xlu0 %v2070_v22, %s3789_s2  ;;  %v2073_v26 = vadd.f32 %v2070_v22, %v1997_v23 }
0x193d   : > { %v3214_v28 = vmul.f32 -1.442695, %v2073_v26 }
0x193f   : > { %3725 = vpow2.f32 %v3214_v28  ;;  %v2219_v28 = vld [vmem:[#allocation3 + $0xc] sm:$0xf] }
0x1949   : > { %v3726_v29 = vpop.eup %3725 }
0x194a   : > { %v2077_v30 = vadd.f32 1.0, %v3726_v29 }
0x194c   : > { %3727 = vrcp.f32 %v2077_v30 }
0x1956   : > { %v3728_v32 = vpop.eup %3727 }
0x1957   : > { %v2091_v37 = vsub.f32 1.0, %v3728_v32  ;;  %v2097_v39 = vmul.f32 %v3728_v32, %v4287_v8 }
0x19ad   : > { %v2082_v33 = vpop.permute.xlu0 %2081 }
0x19ae   : > { %v2084_v34 = vmul.f32 %v3728_v32, %v2082_v33 }
0x19b0   : > { %2086 = vrot.lane.b32.xlu1 %v2084_v34, %s3789_s2 }
0x1a22   : > { %v2087_v36 = vpop.permute.xlu1 %2086 }
0x1a23   : > { %v2089_v11 = vadd.f32 %v2087_v36, %v1997_v23 }
0x1a25   : > { %3729 = vtanh.f32 %v2089_v11 }
0x1a2f   : > { %v3730_v24 = vpop.eup %3729 }
0x1a30   : > { %2093 = vrot.lane.b32.xlu0 %v3730_v24, %s3790_s23 }
0x1aa2   : > { %v2094_v38 = vpop.permute.xlu0 %2093 }
0x1aa3   : > { %v2096_v40 = vmul.f32 %v2094_v38, %v2091_v37 }
0x1aa5   : > { %v2098_v53 = vadd.f32 %v2097_v39, %v2096_v40 }
0x1aa7   : > { %v2099_v54 = vmul.f32 %v2098_v53, %v4024_v18 }
0x1aa9   : > { %v4306_v61 = vadd.f32 %v2100_v41, %v2099_v54 }
0x1aab   : > { %2110 = vrot.lane.b32.xlu1 %v4306_v61, %s3790_s23  ;;  %v2211_v42 = vmul.f32 %v4306_v61, %v4050_v49 }
0x1b1d   : > { %v2111_v46 = vpop.permute.xlu1 %2110 }
0x1b1e   : > { %3475 = vmatmul.mubr.msk.f32.vlgmr.msra.gmra.mrb[14].mxu0 %vm754_vm4, %v2111_v46 }
0x1b1f   : > { %3622 = vmatpush3.bf16.msra.mxu0 %v4187_v45  ;;  %3496 = vmatprep.mubr.msk.f32.mxu0 %vm3785_vm2, %v3786_v9 }
0x1b20   : > { %3623 = vmatprep.subr.bf16.mxu0 %v3784_v2 }
0x1b23   : > { %3625 = vmatpush3.bf16.msra.mxu0 %v4195_v48 }
0x1b24   : > { %3632 = vmatprep.subr.bf16.mxu0 %v3784_v2 }
0x1bf1   : > { %v2180_v13 = vpop.f32.mrb[14].mxu0 }
0x1bf2   : > { %v2181_v47 = vadd.f32 %v4254_v19, %v2180_v13  ;;  %v3476_v52 = vpop.f32.mrb[15].mxu0 }
0x1bf4   : > { %2192 = vrot.lane.b32.xlu0 %v2181_v47, %s3789_s2  ;;  %v2184_v56 = vadd.f32 %v2181_v47, %v2108_v55 }
0x1bf6   : > { %v3216_v27 = vmul.f32 -1.442695, %v2184_v56 }
0x1bf8   : > { %3731 = vpow2.f32 %v3216_v27  ;;  %v2330_v27 = vld [vmem:[#allocation3 + $0x10] sm:$0xf] }
0x1c02   : > { %v3732_v58 = vpop.eup %3731 }
0x1c03   : > { %v2188_v35 = vadd.f32 1.0, %v3732_v58 }
0x1c05   : > { %3733 = vrcp.f32 %v2188_v35 }
0x1c0f   : > { %v3734_v60 = vpop.eup %3733 }
0x1c10   : > { %v2202_v6 = vsub.f32 1.0, %v3734_v60  ;;  %v2208_v12 = vmul.f32 %v3734_v60, %v4306_v61 }
0x1c66   : > { %v2193_v62 = vpop.permute.xlu0 %2192 }
0x1c67   : > { %v2195_v0 = vmul.f32 %v3734_v60, %v2193_v62 }
0x1c69   : > { %2197 = vrot.lane.b32.xlu1 %v2195_v0, %s3789_s2 }
0x1cdb   : > { %v2198_v1 = vpop.permute.xlu1 %2197 }
0x1cdc   : > { %v2200_v3 = vadd.f32 %v2198_v1, %v2108_v55 }
0x1cde   : > { %3735 = vtanh.f32 %v2200_v3 }
0x1ce8   : > { %v3736_v5 = vpop.eup %3735 }
0x1ce9   : > { %2204 = vrot.lane.b32.xlu0 %v3736_v5, %s3790_s23 }
0x1d5b   : > { %v2205_v7 = vpop.permute.xlu0 %2204 }
0x1d5c   : > { %v2207_v10 = vmul.f32 %v2205_v7, %v2202_v6 }
0x1d5e   : > { %v2209_v16 = vadd.f32 %v2208_v12, %v2207_v10 }
0x1d60   : > { %v2210_v17 = vmul.f32 %v2209_v16, %v4047_v43 }
0x1d62   : > { %v4325_v22 = vadd.f32 %v2211_v42, %v2210_v17 }
0x1d64   : > { %2221 = vrot.lane.b32.xlu1 %v4325_v22, %s3790_s23  ;;  %v2322_v13 = vmul.f32 %v4325_v22, %v4076_v21 }
0x1dd6   : > { %v2222_v20 = vpop.permute.xlu1 %2221 }
0x1dd7   : > { %3486 = vmatmul.mubr.msk.f32.vlgmr.msra.gmra.mrb[14].mxu1 %vm754_vm4, %v2222_v20 }
0x1dd8   : > { %3628 = vmatpush3.bf16.msra.mxu1 %v4187_v45  ;;  %3507 = vmatprep.mubr.msk.f32.mxu1 %vm3785_vm2, %v3786_v9 }
0x1dd9   : > { %3629 = vmatprep.subr.bf16.mxu1 %v3784_v2 }
0x1ddc   : > { %3631 = vmatpush3.bf16.msra.mxu1 %v4195_v48 }
0x1ddd   : > { %3638 = vmatprep.subr.bf16.mxu1 %v3784_v2 }
0x1eaa   : > { %v2291_v49 = vpop.f32.mrb[14].mxu1 }
0x1eab   : > { %v2292_v23 = vadd.f32 %v4254_v19, %v2291_v49  ;;  %v3487_v26 = vpop.f32.mrb[15].mxu1 }
0x1ead   : > { %2303 = vrot.lane.b32.xlu0 %v2292_v23, %s3789_s2  ;;  %v2295_v29 = vadd.f32 %v2292_v23, %v2219_v28 }
0x1eaf   : > { %v3218_v30 = vmul.f32 -1.442695, %v2295_v29 }
0x1eb1   : > { %3737 = vpow2.f32 %v3218_v30  ;;  %v2441_v30 = vld [vmem:[#allocation3 + $0x14] sm:$0xf] }
0x1ebb   : > { %v3738_v32 = vpop.eup %3737 }
0x1ebc   : > { %v2299_v33 = vadd.f32 1.0, %v3738_v32 }
0x1ebe   : > { %3739 = vrcp.f32 %v2299_v33 }
0x1ec8   : > { %v3740_v34 = vpop.eup %3739 }
0x1ec9   : > { %v2313_v39 = vsub.f32 1.0, %v3740_v34  ;;  %v2319_v53 = vmul.f32 %v3740_v34, %v4325_v22 }
0x1f1f   : > { %v2304_v36 = vpop.permute.xlu0 %2303 }
0x1f20   : > { %v2306_v11 = vmul.f32 %v3740_v34, %v2304_v36 }
0x1f22   : > { %2308 = vrot.lane.b32.xlu1 %v2306_v11, %s3789_s2 }
0x1f94   : > { %v2309_v24 = vpop.permute.xlu1 %2308 }
0x1f95   : > { %v2311_v37 = vadd.f32 %v2309_v24, %v2219_v28 }
0x1f97   : > { %3741 = vtanh.f32 %v2311_v37 }
0x1fa1   : > { %v3742_v38 = vpop.eup %3741 }
0x1fa2   : > { %2315 = vrot.lane.b32.xlu0 %v3742_v38, %s3790_s23 }
0x2014   : > { %v2316_v40 = vpop.permute.xlu0 %2315 }
0x2015   : > { %v2318_v54 = vmul.f32 %v2316_v40, %v2313_v39 }
0x2017   : > { %v2320_v41 = vadd.f32 %v2319_v53, %v2318_v54 }
0x2019   : > { %v2321_v46 = vmul.f32 %v2320_v41, %v4073_v15 }
0x201b   : > { %v4344_v47 = vadd.f32 %v2322_v13, %v2321_v46 }
0x201d   : > { %2332 = vrot.lane.b32.xlu1 %v4344_v47, %s3790_s23  ;;  %v2433_v49 = vmul.f32 %v4344_v47, %v4101_v57 }
0x208f   : > { %v2333_v52 = vpop.permute.xlu1 %2332 }
0x2090   : > { %3497 = vmatmul.mubr.msk.f32.vlgmr.msra.gmra.mrb[16].mxu0 %vm754_vm4, %v2333_v52 }
0x2091   : > { %3634 = vmatpush3.bf16.msra.mxu0 %v4187_v45  ;;  %3518 = vmatprep.mubr.msk.f32.mxu0 %vm3785_vm2, %v3786_v9 }
0x2092   : > { %3635 = vmatprep.subr.bf16.mxu0 %v3784_v2 }
0x2095   : > { %3637 = vmatpush3.bf16.msra.mxu0 %v4195_v48 }
0x2163   : > { %v2402_v55 = vpop.f32.mrb[16].mxu0 }
0x2164   : > { %v2403_v21 = vadd.f32 %v4254_v19, %v2402_v55  ;;  %v3498_v56 = vpop.f32.mrb[17].mxu0 }
0x2165   : > { %v2552_v56 = vld [vmem:[#allocation3 + $0x18] sm:$0xf] }
0x2166   : > { %2414 = vrot.lane.b32.xlu0 %v2403_v21, %s3789_s2  ;;  %v2406_v58 = vadd.f32 %v2403_v21, %v2330_v27 }
0x2168   : > { %v3220_v35 = vmul.f32 -1.442695, %v2406_v58 }
0x216a   : > { %3743 = vpow2.f32 %v3220_v35 }
0x2174   : > { %v3744_v60 = vpop.eup %3743 }
0x2175   : > { %v2410_v62 = vadd.f32 1.0, %v3744_v60 }
0x2177   : > { %3745 = vrcp.f32 %v2410_v62 }
0x2181   : > { %v3746_v0 = vpop.eup %3745 }
0x2182   : > { %v2424_v12 = vsub.f32 1.0, %v3746_v0  ;;  %v2430_v16 = vmul.f32 %v3746_v0, %v4344_v47 }
0x21d8   : > { %v2415_v1 = vpop.permute.xlu0 %2414 }
0x21d9   : > { %v2417_v3 = vmul.f32 %v3746_v0, %v2415_v1 }
0x21db   : > { %2419 = vrot.lane.b32.xlu1 %v2417_v3, %s3789_s2 }
0x224d   : > { %v2420_v5 = vpop.permute.xlu1 %2419 }
0x224e   : > { %v2422_v6 = vadd.f32 %v2420_v5, %v2330_v27 }
0x2250   : > { %3747 = vtanh.f32 %v2422_v6 }
0x225a   : > { %v3748_v7 = vpop.eup %3747 }
0x225b   : > { %2426 = vrot.lane.b32.xlu0 %v3748_v7, %s3790_s23 }
0x22cd   : > { %v2427_v10 = vpop.permute.xlu0 %2426 }
0x22ce   : > { %v2429_v17 = vmul.f32 %v2427_v10, %v2424_v12 }
0x22d0   : > { %v2431_v42 = vadd.f32 %v2430_v16, %v2429_v17 }
0x22d2   : > { %v2432_v20 = vmul.f32 %v2431_v42, %v4098_v50 }
0x22d4   : > { %v4362_v23 = vadd.f32 %v2433_v49, %v2432_v20 }
0x22d6   : > { %2443 = vrot.lane.b32.xlu1 %v4362_v23, %s3790_s23  ;;  %v2544_v41 = vmul.f32 %v4362_v23, %v4127_v31 }
0x2348   : > { %v2444_v26 = vpop.permute.xlu1 %2443 }
0x2349   : > { %3508 = vmatmul.mubr.msk.f32.vlgmr.msra.gmra.mrb[16].mxu1 %vm754_vm4, %v2444_v26 }
0x234a   : > { %3640 = vmatpush3.bf16.msra.mxu1 %v4187_v45  ;;  %3529 = vmatprep.mubr.msk.f32.mxu1 %vm3785_vm2, %v3786_v9 }
0x234b   : > { %3641 = vmatprep.subr.bf16.mxu1 %v3784_v2 }
0x234e   : > { %3643 = vmatpush3.bf16.msra.mxu1 %v4195_v48 }
0x241c   : > { %v2513_v28 = vpop.f32.mrb[16].mxu1 }
0x241d   : > { %v2514_v57 = vadd.f32 %v4254_v19, %v2513_v28  ;;  %v3509_v29 = vpop.f32.mrb[17].mxu1 }
0x241e   : > { %v2663_v29 = vld [vmem:[#allocation3 + $0x1c] sm:$0xf] }
0x241f   : > { %2525 = vrot.lane.b32.xlu0 %v2514_v57, %s3789_s2  ;;  %v2517_v32 = vadd.f32 %v2514_v57, %v2441_v30 }
0x2421   : > { %v3222_v33 = vmul.f32 -1.442695, %v2517_v32 }
0x2423   : > { %3749 = vpow2.f32 %v3222_v33 }
0x242d   : > { %v3750_v34 = vpop.eup %3749 }
0x242e   : > { %v2521_v36 = vadd.f32 1.0, %v3750_v34 }
0x2430   : > { %3751 = vrcp.f32 %v2521_v36 }
0x243a   : > { %v3752_v45 = vpop.eup %3751 }
0x243b   : > { %v2535_v37 = vsub.f32 1.0, %v3752_v45  ;;  %v2541_v39 = vmul.f32 %v3752_v45, %v4362_v23 }
0x2491   : > { %v2526_v11 = vpop.permute.xlu0 %2525 }
0x2492   : > { %v2528_v9 = vmul.f32 %v3752_v45, %v2526_v11  ;;  %v2213_v11 = vmul.f32 %v4325_v22, %v4047_v43 }
0x2494   : > { %2530 = vrot.lane.b32.xlu1 %v2528_v9, %s3789_s2  ;;  %v2435_v9 = vmul.f32 %v4362_v23, %v4098_v50 }
0x2506   : > { %v2531_v2 = vpop.permute.xlu1 %2530 }
0x2507   : > { %v2533_v48 = vadd.f32 %v2531_v2, %v2441_v30 }
0x2509   : > { %3753 = vtanh.f32 %v2533_v48  ;;  %v2102_v48 = vmul.f32 %v4306_v61, %v4024_v18  ;;  %v3667_v18 = vld [vmem:[%s4536_s26] sm:$0xff]  }
0x250a   : > { %v3668_v61 = vld [vmem:[%s4537_s20] sm:$0xff]   ;;  %3532 = vmatprep.subr.bf16.mxu0 %v3667_v18 }
0x250b   : > { %3540 = vmatprep.subr.bf16.mxu1 %v3668_v61 }
0x2513   : > { %v3754_v24 = vpop.eup %3753 }
0x2514   : > { %2537 = vrot.lane.b32.xlu0 %v3754_v24, %s3790_s23  ;;  %v2324_v24 = vmul.f32 %v4344_v47, %v4073_v15 }
0x2586   : > { %v2538_v38 = vpop.permute.xlu0 %2537 }
0x2587   : > { %v2540_v40 = vmul.f32 %v2538_v38, %v2535_v37 }
0x2589   : > { %v2542_v53 = vadd.f32 %v2541_v39, %v2540_v40  ;;  %v3670_v40 = vld [vmem:[%s4537_s20 + $0x8] sm:$0xff]  }
0x258b   : > { %v2543_v54 = vmul.f32 %v2542_v53, %v4124_v25 }
0x258d   : > { %v4380_v46 = vadd.f32 %v2544_v41, %v2543_v54 }
0x258f   : > { %2554 = vrot.lane.b32.xlu1 %v4380_v46, %s3790_s23  ;;  %v2655_v42 = vmul.f32 %v4380_v46, %v4147_v4  ;;  %v2546_v37 = vmul.f32 %v4380_v46, %v4124_v25  ;;  %v3669_v25 = vld [vmem:[%s4536_s26 + $0x8] sm:$0xff]  }
0x2601   : > { %v2555_v13 = vpop.permute.xlu1 %2554 }
0x2602   : > { %3519 = vmatmul.mubr.msk.f32.vlgmr.msra.gmra.mrb[18].mxu0 %vm754_vm4, %v2555_v13 }
0x2603   : > { %3533 = vmatpush3.bf16.msra.mxu0 %v3667_v18 }
0x2604   : > { %3534 = vmatprep.subr.bf16.mxu0 %v3669_v25 }
0x2607   : > { %3535 = vmatpush3.bf16.msra.mxu0 %v3669_v25 }
0x26d5   : > { %v2624_v52 = vpop.f32.mrb[18].mxu0 }
0x26d6   : > { %v2625_v55 = vadd.f32 %v4254_v19, %v2624_v52  ;;  %v3520_v21 = vpop.f32.mrb[19].mxu0 }
0x26d8   : > { %2636 = vrot.lane.b32.xlu0 %v2625_v55, %s3789_s2  ;;  %v2628_v27 = vadd.f32 %v2625_v55, %v2552_v56 }
0x26da   : > { %v3224_v58 = vmul.f32 -1.442695, %v2628_v27 }
0x26dc   : > { %3755 = vpow2.f32 %v3224_v58 }
0x26e6   : > { %v3756_v35 = vpop.eup %3755 }
0x26e7   : > { %v2632_v31 = vadd.f32 1.0, %v3756_v35 }
0x26e9   : > { %3757 = vrcp.f32 %v2632_v31 }
0x26f3   : > { %v3758_v60 = vpop.eup %3757 }
0x26f4   : > { %v2646_v6 = vsub.f32 1.0, %v3758_v60  ;;  %v2652_v12 = vmul.f32 %v3758_v60, %v4380_v46 }
0x274a   : > { %v2637_v62 = vpop.permute.xlu0 %2636 }
0x274b   : > { %v2639_v0 = vmul.f32 %v3758_v60, %v2637_v62 }
0x274d   : > { %2641 = vrot.lane.b32.xlu1 %v2639_v0, %s3789_s2 }
0x27bf   : > { %v2642_v1 = vpop.permute.xlu1 %2641 }
0x27c0   : > { %v2644_v3 = vadd.f32 %v2642_v1, %v2552_v56 }
0x27c2   : > { %3759 = vtanh.f32 %v2644_v3 }
0x27cc   : > { %v3760_v5 = vpop.eup %3759 }
0x27cd   : > { %2648 = vrot.lane.b32.xlu0 %v3760_v5, %s3790_s23 }
0x283f   : > { %v2649_v7 = vpop.permute.xlu0 %2648 }
0x2840   : > { %v2651_v10 = vmul.f32 %v2649_v7, %v2646_v6 }
0x2842   : > { %v2653_v16 = vadd.f32 %v2652_v12, %v2651_v10 }
0x2844   : > { %v2654_v17 = vmul.f32 %v2653_v16, %v4144_v63 }
0x2846   : > { %v4393_v20 = vadd.f32 %v2655_v42, %v2654_v17 }
0x2848   : > { %2665 = vrot.lane.b32.xlu1 %v4393_v20, %s3790_s23  ;;  %v2657_v2 = vmul.f32 %v4393_v20, %v4144_v63  ;;  %v2766_v46 = vmul.f32 %v4393_v20, %v4197_v51 }
0x28ba   : > { %v2666_v49 = vpop.permute.xlu1 %2665 }
0x28bb   : > { %3530 = vmatmul.mubr.msk.f32.vlgmr.msra.gmra.mrb[18].mxu1 %vm754_vm4, %v2666_v49 }
0x28bc   : > { %3541 = vmatpush3.bf16.msra.mxu1 %v3668_v61 }
0x28bd   : > { %3542 = vmatprep.subr.bf16.mxu1 %v3670_v40 }
0x28c0   : > { %3543 = vmatpush3.bf16.msra.mxu1 %v3670_v40 }
0x298e   : > { %v2735_v26 = vpop.f32.mrb[18].mxu1 }
0x298f   : > { %v2736_v28 = vadd.f32 %v4254_v19, %v2735_v26  ;;  %v3531_v57 = vpop.f32.mrb[19].mxu1  ;;  %v1991_v19 = vmul.f32 %v4287_v8, %v4000_v44 }
0x2991   : > { %2747 = vrot.lane.b32.xlu0 %v2736_v28, %s3789_s2  ;;  %v2739_v30 = vadd.f32 %v2736_v28, %v2663_v29 }
0x2993   : > { %v3226_v32 = vmul.f32 -1.442695, %v2739_v30 }
0x2995   : > { %3761 = vpow2.f32 %v3226_v32 }
0x299f   : > { %v3762_v33 = vpop.eup %3761 }
0x29a0   : > { %v2743_v4 = vadd.f32 1.0, %v3762_v33 }
0x29a2   : > { %3763 = vrcp.f32 %v2743_v4 }
0x29ac   : > { %v3764_v34 = vpop.eup %3763 }
0x29ad   : > { %v2757_v38 = vsub.f32 1.0, %v3764_v34  ;;  %v2763_v47 = vmul.f32 %v3764_v34, %v4393_v20 }
0x2a03   : > { %v2748_v36 = vpop.permute.xlu0 %2747 }
0x2a04   : > { %v2750_v45 = vmul.f32 %v3764_v34, %v2748_v36  ;;  %v2954_v34 = vld [vmem:[%s3903_s24 + $0x10] sm:$0xff]  ;;  %v2952_v36 = vld [vmem:[%s3903_s24] sm:$0xff] }
0x2a06   : > { %2752 = vrot.lane.b32.xlu1 %v2750_v45, %s3789_s2  ;;  %s4539_s2 = sld [smem:[#allocation9_spill]] }
0x2a0a   : > { %1993 = vrot.lane.b32.xlu1 %v1991_v19, %s3790_s23  ;;  %v2955_v19 = vld [vmem:[%s3903_s24 + $0x18] sm:$0xff] }
0x2a0c   : > { %v3227_v0 = vld [vmem:[%s4539_s2] ss:$0 sm:$0xff] }
0x2a0e   : > { %2215 = vrot.lane.b32.xlu1 %v2213_v11, %s3790_s23 }
0x2a12   : > { %2437 = vrot.lane.b32.xlu1 %v2435_v9, %s3790_s23 }
0x2a16   : > { %2659 = vrot.lane.b32.xlu1 %v2657_v2, %s3790_s23  ;;  %v2953_v2 = vld [vmem:[%s3903_s24 + $0x8] sm:$0xff] }
0x2a1a   : > { %1776 = vrot.lane.b32.xlu1 %v4242_v14, %s3790_s23 }
0x2a78   : > { %v2753_v44 = vpop.permute.xlu1 %2752 }
0x2a79   : > { %v2755_v8 = vadd.f32 %v2753_v44, %v2663_v29 }
0x2a7b   : > { %3765 = vtanh.f32 %v2755_v8 }
0x2a7c   : > { %v1994_v43 = vpop.permute.xlu1 %1993 }
0x2a7d   : > { %1996 = vst.msk [vmem:[%s3908_s27] sm:$0xf] %vm884_vm13, %v1994_v43 }
0x2a80   : > { %v2216_v22 = vpop.permute.xlu1 %2215 }
0x2a81   : > { %2218 = vst.msk [vmem:[%s3908_s27 + $0x8] sm:$0xf] %vm884_vm13, %v2216_v22 }
0x2a84   : > { %v2438_v50 = vpop.permute.xlu1 %2437 }
0x2a85   : > { %v3766_v23 = vpop.eup %3765  ;;  %2440 = vst.msk [vmem:[%s3908_s27 + $0x10] sm:$0xf] %vm884_vm13, %v2438_v50 }
0x2a86   : > { %2759 = vrot.lane.b32.xlu0 %v3766_v23, %s3790_s23 }
0x2a88   : > { %v2660_v63 = vpop.permute.xlu1 %2659 }
0x2a89   : > { %2662 = vst.msk [vmem:[%s3908_s27 + $0x18] sm:$0xf] %vm884_vm13, %v2660_v63 }
0x2a8a   : > { %2104 = vrot.lane.b32.xlu0 %v2102_v48, %s3790_s23 }
0x2a8c   : > { %v1777_v14 = vpop.permute.xlu1 %1776 }
0x2a8d   : > { %1779 = vst.msk [vmem:[#allocation2] sm:$0xf] %vm884_vm13, %v1777_v14 }
0x2a8e   : > { %2326 = vrot.lane.b32.xlu0 %v2324_v24, %s3790_s23 }
0x2a92   : > { %2548 = vrot.lane.b32.xlu0 %v2546_v37, %s3790_s23 }
0x2af8   : > { %v2760_v15 = vpop.permute.xlu0 %2759 }
0x2af9   : > { %v2762_v39 = vmul.f32 %v2760_v15, %v2757_v38 }
0x2afb   : > { %v2764_v53 = vadd.f32 %v2763_v47, %v2762_v39 }
0x2afc   : > { %v2105_v54 = vpop.permute.xlu0 %2104 }
0x2afd   : > { %v2765_v41 = vmul.f32 %v2764_v53, %v4227_v59  ;;  %2107 = vst.msk [vmem:[%s3908_s27 + $0x4] sm:$0xf] %vm884_vm13, %v2105_v54 }
0x2aff   : > { %v2767_v13 = vadd.f32 %v2766_v46, %v2765_v41 }
0x2b00   : > { %v2327_v52 = vpop.permute.xlu0 %2326 }
0x2b01   : > { %2329 = vst.msk [vmem:[%s3908_s27 + $0xc] sm:$0xf] %vm884_vm13, %v2327_v52  ;;  %v2768_v55 = vmul.f32 %v2767_v13, %v4227_v59  ;;  %v3232_v59 = vld [vmem:[%s4538_s30] ss:$0 sm:$0xff] }
0x2b03   : > { %2770 = vrot.lane.b32.xlu0 %v2768_v55, %s3790_s23 }
0x2b04   : > { %v2549_v21 = vpop.permute.xlu0 %2548  ;;  %v2779_v27 = vld [vmem:[%s3908_s27] sm:$0xff] }
0x2b05   : > { %2551 = vst.msk [vmem:[%s3908_s27 + $0x14] sm:$0xf] %vm884_vm13, %v2549_v21 }
0x2b07   : > { %2775 = vrot.lane.b32.xlu0 %v2767_v13, %s3790_s23 }
0x2b08   : > { %v2780_v58 = vld [vmem:[%s3908_s27 + $0x8] sm:$0xff] }
0x2b09   : > { %v2783_v31 = vpack.c.bf16 %v2780_v58, %v2779_v27 }
0x2b0b   : > { %3536 = vmatprep.mubr.msk.bf16.mxu0 %vm754_vm4, %v2783_v31  ;;  %3544 = vmatprep.mubr.msk.bf16.mxu1 %vm754_vm4, %v2783_v31 }
0x2b0c   : > { %v2781_v35 = vld [vmem:[%s3908_s27 + $0x10] sm:$0xff] }
0x2b75   : > { %v2771_v56 = vpop.permute.xlu0 %2770 }
0x2b76   : > { %2773 = vst.msk [vmem:[%s3908_s27 + $0x1c] sm:$0xf] %vm884_vm13, %v2771_v56 }
0x2b79   : > { %v2776_v51 = vpop.permute.xlu0 %2775 }
0x2b7a   : > { %2778 = vst.msk [vmem:[#allocation2 + $0x4] sm:$0xf] %vm884_vm13, %v2776_v51 }
0x2b7d   : > { %v2782_v60 = vld [vmem:[%s3908_s27 + $0x18] sm:$0xff] }
0x2b7e   : > { %v2784_v62 = vpack.c.bf16 %v2782_v60, %v2781_v35 }
0x2b80   : > { %3537 = vmatmul.mubr.msk.bf16.vlgmr.msra.gmra.mrb[20].mxu0 %vm754_vm4, %v2784_v62  ;;  %3545 = vmatmul.mubr.msk.bf16.vlgmr.msra.gmra.mrb[20].mxu1 %vm754_vm4, %v2784_v62 }
0x2c53   : > { %v3538_v1 = vpop.f32.mrb[20].mxu0  ;;  %v3546_v3 = vpop.f32.mrb[20].mxu1 }
0x2c54   : > { %v2929_v5 = vadd.f32 %v3546_v3, %v3232_v59  ;;  %v2848_v6 = vpop.f32.mrb[21].mxu0  ;;  %v2920_v7 = vpop.f32.mrb[21].mxu1  ;;  %v2857_v30 = vadd.f32 %v3538_v1, %v3227_v0 }
0x2c55   : > { %v2849_v12 = vadd.f32 %v3227_v0, %v2848_v6  ;;  %v2921_v10 = vadd.f32 %v3232_v59, %v2920_v7  ;;  %v3539_v16 = vpop.f32.mrb[22].mxu0  ;;  %v3547_v17 = vpop.f32.mrb[22].mxu1 }
0x2c56   : > { %v2948_v42 = vmul.f32 1.442695, %v2929_v5  ;;  %v2932_v20 = vadd.f32 %v3547_v17, %v3232_v59  ;;  %v2851_v49 = vpop.f32.mrb[23].mxu0  ;;  %v2923_v26 = vpop.f32.mrb[23].mxu1  ;;  %v2860_v33 = vadd.f32 %v3539_v16, %v3227_v0  ;;  %2938 = vst.msk [vmem:[%s3913_s13 + $0x10] sm:$0xff] %vm2935_vm14, %v2857_v30  ;;  %2942 = vst.msk [vmem:[%s3918_s19 + $0x10] sm:$0xff] %vm2935_vm14, %v2929_v5 }
0x2c57   : > { %2936 = vst.msk [vmem:[%s3913_s13] sm:$0xff] %vm2935_vm14, %v2849_v12  ;;  %2940 = vst.msk [vmem:[%s3918_s19] sm:$0xff] %vm2935_vm14, %v2921_v10  ;;  %v2944_v28 = vmul.f32 1.442695, %v2921_v10  ;;  %v2852_v57 = vadd.f32 %v3227_v0, %v2851_v49  ;;  %v2924_v29 = vadd.f32 %v3232_v59, %v2923_v26 }
0x2c58   : > { %3767 = vpow2.f32 %v2948_v42  ;;  %v2950_v32 = vmul.f32 1.442695, %v2932_v20  ;;  %2939 = vst.msk [vmem:[%s3913_s13 + $0x18] sm:$0xff] %vm2935_vm14, %v2860_v33  ;;  %2943 = vst.msk [vmem:[%s3918_s19 + $0x18] sm:$0xff] %vm2935_vm14, %v2932_v20 }
0x2c59   : > { %3769 = vpow2.f32 %v2944_v28  ;;  %2937 = vst.msk [vmem:[%s3913_s13 + $0x8] sm:$0xff] %vm2935_vm14, %v2852_v57  ;;  %2941 = vst.msk [vmem:[%s3918_s19 + $0x8] sm:$0xff] %vm2935_vm14, %v2924_v29  ;;  %v2946_v4 = vmul.f32 1.442695, %v2924_v29 }
0x2c5a   : > { %3771 = vpow2.f32 %v2950_v32 }
0x2c5b   : > { %3773 = vpow2.f32 %v2946_v4 }
0x2c62   : > { %v3768_v45 = vpop.eup %3767 }
0x2c63   : > { %v3770_v11 = vpop.eup %3769  ;;  %v2958_v9 = vmul.f32 %v3768_v45, %v2954_v34 }
0x2c64   : > { %v3772_v44 = vpop.eup %3771  ;;  %v2956_v8 = vmul.f32 %v3770_v11, %v2952_v36 }
0x2c65   : > { %v3774_v43 = vpop.eup %3773  ;;  %v2962_v22 = vadd.f32 %v2958_v9, %v2857_v30  ;;  %v2959_v50 = vmul.f32 %v3772_v44, %v2955_v19 }
0x2c66   : > { %v2960_v23 = vadd.f32 %v2956_v8, %v2849_v12  ;;  %v2957_v63 = vmul.f32 %v3774_v43, %v2953_v2 }
0x2c67   : > { %v2963_v48 = vadd.f32 %v2959_v50, %v2860_v33  ;;  %v3245_v18 = vpack.c.bf16 %v2962_v22, %v2962_v22 }
0x2c68   : > { %v3243_v14 = vpack.c.bf16 %v2960_v23, %v2960_v23  ;;  %v2961_v24 = vadd.f32 %v2957_v63, %v2852_v57 }
0x2c69   : > { %v3246_v61 = vpack.c.bf16 %v2963_v48, %v2963_v48  ;;  %2983 = vst.msk [vmem:[%s3923_s22 + $0x8] sm:$0xf] %vm2980_vm15, %v3245_v18 }
0x2c6a   : > { %2981 = vst.msk [vmem:[%s3923_s22] sm:$0xf] %vm2980_vm15, %v3243_v14  ;;  %v3244_v37 = vpack.c.bf16 %v2961_v24, %v2961_v24 }
0x2c6b   : > { %2984 = vst.msk [vmem:[%s3923_s22 + $0xc] sm:$0xf] %vm2980_vm15, %v3246_v61 }
0x2c6c   : > { %2982 = vst.msk [vmem:[%s3923_s22 + $0x4] sm:$0xf] %vm2980_vm15, %v3244_v37 }
0x2c6d PF: > { %s4540_s13 = sld [smem:[#allocation4_spill]] }
0x2c73   : > { %s29_s27 = sadd.s32 1, %s4540_s13  }
0x2c74   : > { %p26_p5 = scmp.ge.s32.totalorder %s29_s27, 4  }
0x2c76   :  { %28 = sbr.rel (!%p26_p5) target bundleno = 8 (0x8), region = 154 }

</bundles_post_ra>
